<compile_context>
chip_gen: v5e
topology: v5e:2x2
jax: 0.10.0
libtpu: 0.0.40
codegen_flags: <defaults>
</compile_context>

<pallas_src>
import jax
import jax.numpy as jnp
import numpy as np
from jax import lax
from jax.experimental import pallas as pl
from jax.experimental.pallas import tpu as pltpu


# ----------------------------- fused kernel ---------------------------------
def rnn_classifier_kernel(lens_ref, x_ref, wih_ref, whh_ref, b_ref,
                          w1_ref, b1_ref, w2_ref, b2_ref,
                          out_ref, xproj_scr):
    TB, D = x_ref.shape                 # x is time-major, flattened: (T*B, D)
    H = whh_ref.shape[0]
    B = lens_ref.shape[0]
    T = TB // B                         # static at trace time

    # ---- Phase 1: hoisted input projection (one MXU matmul, bias folded in) ----
    xproj_scr[...] = (jnp.dot(x_ref[...], wih_ref[...],
                              preferred_element_type=jnp.float32)
                      + b_ref[...])                               # (T*B, 4H)

    lens = lens_ref[...]                # (B, 1) int32, loaded ONCE (not per step)
    whh = whh_ref[...]                  # resident (H, 4H)

    # ---- Phase 2: serial recurrence, one MXU push + elementwise per step ----
    def step(t, carry):
        h, c = carry
        off = pl.multiple_of(t * B, B)                            # sublane-aligned
        gates = xproj_scr[pl.ds(off, B), :] + jnp.dot(
            h, whh, preferred_element_type=jnp.float32)           # (B, 4H)
        # PyTorch gate order: i, f, g, o ; H=128 -> lane-aligned slices.
        i_g = jax.nn.sigmoid(gates[:, 0 * H:1 * H])
        f_g = jax.nn.sigmoid(gates[:, 1 * H:2 * H])
        g_g = jnp.tanh(gates[:, 2 * H:3 * H])
        o_g = jax.nn.sigmoid(gates[:, 3 * H:4 * H])
        c_new = f_g * c + i_g * g_g
        h_new = o_g * jnp.tanh(c_new)
        valid = t < lens                                          # packed-seq mask
        return jnp.where(valid, h_new, h), jnp.where(valid, c_new, c)

    h0 = jnp.zeros((B, H), jnp.float32)
    c0 = jnp.zeros((B, H), jnp.float32)
    h, _ = lax.fori_loop(0, T, step, (h0, c0), unroll=True)

    # pad_packed_sequence zero-pads: RNN_out[:, -1, :] is zero unless len == T_max.
    h_last = jnp.where(lens == T, h, 0.0)

    # ---- Phase 3: fused classification head (Dropout = identity at inference) ----
    z = jnp.maximum(
        jnp.dot(h_last, w1_ref[...], preferred_element_type=jnp.float32) + b1_ref[...],
        0.0)
    y = jnp.dot(z, w2_ref[...], preferred_element_type=jnp.float32) + b2_ref[...]
    out_ref[...] = jax.nn.sigmoid(y)


# ------------------------------- wrapper ------------------------------------
def rnn_classifier_forward(params, input_seq, seq_lengths):
    """Pallas implementation of RNNClassifier.forward. Returns (B, 1, 1)."""
    B, _, D = input_seq.shape
    seq_lengths = np.asarray(seq_lengths, dtype=np.int32)
    # NOTE: max length is baked into the trace (one compile per distinct T_max),
    # matching pad_packed_sequence trimming to max(seq_lengths).
    T = int(seq_lengths.max())

    wih, whh, b = params["wih"], params["whh"], params["b"]
    w1, b1, w2, b2 = params["w1"], params["b1"], params["w2"], params["b2"]
    H = whh.shape[0]

    # Pad batch to a multiple of 8 sublanes (padded rows have len=0 -> inert).
    Bp = -(-B // 8) * 8
    x = input_seq[:, :T, :]
    if Bp != B:
        x = jnp.concatenate([x, jnp.zeros((Bp - B, T, D), x.dtype)], axis=0)
        lens_np = np.concatenate([seq_lengths, np.zeros(Bp - B, np.int32)])
    else:
        lens_np = seq_lengths

    # Time-major, flattened so the input projection is one big matmul.
    x_tm = jnp.transpose(x, (1, 0, 2)).reshape(T * Bp, D)         # (T*Bp, D)
    lens = jnp.asarray(lens_np, jnp.int32).reshape(Bp, 1)

    out = pl.pallas_call(
        rnn_classifier_kernel,
        out_shape=jax.ShapeDtypeStruct((Bp, 1), jnp.float32),
        scratch_shapes=[pltpu.VMEM((T * Bp, 4 * H), jnp.float32)],  # x_proj
    )(lens, x_tm, wih, whh, b, w1, b1, w2, b2)

    return out[:B, :, None]             # == classification_head(RNN_out[:, -1, :]).unsqueeze(-1)


# ---------------------------- param init ------------------------------------
def init_params(key, input_size, hidden, head):
    ks = jax.random.split(key, 8)
    kH = 1.0 / np.sqrt(hidden)          # PyTorch LSTM / Linear default init range
    kC = 1.0 / np.sqrt(head)

    def u(k, shape, scale):
        return jax.random.uniform(k, shape, jnp.float32, -scale, scale)

    return dict(
        wih=u(ks[0], (input_size, 4 * hidden), kH),               # = weight_ih_l0.T
        whh=u(ks[1], (hidden, 4 * hidden), kH),                   # = weight_hh_l0.T
        b=u(ks[2], (1, 4 * hidden), kH) + u(ks[3], (1, 4 * hidden), kH),  # b_ih + b_hh
        w1=u(ks[4], (hidden, head), kH),                          # Linear(hidden, head).weight.T
        b1=u(ks[5], (1, head), kH),
        w2=u(ks[6], (head, 1), kC),                               # Linear(head, 1).weight.T
        b2=u(ks[7], (1, 1), kC),
    )


# --------------------------- pure-JAX reference ------------------------------
def reference_forward(params, input_seq, seq_lengths):
    B, _, _ = input_seq.shape
    lens = jnp.asarray(np.asarray(seq_lengths, np.int32))
    T = int(np.asarray(seq_lengths).max())
    x = input_seq[:, :T, :]
    H = params["whh"].shape[0]
    h = jnp.zeros((B, H), jnp.float32)
    c = jnp.zeros((B, H), jnp.float32)
    for t in range(T):
        gates = x[:, t, :] @ params["wih"] + h @ params["whh"] + params["b"]
        i, f, g, o = jnp.split(gates, 4, axis=-1)
        i, f, o = jax.nn.sigmoid(i), jax.nn.sigmoid(f), jax.nn.sigmoid(o)
        g = jnp.tanh(g)
        c_new = f * c + i * g
        h_new = o * jnp.tanh(c_new)
        valid = (t < lens)[:, None]
        h = jnp.where(valid, h_new, h)
        c = jnp.where(valid, c_new, c)
    h_last = jnp.where((lens == T)[:, None], h, 0.0)
    z = jnp.maximum(h_last @ params["w1"] + params["b1"], 0.0)
    y = jax.nn.sigmoid(z @ params["w2"] + params["b2"])
    return y[:, :, None]


if __name__ == "__main__":
    B, T, D = 2, 8, 16                  # batch, seq len, input_size
    HIDDEN, HEAD = 128, 128             # rnn_embeding_size, classification_head_size

    key = jax.random.PRNGKey(0)
    kp, kx = jax.random.split(key)
    params = init_params(kp, D, HIDDEN, HEAD)
    input_seq = jax.random.normal(kx, (B, T, D), jnp.float32)
    seq_lengths = np.array([8, 5], dtype=np.int32)   # enforce_sorted=False -> any order OK

    pred = rnn_classifier_forward(params, input_seq, seq_lengths)
    pred = jax.block_until_ready(pred)

    ref = reference_forward(params, input_seq, seq_lengths)
    assert pred.shape == (B, 1, 1), pred.shape
    assert jnp.allclose(pred, ref, atol=5e-5, rtol=5e-5), (pred, ref)
    print("KERNEL_OK")
</pallas_src>

<mosaic_0001>
module attributes {stable_mosaic.version = 11 : i64} {
  func.func @rnn_classifier_kernel(%arg0: memref<8x1xi32, #tpu.memory_space<vmem>>, %arg1: memref<64x16xf32, #tpu.memory_space<vmem>>, %arg2: memref<16x512xf32, #tpu.memory_space<vmem>>, %arg3: memref<128x512xf32, #tpu.memory_space<vmem>>, %arg4: memref<1x512xf32, #tpu.memory_space<vmem>>, %arg5: memref<128x128xf32, #tpu.memory_space<vmem>>, %arg6: memref<1x128xf32, #tpu.memory_space<vmem>>, %arg7: memref<128x1xf32, #tpu.memory_space<vmem>>, %arg8: memref<1x1xf32, #tpu.memory_space<vmem>>, %arg9: memref<8x1xf32, #tpu.memory_space<vmem>>, %arg10: memref<64x512xf32, #tpu.memory_space<vmem>>) attributes {dimension_semantics = [], scalar_prefetch = 0 : i64, scratch_operands = 1 : i64, tpu.core_type = #tpu.core_type<tc>} {
    %c0 = arith.constant 0 : index
    %c0_0 = arith.constant 0 : index
    %0 = vector.load %arg1[%c0, %c0_0] : memref<64x16xf32, #tpu.memory_space<vmem>>, vector<64x16xf32>
    %c0_1 = arith.constant 0 : index
    %c0_2 = arith.constant 0 : index
    %1 = vector.load %arg2[%c0_1, %c0_2] : memref<16x512xf32, #tpu.memory_space<vmem>>, vector<16x512xf32>
    %cst = arith.constant dense<0.000000e+00> : vector<64x512xf32>
    %2 = tpu.matmul %0, %1, %cst {dimension_numbers = #tpu.dot_dimension_numbers<[1], [0], [0], [1], [0, 0, 1, 1], [], []>} : vector<64x16xf32>, vector<16x512xf32>, vector<64x512xf32> -> vector<64x512xf32>
    %c0_3 = arith.constant 0 : index
    %c0_4 = arith.constant 0 : index
    %3 = vector.load %arg4[%c0_3, %c0_4] : memref<1x512xf32, #tpu.memory_space<vmem>>, vector<1x512xf32>
    %4 = vector.broadcast %3 : vector<1x512xf32> to vector<64x512xf32>
    %5 = arith.addf %2, %4 : vector<64x512xf32>
    %c0_5 = arith.constant 0 : index
    %c0_6 = arith.constant 0 : index
    %6 = vector.load %arg10[%c0_5, %c0_6] : memref<64x512xf32, #tpu.memory_space<vmem>>, vector<64x512xf32>
    tpu.vector_store %arg10[%c0_5, %c0_6], %5 {strides = array<i32>} : memref<64x512xf32, #tpu.memory_space<vmem>>, vector<64x512xf32>,
    %c0_7 = arith.constant 0 : index
    %c0_8 = arith.constant 0 : index
    %7 = vector.load %arg0[%c0_7, %c0_8] : memref<8x1xi32, #tpu.memory_space<vmem>>, vector<8x1xi32>
    %c0_9 = arith.constant 0 : index
    %c0_10 = arith.constant 0 : index
    %8 = vector.load %arg3[%c0_9, %c0_10] : memref<128x512xf32, #tpu.memory_space<vmem>>, vector<128x512xf32>
    %cst_11 = arith.constant 0.000000e+00 : f32
    %9 = vector.broadcast %cst_11 : f32 to vector<8x128xf32>
    %cst_12 = arith.constant 0.000000e+00 : f32
    %10 = vector.broadcast %cst_12 : f32 to vector<8x128xf32>
    %c0_i32 = arith.constant 0 : i32
    %c8_i32 = arith.constant 8 : i32
    %11 = arith.muli %c0_i32, %c8_i32 : i32
    %12 = tpu.assume_multiple %11, 8 : i32
    %13 = arith.index_cast %12 : i32 to index
    %c0_13 = arith.constant 0 : index
    %14 = vector.load %arg10[%13, %c0_13] : memref<64x512xf32, #tpu.memory_space<vmem>>, vector<8x512xf32>
    %cst_14 = arith.constant dense<0.000000e+00> : vector<8x512xf32>
    %15 = tpu.matmul %9, %8, %cst_14 {dimension_numbers = #tpu.dot_dimension_numbers<[1], [0], [0], [1], [0, 0, 1, 1], [], []>} : vector<8x128xf32>, vector<128x512xf32>, vector<8x512xf32> -> vector<8x512xf32>
    %16 = arith.addf %14, %15 : vector<8x512xf32>
    %17 = vector.extract_strided_slice %16 {offsets = [0, 0], sizes = [8, 128], strides = [1, 1]} : vector<8x512xf32> to vector<8x128xf32>
    %18 = arith.negf %17 : vector<8x128xf32>
    %19 = math.exp %18 : vector<8x128xf32>
    %cst_15 = arith.constant 1.000000e+00 : f32
    %20 = vector.broadcast %cst_15 : f32 to vector<8x128xf32>
    %21 = arith.addf %20, %19 : vector<8x128xf32>
    %22 = arith.divf %20, %21 : vector<8x128xf32>
    %23 = vector.extract_strided_slice %16 {offsets = [0, 128], sizes = [8, 128], strides = [1, 1]} : vector<8x512xf32> to vector<8x128xf32>
    %24 = arith.negf %23 : vector<8x128xf32>
    %25 = math.exp %24 : vector<8x128xf32>
    %cst_16 = arith.constant 1.000000e+00 : f32
    %26 = vector.broadcast %cst_16 : f32 to vector<8x128xf32>
    %27 = arith.addf %26, %25 : vector<8x128xf32>
    %28 = arith.divf %26, %27 : vector<8x128xf32>
    %29 = vector.extract_strided_slice %16 {offsets = [0, 256], sizes = [8, 128], strides = [1, 1]} : vector<8x512xf32> to vector<8x128xf32>
    %30 = math.tanh %29 : vector<8x128xf32>
    %31 = vector.extract_strided_slice %16 {offsets = [0, 384], sizes = [8, 128], strides = [1, 1]} : vector<8x512xf32> to vector<8x128xf32>
    %32 = arith.negf %31 : vector<8x128xf32>
    %33 = math.exp %32 : vector<8x128xf32>
    %cst_17 = arith.constant 1.000000e+00 : f32
    %34 = vector.broadcast %cst_17 : f32 to vector<8x128xf32>
    %35 = arith.addf %34, %33 : vector<8x128xf32>
    %36 = arith.divf %34, %35 : vector<8x128xf32>
    %37 = arith.mulf %28, %10 : vector<8x128xf32>
    %38 = arith.mulf %22, %30 : vector<8x128xf32>
    %39 = arith.addf %37, %38 : vector<8x128xf32>
    %40 = math.tanh %39 : vector<8x128xf32>
    %41 = arith.mulf %36, %40 : vector<8x128xf32>
    %42 = vector.broadcast %c0_i32 : i32 to vector<8x1xi32>
    %43 = arith.cmpi slt, %42, %7 : vector<8x1xi32>
    %44 = vector.shape_cast %43 : vector<8x1xi1> to vector<8x1xi1>
    %45 = vector.broadcast %44 : vector<8x1xi1> to vector<8x128xi1>
    %46 = arith.select %45, %41, %9 : vector<8x128xi1>, vector<8x128xf32>
    %47 = vector.shape_cast %43 : vector<8x1xi1> to vector<8x1xi1>
    %48 = vector.broadcast %47 : vector<8x1xi1> to vector<8x128xi1>
    %49 = arith.select %48, %39, %10 : vector<8x128xi1>, vector<8x128xf32>
    %c1_i32 = arith.constant 1 : i32
    %c8_i32_18 = arith.constant 8 : i32
    %50 = arith.muli %c1_i32, %c8_i32_18 : i32
    %51 = tpu.assume_multiple %50, 8 : i32
    %52 = arith.index_cast %51 : i32 to index
    %c0_19 = arith.constant 0 : index
    %53 = vector.load %arg10[%52, %c0_19] : memref<64x512xf32, #tpu.memory_space<vmem>>, vector<8x512xf32>
    %cst_20 = arith.constant dense<0.000000e+00> : vector<8x512xf32>
    %54 = tpu.matmul %46, %8, %cst_20 {dimension_numbers = #tpu.dot_dimension_numbers<[1], [0], [0], [1], [0, 0, 1, 1], [], []>} : vector<8x128xf32>, vector<128x512xf32>, vector<8x512xf32> -> vector<8x512xf32>
    %55 = arith.addf %53, %54 : vector<8x512xf32>
    %56 = vector.extract_strided_slice %55 {offsets = [0, 0], sizes = [8, 128], strides = [1, 1]} : vector<8x512xf32> to vector<8x128xf32>
    %57 = arith.negf %56 : vector<8x128xf32>
    %58 = math.exp %57 : vector<8x128xf32>
    %cst_21 = arith.constant 1.000000e+00 : f32
    %59 = vector.broadcast %cst_21 : f32 to vector<8x128xf32>
    %60 = arith.addf %59, %58 : vector<8x128xf32>
    %61 = arith.divf %59, %60 : vector<8x128xf32>
    %62 = vector.extract_strided_slice %55 {offsets = [0, 128], sizes = [8, 128], strides = [1, 1]} : vector<8x512xf32> to vector<8x128xf32>
    %63 = arith.negf %62 : vector<8x128xf32>
    %64 = math.exp %63 : vector<8x128xf32>
    %cst_22 = arith.constant 1.000000e+00 : f32
    %65 = vector.broadcast %cst_22 : f32 to vector<8x128xf32>
    %66 = arith.addf %65, %64 : vector<8x128xf32>
    %67 = arith.divf %65, %66 : vector<8x128xf32>
    %68 = vector.extract_strided_slice %55 {offsets = [0, 256], sizes = [8, 128], strides = [1, 1]} : vector<8x512xf32> to vector<8x128xf32>
    %69 = math.tanh %68 : vector<8x128xf32>
    %70 = vector.extract_strided_slice %55 {offsets = [0, 384], sizes = [8, 128], strides = [1, 1]} : vector<8x512xf32> to vector<8x128xf32>
    %71 = arith.negf %70 : vector<8x128xf32>
    %72 = math.exp %71 : vector<8x128xf32>
    %cst_23 = arith.constant 1.000000e+00 : f32
    %73 = vector.broadcast %cst_23 : f32 to vector<8x128xf32>
    %74 = arith.addf %73, %72 : vector<8x128xf32>
    %75 = arith.divf %73, %74 : vector<8x128xf32>
    %76 = arith.mulf %67, %49 : vector<8x128xf32>
    %77 = arith.mulf %61, %69 : vector<8x128xf32>
    %78 = arith.addf %76, %77 : vector<8x128xf32>
    %79 = math.tanh %78 : vector<8x128xf32>
    %80 = arith.mulf %75, %79 : vector<8x128xf32>
    %81 = vector.broadcast %c1_i32 : i32 to vector<8x1xi32>
    %82 = arith.cmpi slt, %81, %7 : vector<8x1xi32>
    %83 = vector.shape_cast %82 : vector<8x1xi1> to vector<8x1xi1>
    %84 = vector.broadcast %83 : vector<8x1xi1> to vector<8x128xi1>
    %85 = arith.select %84, %80, %46 : vector<8x128xi1>, vector<8x128xf32>
    %86 = vector.shape_cast %82 : vector<8x1xi1> to vector<8x1xi1>
    %87 = vector.broadcast %86 : vector<8x1xi1> to vector<8x128xi1>
    %88 = arith.select %87, %78, %49 : vector<8x128xi1>, vector<8x128xf32>
    %c2_i32 = arith.constant 2 : i32
    %c8_i32_24 = arith.constant 8 : i32
    %89 = arith.muli %c2_i32, %c8_i32_24 : i32
    %90 = tpu.assume_multiple %89, 8 : i32
    %91 = arith.index_cast %90 : i32 to index
    %c0_25 = arith.constant 0 : index
    %92 = vector.load %arg10[%91, %c0_25] : memref<64x512xf32, #tpu.memory_space<vmem>>, vector<8x512xf32>
    %cst_26 = arith.constant dense<0.000000e+00> : vector<8x512xf32>
    %93 = tpu.matmul %85, %8, %cst_26 {dimension_numbers = #tpu.dot_dimension_numbers<[1], [0], [0], [1], [0, 0, 1, 1], [], []>} : vector<8x128xf32>, vector<128x512xf32>, vector<8x512xf32> -> vector<8x512xf32>
    %94 = arith.addf %92, %93 : vector<8x512xf32>
    %95 = vector.extract_strided_slice %94 {offsets = [0, 0], sizes = [8, 128], strides = [1, 1]} : vector<8x512xf32> to vector<8x128xf32>
    %96 = arith.negf %95 : vector<8x128xf32>
    %97 = math.exp %96 : vector<8x128xf32>
    %cst_27 = arith.constant 1.000000e+00 : f32
    %98 = vector.broadcast %cst_27 : f32 to vector<8x128xf32>
    %99 = arith.addf %98, %97 : vector<8x128xf32>
    %100 = arith.divf %98, %99 : vector<8x128xf32>
    %101 = vector.extract_strided_slice %94 {offsets = [0, 128], sizes = [8, 128], strides = [1, 1]} : vector<8x512xf32> to vector<8x128xf32>
    %102 = arith.negf %101 : vector<8x128xf32>
    %103 = math.exp %102 : vector<8x128xf32>
    %cst_28 = arith.constant 1.000000e+00 : f32
    %104 = vector.broadcast %cst_28 : f32 to vector<8x128xf32>
    %105 = arith.addf %104, %103 : vector<8x128xf32>
    %106 = arith.divf %104, %105 : vector<8x128xf32>
    %107 = vector.extract_strided_slice %94 {offsets = [0, 256], sizes = [8, 128], strides = [1, 1]} : vector<8x512xf32> to vector<8x128xf32>
    %108 = math.tanh %107 : vector<8x128xf32>
    %109 = vector.extract_strided_slice %94 {offsets = [0, 384], sizes = [8, 128], strides = [1, 1]} : vector<8x512xf32> to vector<8x128xf32>
    %110 = arith.negf %109 : vector<8x128xf32>
    %111 = math.exp %110 : vector<8x128xf32>
    %cst_29 = arith.constant 1.000000e+00 : f32
    %112 = vector.broadcast %cst_29 : f32 to vector<8x128xf32>
    %113 = arith.addf %112, %111 : vector<8x128xf32>
    %114 = arith.divf %112, %113 : vector<8x128xf32>
    %115 = arith.mulf %106, %88 : vector<8x128xf32>
    %116 = arith.mulf %100, %108 : vector<8x128xf32>
    %117 = arith.addf %115, %116 : vector<8x128xf32>
    %118 = math.tanh %117 : vector<8x128xf32>
    %119 = arith.mulf %114, %118 : vector<8x128xf32>
    %120 = vector.broadcast %c2_i32 : i32 to vector<8x1xi32>
    %121 = arith.cmpi slt, %120, %7 : vector<8x1xi32>
    %122 = vector.shape_cast %121 : vector<8x1xi1> to vector<8x1xi1>
    %123 = vector.broadcast %122 : vector<8x1xi1> to vector<8x128xi1>
    %124 = arith.select %123, %119, %85 : vector<8x128xi1>, vector<8x128xf32>
    %125 = vector.shape_cast %121 : vector<8x1xi1> to vector<8x1xi1>
    %126 = vector.broadcast %125 : vector<8x1xi1> to vector<8x128xi1>
    %127 = arith.select %126, %117, %88 : vector<8x128xi1>, vector<8x128xf32>
    %c3_i32 = arith.constant 3 : i32
    %c8_i32_30 = arith.constant 8 : i32
    %128 = arith.muli %c3_i32, %c8_i32_30 : i32
    %129 = tpu.assume_multiple %128, 8 : i32
    %130 = arith.index_cast %129 : i32 to index
    %c0_31 = arith.constant 0 : index
    %131 = vector.load %arg10[%130, %c0_31] : memref<64x512xf32, #tpu.memory_space<vmem>>, vector<8x512xf32>
    %cst_32 = arith.constant dense<0.000000e+00> : vector<8x512xf32>
    %132 = tpu.matmul %124, %8, %cst_32 {dimension_numbers = #tpu.dot_dimension_numbers<[1], [0], [0], [1], [0, 0, 1, 1], [], []>} : vector<8x128xf32>, vector<128x512xf32>, vector<8x512xf32> -> vector<8x512xf32>
    %133 = arith.addf %131, %132 : vector<8x512xf32>
    %134 = vector.extract_strided_slice %133 {offsets = [0, 0], sizes = [8, 128], strides = [1, 1]} : vector<8x512xf32> to vector<8x128xf32>
    %135 = arith.negf %134 : vector<8x128xf32>
    %136 = math.exp %135 : vector<8x128xf32>
    %cst_33 = arith.constant 1.000000e+00 : f32
    %137 = vector.broadcast %cst_33 : f32 to vector<8x128xf32>
    %138 = arith.addf %137, %136 : vector<8x128xf32>
    %139 = arith.divf %137, %138 : vector<8x128xf32>
    %140 = vector.extract_strided_slice %133 {offsets = [0, 128], sizes = [8, 128], strides = [1, 1]} : vector<8x512xf32> to vector<8x128xf32>
    %141 = arith.negf %140 : vector<8x128xf32>
    %142 = math.exp %141 : vector<8x128xf32>
    %cst_34 = arith.constant 1.000000e+00 : f32
    %143 = vector.broadcast %cst_34 : f32 to vector<8x128xf32>
    %144 = arith.addf %143, %142 : vector<8x128xf32>
    %145 = arith.divf %143, %144 : vector<8x128xf32>
    %146 = vector.extract_strided_slice %133 {offsets = [0, 256], sizes = [8, 128], strides = [1, 1]} : vector<8x512xf32> to vector<8x128xf32>
    %147 = math.tanh %146 : vector<8x128xf32>
    %148 = vector.extract_strided_slice %133 {offsets = [0, 384], sizes = [8, 128], strides = [1, 1]} : vector<8x512xf32> to vector<8x128xf32>
    %149 = arith.negf %148 : vector<8x128xf32>
    %150 = math.exp %149 : vector<8x128xf32>
    %cst_35 = arith.constant 1.000000e+00 : f32
    %151 = vector.broadcast %cst_35 : f32 to vector<8x128xf32>
    %152 = arith.addf %151, %150 : vector<8x128xf32>
    %153 = arith.divf %151, %152 : vector<8x128xf32>
    %154 = arith.mulf %145, %127 : vector<8x128xf32>
    %155 = arith.mulf %139, %147 : vector<8x128xf32>
    %156 = arith.addf %154, %155 : vector<8x128xf32>
    %157 = math.tanh %156 : vector<8x128xf32>
    %158 = arith.mulf %153, %157 : vector<8x128xf32>
    %159 = vector.broadcast %c3_i32 : i32 to vector<8x1xi32>
    %160 = arith.cmpi slt, %159, %7 : vector<8x1xi32>
    %161 = vector.shape_cast %160 : vector<8x1xi1> to vector<8x1xi1>
    %162 = vector.broadcast %161 : vector<8x1xi1> to vector<8x128xi1>
    %163 = arith.select %162, %158, %124 : vector<8x128xi1>, vector<8x128xf32>
    %164 = vector.shape_cast %160 : vector<8x1xi1> to vector<8x1xi1>
    %165 = vector.broadcast %164 : vector<8x1xi1> to vector<8x128xi1>
    %166 = arith.select %165, %156, %127 : vector<8x128xi1>, vector<8x128xf32>
    %c4_i32 = arith.constant 4 : i32
    %c8_i32_36 = arith.constant 8 : i32
    %167 = arith.muli %c4_i32, %c8_i32_36 : i32
    %168 = tpu.assume_multiple %167, 8 : i32
    %169 = arith.index_cast %168 : i32 to index
    %c0_37 = arith.constant 0 : index
    %170 = vector.load %arg10[%169, %c0_37] : memref<64x512xf32, #tpu.memory_space<vmem>>, vector<8x512xf32>
    %cst_38 = arith.constant dense<0.000000e+00> : vector<8x512xf32>
    %171 = tpu.matmul %163, %8, %cst_38 {dimension_numbers = #tpu.dot_dimension_numbers<[1], [0], [0], [1], [0, 0, 1, 1], [], []>} : vector<8x128xf32>, vector<128x512xf32>, vector<8x512xf32> -> vector<8x512xf32>
    %172 = arith.addf %170, %171 : vector<8x512xf32>
    %173 = vector.extract_strided_slice %172 {offsets = [0, 0], sizes = [8, 128], strides = [1, 1]} : vector<8x512xf32> to vector<8x128xf32>
    %174 = arith.negf %173 : vector<8x128xf32>
    %175 = math.exp %174 : vector<8x128xf32>
    %cst_39 = arith.constant 1.000000e+00 : f32
    %176 = vector.broadcast %cst_39 : f32 to vector<8x128xf32>
    %177 = arith.addf %176, %175 : vector<8x128xf32>
    %178 = arith.divf %176, %177 : vector<8x128xf32>
    %179 = vector.extract_strided_slice %172 {offsets = [0, 128], sizes = [8, 128], strides = [1, 1]} : vector<8x512xf32> to vector<8x128xf32>
    %180 = arith.negf %179 : vector<8x128xf32>
    %181 = math.exp %180 : vector<8x128xf32>
    %cst_40 = arith.constant 1.000000e+00 : f32
    %182 = vector.broadcast %cst_40 : f32 to vector<8x128xf32>
    %183 = arith.addf %182, %181 : vector<8x128xf32>
    %184 = arith.divf %182, %183 : vector<8x128xf32>
    %185 = vector.extract_strided_slice %172 {offsets = [0, 256], sizes = [8, 128], strides = [1, 1]} : vector<8x512xf32> to vector<8x128xf32>
    %186 = math.tanh %185 : vector<8x128xf32>
    %187 = vector.extract_strided_slice %172 {offsets = [0, 384], sizes = [8, 128], strides = [1, 1]} : vector<8x512xf32> to vector<8x128xf32>
    %188 = arith.negf %187 : vector<8x128xf32>
    %189 = math.exp %188 : vector<8x128xf32>
    %cst_41 = arith.constant 1.000000e+00 : f32
    %190 = vector.broadcast %cst_41 : f32 to vector<8x128xf32>
    %191 = arith.addf %190, %189 : vector<8x128xf32>
    %192 = arith.divf %190, %191 : vector<8x128xf32>
    %193 = arith.mulf %184, %166 : vector<8x128xf32>
    %194 = arith.mulf %178, %186 : vector<8x128xf32>
    %195 = arith.addf %193, %194 : vector<8x128xf32>
    %196 = math.tanh %195 : vector<8x128xf32>
    %197 = arith.mulf %192, %196 : vector<8x128xf32>
    %198 = vector.broadcast %c4_i32 : i32 to vector<8x1xi32>
    %199 = arith.cmpi slt, %198, %7 : vector<8x1xi32>
    %200 = vector.shape_cast %199 : vector<8x1xi1> to vector<8x1xi1>
    %201 = vector.broadcast %200 : vector<8x1xi1> to vector<8x128xi1>
    %202 = arith.select %201, %197, %163 : vector<8x128xi1>, vector<8x128xf32>
    %203 = vector.shape_cast %199 : vector<8x1xi1> to vector<8x1xi1>
    %204 = vector.broadcast %203 : vector<8x1xi1> to vector<8x128xi1>
    %205 = arith.select %204, %195, %166 : vector<8x128xi1>, vector<8x128xf32>
    %c5_i32 = arith.constant 5 : i32
    %c8_i32_42 = arith.constant 8 : i32
    %206 = arith.muli %c5_i32, %c8_i32_42 : i32
    %207 = tpu.assume_multiple %206, 8 : i32
    %208 = arith.index_cast %207 : i32 to index
    %c0_43 = arith.constant 0 : index
    %209 = vector.load %arg10[%208, %c0_43] : memref<64x512xf32, #tpu.memory_space<vmem>>, vector<8x512xf32>
    %cst_44 = arith.constant dense<0.000000e+00> : vector<8x512xf32>
    %210 = tpu.matmul %202, %8, %cst_44 {dimension_numbers = #tpu.dot_dimension_numbers<[1], [0], [0], [1], [0, 0, 1, 1], [], []>} : vector<8x128xf32>, vector<128x512xf32>, vector<8x512xf32> -> vector<8x512xf32>
    %211 = arith.addf %209, %210 : vector<8x512xf32>
    %212 = vector.extract_strided_slice %211 {offsets = [0, 0], sizes = [8, 128], strides = [1, 1]} : vector<8x512xf32> to vector<8x128xf32>
    %213 = arith.negf %212 : vector<8x128xf32>
    %214 = math.exp %213 : vector<8x128xf32>
    %cst_45 = arith.constant 1.000000e+00 : f32
    %215 = vector.broadcast %cst_45 : f32 to vector<8x128xf32>
    %216 = arith.addf %215, %214 : vector<8x128xf32>
    %217 = arith.divf %215, %216 : vector<8x128xf32>
    %218 = vector.extract_strided_slice %211 {offsets = [0, 128], sizes = [8, 128], strides = [1, 1]} : vector<8x512xf32> to vector<8x128xf32>
    %219 = arith.negf %218 : vector<8x128xf32>
    %220 = math.exp %219 : vector<8x128xf32>
    %cst_46 = arith.constant 1.000000e+00 : f32
    %221 = vector.broadcast %cst_46 : f32 to vector<8x128xf32>
    %222 = arith.addf %221, %220 : vector<8x128xf32>
    %223 = arith.divf %221, %222 : vector<8x128xf32>
    %224 = vector.extract_strided_slice %211 {offsets = [0, 256], sizes = [8, 128], strides = [1, 1]} : vector<8x512xf32> to vector<8x128xf32>
    %225 = math.tanh %224 : vector<8x128xf32>
    %226 = vector.extract_strided_slice %211 {offsets = [0, 384], sizes = [8, 128], strides = [1, 1]} : vector<8x512xf32> to vector<8x128xf32>
    %227 = arith.negf %226 : vector<8x128xf32>
    %228 = math.exp %227 : vector<8x128xf32>
    %cst_47 = arith.constant 1.000000e+00 : f32
    %229 = vector.broadcast %cst_47 : f32 to vector<8x128xf32>
    %230 = arith.addf %229, %228 : vector<8x128xf32>
    %231 = arith.divf %229, %230 : vector<8x128xf32>
    %232 = arith.mulf %223, %205 : vector<8x128xf32>
    %233 = arith.mulf %217, %225 : vector<8x128xf32>
    %234 = arith.addf %232, %233 : vector<8x128xf32>
    %235 = math.tanh %234 : vector<8x128xf32>
    %236 = arith.mulf %231, %235 : vector<8x128xf32>
    %237 = vector.broadcast %c5_i32 : i32 to vector<8x1xi32>
    %238 = arith.cmpi slt, %237, %7 : vector<8x1xi32>
    %239 = vector.shape_cast %238 : vector<8x1xi1> to vector<8x1xi1>
    %240 = vector.broadcast %239 : vector<8x1xi1> to vector<8x128xi1>
    %241 = arith.select %240, %236, %202 : vector<8x128xi1>, vector<8x128xf32>
    %242 = vector.shape_cast %238 : vector<8x1xi1> to vector<8x1xi1>
    %243 = vector.broadcast %242 : vector<8x1xi1> to vector<8x128xi1>
    %244 = arith.select %243, %234, %205 : vector<8x128xi1>, vector<8x128xf32>
    %c6_i32 = arith.constant 6 : i32
    %c8_i32_48 = arith.constant 8 : i32
    %245 = arith.muli %c6_i32, %c8_i32_48 : i32
    %246 = tpu.assume_multiple %245, 8 : i32
    %247 = arith.index_cast %246 : i32 to index
    %c0_49 = arith.constant 0 : index
    %248 = vector.load %arg10[%247, %c0_49] : memref<64x512xf32, #tpu.memory_space<vmem>>, vector<8x512xf32>
    %cst_50 = arith.constant dense<0.000000e+00> : vector<8x512xf32>
    %249 = tpu.matmul %241, %8, %cst_50 {dimension_numbers = #tpu.dot_dimension_numbers<[1], [0], [0], [1], [0, 0, 1, 1], [], []>} : vector<8x128xf32>, vector<128x512xf32>, vector<8x512xf32> -> vector<8x512xf32>
    %250 = arith.addf %248, %249 : vector<8x512xf32>
    %251 = vector.extract_strided_slice %250 {offsets = [0, 0], sizes = [8, 128], strides = [1, 1]} : vector<8x512xf32> to vector<8x128xf32>
    %252 = arith.negf %251 : vector<8x128xf32>
    %253 = math.exp %252 : vector<8x128xf32>
    %cst_51 = arith.constant 1.000000e+00 : f32
    %254 = vector.broadcast %cst_51 : f32 to vector<8x128xf32>
    %255 = arith.addf %254, %253 : vector<8x128xf32>
    %256 = arith.divf %254, %255 : vector<8x128xf32>
    %257 = vector.extract_strided_slice %250 {offsets = [0, 128], sizes = [8, 128], strides = [1, 1]} : vector<8x512xf32> to vector<8x128xf32>
    %258 = arith.negf %257 : vector<8x128xf32>
    %259 = math.exp %258 : vector<8x128xf32>
    %cst_52 = arith.constant 1.000000e+00 : f32
    %260 = vector.broadcast %cst_52 : f32 to vector<8x128xf32>
    %261 = arith.addf %260, %259 : vector<8x128xf32>
    %262 = arith.divf %260, %261 : vector<8x128xf32>
    %263 = vector.extract_strided_slice %250 {offsets = [0, 256], sizes = [8, 128], strides = [1, 1]} : vector<8x512xf32> to vector<8x128xf32>
    %264 = math.tanh %263 : vector<8x128xf32>
    %265 = vector.extract_strided_slice %250 {offsets = [0, 384], sizes = [8, 128], strides = [1, 1]} : vector<8x512xf32> to vector<8x128xf32>
    %266 = arith.negf %265 : vector<8x128xf32>
    %267 = math.exp %266 : vector<8x128xf32>
    %cst_53 = arith.constant 1.000000e+00 : f32
    %268 = vector.broadcast %cst_53 : f32 to vector<8x128xf32>
    %269 = arith.addf %268, %267 : vector<8x128xf32>
    %270 = arith.divf %268, %269 : vector<8x128xf32>
    %271 = arith.mulf %262, %244 : vector<8x128xf32>
    %272 = arith.mulf %256, %264 : vector<8x128xf32>
    %273 = arith.addf %271, %272 : vector<8x128xf32>
    %274 = math.tanh %273 : vector<8x128xf32>
    %275 = arith.mulf %270, %274 : vector<8x128xf32>
    %276 = vector.broadcast %c6_i32 : i32 to vector<8x1xi32>
    %277 = arith.cmpi slt, %276, %7 : vector<8x1xi32>
    %278 = vector.shape_cast %277 : vector<8x1xi1> to vector<8x1xi1>
    %279 = vector.broadcast %278 : vector<8x1xi1> to vector<8x128xi1>
    %280 = arith.select %279, %275, %241 : vector<8x128xi1>, vector<8x128xf32>
    %281 = vector.shape_cast %277 : vector<8x1xi1> to vector<8x1xi1>
    %282 = vector.broadcast %281 : vector<8x1xi1> to vector<8x128xi1>
    %283 = arith.select %282, %273, %244 : vector<8x128xi1>, vector<8x128xf32>
    %c7_i32 = arith.constant 7 : i32
    %c8_i32_54 = arith.constant 8 : i32
    %284 = arith.muli %c7_i32, %c8_i32_54 : i32
    %285 = tpu.assume_multiple %284, 8 : i32
    %286 = arith.index_cast %285 : i32 to index
    %c0_55 = arith.constant 0 : index
    %287 = vector.load %arg10[%286, %c0_55] : memref<64x512xf32, #tpu.memory_space<vmem>>, vector<8x512xf32>
    %cst_56 = arith.constant dense<0.000000e+00> : vector<8x512xf32>
    %288 = tpu.matmul %280, %8, %cst_56 {dimension_numbers = #tpu.dot_dimension_numbers<[1], [0], [0], [1], [0, 0, 1, 1], [], []>} : vector<8x128xf32>, vector<128x512xf32>, vector<8x512xf32> -> vector<8x512xf32>
    %289 = arith.addf %287, %288 : vector<8x512xf32>
    %290 = vector.extract_strided_slice %289 {offsets = [0, 0], sizes = [8, 128], strides = [1, 1]} : vector<8x512xf32> to vector<8x128xf32>
    %291 = arith.negf %290 : vector<8x128xf32>
    %292 = math.exp %291 : vector<8x128xf32>
    %cst_57 = arith.constant 1.000000e+00 : f32
    %293 = vector.broadcast %cst_57 : f32 to vector<8x128xf32>
    %294 = arith.addf %293, %292 : vector<8x128xf32>
    %295 = arith.divf %293, %294 : vector<8x128xf32>
    %296 = vector.extract_strided_slice %289 {offsets = [0, 128], sizes = [8, 128], strides = [1, 1]} : vector<8x512xf32> to vector<8x128xf32>
    %297 = arith.negf %296 : vector<8x128xf32>
    %298 = math.exp %297 : vector<8x128xf32>
    %cst_58 = arith.constant 1.000000e+00 : f32
    %299 = vector.broadcast %cst_58 : f32 to vector<8x128xf32>
    %300 = arith.addf %299, %298 : vector<8x128xf32>
    %301 = arith.divf %299, %300 : vector<8x128xf32>
    %302 = vector.extract_strided_slice %289 {offsets = [0, 256], sizes = [8, 128], strides = [1, 1]} : vector<8x512xf32> to vector<8x128xf32>
    %303 = math.tanh %302 : vector<8x128xf32>
    %304 = vector.extract_strided_slice %289 {offsets = [0, 384], sizes = [8, 128], strides = [1, 1]} : vector<8x512xf32> to vector<8x128xf32>
    %305 = arith.negf %304 : vector<8x128xf32>
    %306 = math.exp %305 : vector<8x128xf32>
    %cst_59 = arith.constant 1.000000e+00 : f32
    %307 = vector.broadcast %cst_59 : f32 to vector<8x128xf32>
    %308 = arith.addf %307, %306 : vector<8x128xf32>
    %309 = arith.divf %307, %308 : vector<8x128xf32>
    %310 = arith.mulf %301, %283 : vector<8x128xf32>
    %311 = arith.mulf %295, %303 : vector<8x128xf32>
    %312 = arith.addf %310, %311 : vector<8x128xf32>
    %313 = math.tanh %312 : vector<8x128xf32>
    %314 = arith.mulf %309, %313 : vector<8x128xf32>
    %315 = vector.broadcast %c7_i32 : i32 to vector<8x1xi32>
    %316 = arith.cmpi slt, %315, %7 : vector<8x1xi32>
    %317 = vector.shape_cast %316 : vector<8x1xi1> to vector<8x1xi1>
    %318 = vector.broadcast %317 : vector<8x1xi1> to vector<8x128xi1>
    %319 = arith.select %318, %314, %280 : vector<8x128xi1>, vector<8x128xf32>
    %320 = vector.shape_cast %316 : vector<8x1xi1> to vector<8x1xi1>
    %321 = vector.broadcast %320 : vector<8x1xi1> to vector<8x128xi1>
    %322 = arith.select %321, %312, %283 : vector<8x128xi1>, vector<8x128xf32>
    %c8_i32_60 = arith.constant 8 : i32
    %c8_i32_61 = arith.constant 8 : i32
    %323 = vector.broadcast %c8_i32_61 : i32 to vector<8x1xi32>
    %324 = arith.cmpi eq, %7, %323 : vector<8x1xi32>
    %cst_62 = arith.constant 0.000000e+00 : f32
    %325 = vector.shape_cast %324 : vector<8x1xi1> to vector<8x1xi1>
    %326 = vector.broadcast %325 : vector<8x1xi1> to vector<8x128xi1>
    %327 = vector.broadcast %cst_62 : f32 to vector<8x128xf32>
    %328 = arith.select %326, %319, %327 : vector<8x128xi1>, vector<8x128xf32>
    %c0_63 = arith.constant 0 : index
    %c0_64 = arith.constant 0 : index
    %329 = vector.load %arg5[%c0_63, %c0_64] : memref<128x128xf32, #tpu.memory_space<vmem>>, vector<128x128xf32>
    %cst_65 = arith.constant dense<0.000000e+00> : vector<8x128xf32>
    %330 = tpu.matmul %328, %329, %cst_65 {dimension_numbers = #tpu.dot_dimension_numbers<[1], [0], [0], [1], [0, 0, 1, 1], [], []>} : vector<8x128xf32>, vector<128x128xf32>, vector<8x128xf32> -> vector<8x128xf32>
    %c0_66 = arith.constant 0 : index
    %c0_67 = arith.constant 0 : index
    %331 = vector.load %arg6[%c0_66, %c0_67] : memref<1x128xf32, #tpu.memory_space<vmem>>, vector<1x128xf32>
    %332 = vector.broadcast %331 : vector<1x128xf32> to vector<8x128xf32>
    %333 = arith.addf %330, %332 : vector<8x128xf32>
    %cst_68 = arith.constant 0.000000e+00 : f32
    %334 = vector.broadcast %cst_68 : f32 to vector<8x128xf32>
    %335 = arith.maximumf %333, %334 : vector<8x128xf32>
    %c0_69 = arith.constant 0 : index
    %c0_70 = arith.constant 0 : index
    %336 = vector.load %arg7[%c0_69, %c0_70] : memref<128x1xf32, #tpu.memory_space<vmem>>, vector<128x1xf32>
    %cst_71 = arith.constant dense<0.000000e+00> : vector<8x1xf32>
    %337 = tpu.matmul %335, %336, %cst_71 {dimension_numbers = #tpu.dot_dimension_numbers<[1], [0], [0], [1], [0, 0, 1, 1], [], []>} : vector<8x128xf32>, vector<128x1xf32>, vector<8x1xf32> -> vector<8x1xf32>
    %c0_72 = arith.constant 0 : index
    %c0_73 = arith.constant 0 : index
    %338 = vector.load %arg8[%c0_72, %c0_73] : memref<1x1xf32, #tpu.memory_space<vmem>>, vector<1x1xf32>
    %339 = vector.broadcast %338 : vector<1x1xf32> to vector<8x1xf32>
    %340 = arith.addf %337, %339 : vector<8x1xf32>
    %341 = arith.negf %340 : vector<8x1xf32>
    %342 = math.exp %341 : vector<8x1xf32>
    %cst_74 = arith.constant 1.000000e+00 : f32
    %343 = vector.broadcast %cst_74 : f32 to vector<8x1xf32>
    %344 = arith.addf %343, %342 : vector<8x1xf32>
    %345 = arith.divf %343, %344 : vector<8x1xf32>
    %c0_75 = arith.constant 0 : index
    %c0_76 = arith.constant 0 : index
    %346 = vector.load %arg9[%c0_75, %c0_76] : memref<8x1xf32, #tpu.memory_space<vmem>>, vector<8x1xf32>
    tpu.vector_store %arg9[%c0_75, %c0_76], %345 {strides = array<i32>} : memref<8x1xf32, #tpu.memory_space<vmem>>, vector<8x1xf32>,
    return
  }
}

</mosaic_0001>

<bundles_post_ra>
// kernel: tpu_custom_call.1
= control target key start
LH: loop header
LB: loop body
LE: loop exit
PB: predicated region body
PF: predicated region fallthrough
CT: control target
= control target key end

     0   :  { %s3336_s0 = inlined_call_operand.vmem [shape: s32[8,1], index: 0, kind: input, shape index: {}]   ;;  %s3337_s1 = inlined_call_operand.vmem [shape: f32[64,16], index: 1, kind: input, shape index: {}]   ;;  %s3338_s2 = inlined_call_operand.vmem [shape: f32[16,512], index: 2, kind: input, shape index: {}]   ;;  %s3339_s3 = inlined_call_operand.hbm [shape: f32[128,512], index: 3, kind: input, shape index: {}]   ;;  %s3340_s4 = inlined_call_operand.vmem [shape: f32[1,512], index: 4, kind: input, shape index: {}]   ;;  %s3341_s5 = inlined_call_operand.vmem [shape: f32[128,128], index: 5, kind: input, shape index: {}]   ;;  %s3342_s6 = inlined_call_operand.vmem [shape: f32[1,128], index: 6, kind: input, shape index: {}]   ;;  %s3343_s7 = inlined_call_operand.vmem [shape: f32[128,1], index: 7, kind: input, shape index: {}]   ;;  %s3344_s8 = inlined_call_operand.<no memory space> [shape: f32[1,1], index: 8, kind: input, shape index: {}]   ;;  %s3345_s9 = inlined_call_operand.vmem [shape: f32[8,1], index: 9, kind: output, shape index: {}]  }
   0x1   :  { %v14_v0 = vstv %s3344_s8 }
   0x2   :  { %15 = vst [vmem:[#allocation3] sm:$0x1] %v14_v0 }
   0x3   :  { %16 = vsyncpa [#allocation5], 0  ;;  %s27_s13 = sshll.u32 %s3339_s3, 4  ;;  %s2077_s14 = smov [#allocation4]   ;;  %s28_s13 = int_to_ptr.hbm [resolvable:$true] %s27_s13 }
   0x4   :  { %s29_s15 = sshll.u32 %s2077_s14, 4  ;;  %s2078_s16 = smov 512   ;;  %s30_s15 = int_to_ptr.vmem [resolvable:$true] %s29_s15 }
   0x5   :  { %s2079_s17 = smov 32  }
   0x6   :  { %35 = dma.hbm_to_vmem [thread:$0]  %s28_s13, 8192, %s30_s15, [#allocation5], %s2078_s16, %s2078_s16, %s2079_s17  }
   0x7   :  { %2075 = dma.done.wait [#allocation5], 8192  }
   0x8   :  { %2076 = vsyncadd [#allocation5], 4294959104  ;;  %v62_v1 = vld [vmem:[%s3338_s2 + $0x20] sm:$0xff]  ;;  %v63_v2 = vld [vmem:[%s3338_s2 + $0x28] sm:$0xff]  ;;  %vm76_vm0 = vcmask 130048  }
   0x9   :  { %v58_v3 = vld [vmem:[%s3338_s2] sm:$0xff]  ;;  %115 = vmatpush.msra.mxu0 %v62_v1  ;;  %1840 = vmatpush.msra.mxu2 %v62_v1  ;;  %v59_v4 = vld [vmem:[%s3338_s2 + $0x8] sm:$0xff]  ;;  %v2158_v6 = vld [vmem:[%s3337_s1 + $0x30] sm:$0xff] }
   0xa   :  { %156 = vmatpush.msra.mxu1 %v63_v2  ;;  %1842 = vmatpush.msra.mxu3 %v63_v2  ;;  %v2153_v5 = vld [vmem:[%s3337_s1] sm:$0xff]  ;;  %v65_v7 = vld [vmem:[%s3338_s2 + $0x38] sm:$0xff]  ;;  %v64_v8 = vld [vmem:[%s3338_s2 + $0x30] sm:$0xff] }
   0xb   :  { %116 = vmatpush.msra.mxu0 %v58_v3  ;;  %1841 = vmatpush.msra.mxu2 %v58_v3  ;;  %v2170_v9 = vld [vmem:[#allocation4 + $0x1e0] sm:$0xff]  ;;  %v2172_v10 = vld [vmem:[#allocation4 + $0x1e8] sm:$0xff]  ;;  %v61_v11 = vld [vmem:[%s3338_s2 + $0x18] sm:$0xff] }
   0xc   :  { %157 = vmatpush.msra.mxu1 %v59_v4  ;;  %1843 = vmatpush.msra.mxu3 %v59_v4  ;;  %3450 = vst [vmem:[#allocation7_spill] sm:$0xff] %v2172_v10  ;;  %v60_v12 = vld [vmem:[%s3338_s2 + $0x10] sm:$0xff]  ;;  %v2184_v13 = vld [vmem:[#allocation4 + $0x1f8] sm:$0xff]  ;;  %v2186_v14 = vld [vmem:[#allocation4 + $0x1c0] sm:$0xff] }
   0xd   :  { %1778 = vmatmul.msk.f32.vlgmr.msra.gmra.mxu0 %vm76_vm0, %v2153_v5  ;;  %1784 = vmatmul.msk.f32.vlgmr.msra.gmra.mxu2 %vm76_vm0, %v2158_v6  ;;  %3451 = vst [vmem:[#allocation8_spill] sm:$0xff] %v2184_v13  ;;  %v2190_v15 = vld [vmem:[#allocation4 + $0x1c8] sm:$0xff]  ;;  %v2192_v16 = vld [vmem:[#allocation4 + $0x1d8] sm:$0xff]  ;;  %v2194_v17 = vld [vmem:[#allocation4 + $0x1a0] sm:$0xff] }
   0xe   :  { %1786 = vmatmul.msk.f32.vlgmr.msra.gmra.mxu1 %vm76_vm0, %v2153_v5  ;;  %1792 = vmatmul.msk.f32.vlgmr.msra.gmra.mxu3 %vm76_vm0, %v2158_v6  ;;  %3452 = vst [vmem:[#allocation9_spill] sm:$0xff] %v2186_v14  ;;  %v2196_v18 = vld [vmem:[#allocation4 + $0x1f0] sm:$0xff]  ;;  %v2201_v19 = vld [vmem:[%s3337_s1 + $0x8] sm:$0xff]  ;;  %v2222_v23 = vld [vmem:[#allocation4 + $0x1b8] sm:$0xff] }
   0xf   :  { %238 = vmatpush.msrb.mxu3 %v65_v7  ;;  %197 = vmatpush.msrb.mxu2 %v64_v8  ;;  %v2206_v20 = vld [vmem:[%s3337_s1 + $0x38] sm:$0xff]  ;;  %v2214_v21 = vld [vmem:[#allocation4 + $0x1a8] sm:$0xff]  ;;  %v2216_v22 = vld [vmem:[#allocation4 + $0x180] sm:$0xff]  ;;  %3453 = vst [vmem:[#allocation10_spill] sm:$0xff] %v2222_v23 }
  0x10   :  { %369 = vmatpush.msrb.mxu0 %v2170_v9  ;;  %389 = vmatpush.msrb.mxu1 %v2172_v10  ;;  %v2224_v24 = vld [vmem:[#allocation4 + $0x1d0] sm:$0xff]  ;;  %v2230_v25 = vld [vmem:[#allocation4 + $0x188] sm:$0xff]  ;;  %v2232_v26 = vld [vmem:[#allocation4 + $0x160] sm:$0xff] }
  0x11   :  { %239 = vmatpush.msrb.mxu3 %v61_v11  ;;  %198 = vmatpush.msrb.mxu2 %v60_v12  ;;  %v2236_v27 = vld [vmem:[#allocation4 + $0x198] sm:$0xff]  ;;  %v2238_v28 = vld [vmem:[#allocation4 + $0x1b0] sm:$0xff]  ;;  %v2241_v29 = vld [vmem:[#allocation4 + $0x168] sm:$0xff] }
  0x12   :  { %370 = vmatpush.msrb.mxu0 %v2186_v14  ;;  %390 = vmatpush.msrb.mxu1 %v2190_v15  ;;  %3454 = vst [vmem:[#allocation11_spill] sm:$0xff] %v2238_v28  ;;  %v2243_v30 = vld [vmem:[#allocation4 + $0x140] sm:$0xff]  ;;  %v2248_v31 = vld [vmem:[#allocation4 + $0x178] sm:$0xff]  ;;  %v2250_v32 = vld [vmem:[#allocation4 + $0x190] sm:$0xff] }
  0x13   :  { %429 = vmatpush.msra.mxu3 %v2184_v13  ;;  %409 = vmatpush.msra.mxu2 %v2196_v18  ;;  %v2255_v33 = vld [vmem:[%s3337_s1 + $0x10] sm:$0xff]  ;;  %v2263_v35 = vld [vmem:[#allocation4 + $0x120] sm:$0xff]  ;;  %v2271_v36 = vld [vmem:[#allocation4 + $0x158] sm:$0xff] }
  0x14   :  { %371 = vmatpush.msrb.mxu0 %v2194_v17  ;;  %391 = vmatpush.msrb.mxu1 %v2214_v21  ;;  %v2261_v34 = vld [vmem:[#allocation4 + $0x148] sm:$0xff]  ;;  %v2273_v37 = vld [vmem:[#allocation4 + $0x170] sm:$0xff]  ;;  %v2281_v39 = vld [vmem:[#allocation4 + $0x100] sm:$0xff] }
  0x15   :  { %430 = vmatpush.msra.mxu3 %v2192_v16  ;;  %1779 = vmatmul.msk.f32.gmra.mxu0 %vm76_vm0, %v2201_v19  ;;  %v2279_v38 = vld [vmem:[#allocation4 + $0x128] sm:$0xff]  ;;  %v2285_v40 = vld [vmem:[#allocation4 + $0x138] sm:$0xff]  ;;  %v2287_v41 = vld [vmem:[#allocation4 + $0x150] sm:$0xff] }
  0x16   :  { %1785 = vmatmul.msk.f32.gmra.mxu2 %vm76_vm0, %v2206_v20  ;;  %1787 = vmatmul.msk.f32.gmra.mxu1 %vm76_vm0, %v2201_v19  ;;  %v2289_v42 = vld [vmem:[#allocation4 + $0x108] sm:$0xff]  ;;  %v2291_v43 = vld [vmem:[#allocation4 + $0xe0] sm:$0xff]  ;;  %v2297_v44 = vld [vmem:[#allocation4 + $0x118] sm:$0xff] }
  0x17   :  { %1793 = vmatmul.msk.f32.gmra.mxu3 %vm76_vm0, %v2206_v20  ;;  %372 = vmatpush.msrb.mxu0 %v2216_v22  ;;  %v2299_v45 = vld [vmem:[#allocation4 + $0x130] sm:$0xff]  ;;  %v2310_v47 = vld [vmem:[#allocation4 + $0xe8] sm:$0xff]  ;;  %v2312_v48 = vld [vmem:[#allocation4 + $0xc0] sm:$0xff] }
  0x18   :  { %431 = vmatpush.msra.mxu3 %v2222_v23  ;;  %410 = vmatpush.msra.mxu2 %v2224_v24  ;;  %v2304_v46 = vld [vmem:[%s3337_s1 + $0x18] sm:$0xff]  ;;  %v2328_v51 = vld [vmem:[#allocation4 + $0xc8] sm:$0xff]  ;;  %v2330_v52 = vld [vmem:[#allocation4 + $0xa0] sm:$0xff] }
  0x19   :  { %392 = vmatpush.msrb.mxu1 %v2230_v25  ;;  %373 = vmatpush.msrb.mxu0 %v2232_v26  ;;  %v2320_v49 = vld [vmem:[#allocation4 + $0xf8] sm:$0xff]  ;;  %v2322_v50 = vld [vmem:[#allocation4 + $0x110] sm:$0xff]  ;;  %v2338_v55 = vld [vmem:[#allocation4 + $0xa8] sm:$0xff] }
  0x1a   :  { %432 = vmatpush.msra.mxu3 %v2236_v27  ;;  %411 = vmatpush.msra.mxu2 %v2238_v28  ;;  %v2334_v53 = vld [vmem:[#allocation4 + $0xd8] sm:$0xff]  ;;  %v2336_v54 = vld [vmem:[#allocation4 + $0xf0] sm:$0xff]  ;;  %3455 = vst [vmem:[#allocation12_spill] sm:$0xff] %v2338_v55  ;;  %v2340_v56 = vld [vmem:[#allocation4 + $0x80] sm:$0xff] }
  0x1b   :  { %393 = vmatpush.msrb.mxu1 %v2241_v29  ;;  %374 = vmatpush.msrb.mxu0 %v2243_v30  ;;  %3456 = vst [vmem:[#allocation13_spill] sm:$0xff] %v2340_v56  ;;  %v2346_v57 = vld [vmem:[#allocation4 + $0xb8] sm:$0xff]  ;;  %v2348_v58 = vld [vmem:[#allocation4 + $0xd0] sm:$0xff]  ;;  %v2357_v60 = vld [vmem:[#allocation4 + $0x88] sm:$0xff] }
  0x1c   :  { %433 = vmatpush.msra.mxu3 %v2248_v31  ;;  %412 = vmatpush.msra.mxu2 %v2250_v32  ;;  %3457 = vst [vmem:[#allocation14_spill] sm:$0xff] %v2346_v57  ;;  %v54_v59 = vld [vmem:[%s3337_s1 + $0x20] sm:$0xff]  ;;  %v2371_v63 = vld [vmem:[#allocation4 + $0x68] sm:$0xff]  ;;  %v2375_v1 = vld [vmem:[#allocation4 + $0xb0] sm:$0xff] }
  0x1d   :  { %1780 = vmatmul.msk.f32.gmra.mxu0 %vm76_vm0, %v2255_v33  ;;  %394 = vmatpush.msrb.mxu1 %v2261_v34  ;;  %3458 = vst [vmem:[#allocation15_spill] sm:$0xff] %v2357_v60  ;;  %v2359_v61 = vld [vmem:[#allocation4 + $0x60] sm:$0xff]  ;;  %v2366_v62 = vld [vmem:[#allocation4 + $0x98] sm:$0xff]  ;;  %v2381_v3 = vld [vmem:[#allocation4 + $0x90] sm:$0xff] }
  0x1e   :  { %1794 = vmatmul.msk.f32.vlgmr.msrb.gmra.mxu2 %vm76_vm0, %v2153_v5  ;;  %1788 = vmatmul.msk.f32.gmra.mxu1 %vm76_vm0, %v2255_v33  ;;  %3459 = vst [vmem:[#allocation16_spill] sm:$0xff] %v2359_v61  ;;  %v2373_v0 = vld [vmem:[#allocation4 + $0x40] sm:$0xff]  ;;  %v2379_v2 = vld [vmem:[#allocation4 + $0x78] sm:$0xff]  ;;  %v2383_v4 = vld [vmem:[#allocation4 + $0x48] sm:$0xff] }
  0x1f   :  { %1802 = vmatmul.msk.f32.vlgmr.msrb.gmra.mxu3 %vm76_vm0, %v2153_v5  ;;  %375 = vmatpush.msrb.mxu0 %v2263_v35  ;;  %3460 = vst [vmem:[#allocation17_spill] sm:$0xff] %v2366_v62  ;;  %v2385_v5 = vld [vmem:[#allocation4 + $0x20] sm:$0xff]  ;;  %v2391_v7 = vld [vmem:[#allocation4 + $0x58] sm:$0xff]  ;;  %v2400_v11 = vld [vmem:[#allocation4 + $0x28] sm:$0xff] }
  0x20   :  { %434 = vmatpush.msra.mxu3 %v2271_v36  ;;  %413 = vmatpush.msra.mxu2 %v2273_v37  ;;  %3461 = vst [vmem:[#allocation18_spill] sm:$0xff] %v2371_v63  ;;  %v55_v8 = vld [vmem:[%s3337_s1 + $0x28] sm:$0xff] }
  0x21   :  { %395 = vmatpush.msrb.mxu1 %v2279_v38  ;;  %376 = vmatpush.msrb.mxu0 %v2281_v39  ;;  %3462 = vst [vmem:[#allocation19_spill] sm:$0xff] %v2373_v0  ;;  %v2402_v12 = vld [vmem:[#allocation4] sm:$0xff] }
  0x22   :  { %435 = vmatpush.msra.mxu3 %v2285_v40  ;;  %414 = vmatpush.msra.mxu2 %v2287_v41  ;;  %3463 = vst [vmem:[#allocation20_spill] sm:$0xff] %v2375_v1 }
  0x23   :  { %396 = vmatpush.msrb.mxu1 %v2289_v42  ;;  %377 = vmatpush.msrb.mxu0 %v2291_v43  ;;  %3464 = vst [vmem:[#allocation21_spill] sm:$0xff] %v2379_v2 }
  0x24   :  { %436 = vmatpush.msra.mxu3 %v2297_v44  ;;  %415 = vmatpush.msra.mxu2 %v2299_v45  ;;  %3465 = vst [vmem:[#allocation22_spill] sm:$0xff] %v2381_v3 }
  0x25   :  { %1781 = vmatmul.msk.f32.gmra.mxu0 %vm76_vm0, %v2304_v46  ;;  %397 = vmatpush.msrb.mxu1 %v2310_v47  ;;  %3466 = vst [vmem:[#allocation23_spill] sm:$0xff] %v2383_v4 }
  0x26   :  { %1795 = vmatmul.msk.f32.gmra.mxu2 %vm76_vm0, %v2201_v19  ;;  %1789 = vmatmul.msk.f32.gmra.mxu1 %vm76_vm0, %v2304_v46  ;;  %3467 = vst [vmem:[#allocation24_spill] sm:$0xff] %v2385_v5 }
  0x27   :  { %1803 = vmatmul.msk.f32.gmra.mxu3 %vm76_vm0, %v2201_v19  ;;  %378 = vmatpush.msrb.mxu0 %v2312_v48  ;;  %3468 = vst [vmem:[#allocation25_spill] sm:$0xff] %v2391_v7  ;;  %v2411_v19 = vld [vmem:[#allocation4 + $0x8] sm:$0xff] }
  0x28   :  { %437 = vmatpush.msra.mxu3 %v2320_v49  ;;  %416 = vmatpush.msra.mxu2 %v2322_v50  ;;  %3469 = vst [vmem:[#allocation26_spill] sm:$0xff] %v2400_v11 }
  0x29   :  { %398 = vmatpush.msrb.mxu1 %v2328_v51  ;;  %379 = vmatpush.msrb.mxu0 %v2330_v52  ;;  %3470 = vst [vmem:[#allocation27_spill] sm:$0xff] %v2402_v12 }
  0x2a   :  { %438 = vmatpush.msra.mxu3 %v2334_v53  ;;  %417 = vmatpush.msra.mxu2 %v2336_v54  ;;  %3471 = vst [vmem:[#allocation28_spill] sm:$0xff] %v2411_v19 }
  0x2b   :  { %399 = vmatpush.msrb.mxu1 %v2338_v55  ;;  %380 = vmatpush.msrb.mxu0 %v2340_v56 }
  0x2c   :  { %439 = vmatpush.msra.mxu3 %v2346_v57  ;;  %418 = vmatpush.msra.mxu2 %v2348_v58 }
  0x2d   :  { %1782 = vmatmul.msk.f32.gmra.mxu0 %vm76_vm0, %v54_v59  ;;  %400 = vmatpush.msrb.mxu1 %v2357_v60 }
  0x2e   :  { %1796 = vmatmul.msk.f32.gmra.mxu2 %vm76_vm0, %v2255_v33  ;;  %1790 = vmatmul.msk.f32.gmra.mxu1 %vm76_vm0, %v54_v59 }
  0x2f   :  { %1804 = vmatmul.msk.f32.gmra.mxu3 %vm76_vm0, %v2255_v33  ;;  %381 = vmatpush.msrb.mxu0 %v2359_v61  ;;  %v2413_v33 = vld [vmem:[#allocation4 + $0x38] sm:$0xff] }
  0x30   :  { %440 = vmatpush.msra.mxu3 %v2366_v62  ;;  %419 = vmatpush.msra.mxu2 %v2375_v1  ;;  %3472 = vst [vmem:[#allocation29_spill] sm:$0xff] %v2413_v33 }
  0x31   :  { %401 = vmatpush.msrb.mxu1 %v2371_v63  ;;  %382 = vmatpush.msrb.mxu0 %v2373_v0 }
  0x32   :  { %441 = vmatpush.msra.mxu3 %v2379_v2  ;;  %420 = vmatpush.msra.mxu2 %v2381_v3 }
  0x33   :  { %402 = vmatpush.msrb.mxu1 %v2383_v4  ;;  %383 = vmatpush.msrb.mxu0 %v2385_v5  ;;  %v2415_v5 = vld [vmem:[#allocation4 + $0x70] sm:$0xff]  ;;  %v2421_v4 = vld [vmem:[#allocation4 + $0x18] sm:$0xff] }
  0x34   :  { %442 = vmatpush.msra.mxu3 %v2391_v7  ;;  %3473 = vst [vmem:[#allocation30_spill] sm:$0xff] %v2415_v5  ;;  %v2419_v7 = vld [vmem:[#allocation4 + $0x50] sm:$0xff]  ;;  %421 = vmatpush.msra.mxu2 %v2415_v5 }
  0x35   :  { %1783 = vmatmul.msk.f32.gmra.mxu0 %vm76_vm0, %v55_v8  ;;  %403 = vmatpush.msrb.mxu1 %v2400_v11  ;;  %3474 = vst [vmem:[#allocation31_spill] sm:$0xff] %v2419_v7 }
  0x36   :  { %1797 = vmatmul.msk.f32.gmra.mxu2 %vm76_vm0, %v2304_v46  ;;  %1791 = vmatmul.msk.f32.gmra.mxu1 %vm76_vm0, %v55_v8  ;;  %3475 = vst [vmem:[#allocation32_spill] sm:$0xff] %v2421_v4 }
  0x37   :  { %1805 = vmatmul.msk.f32.gmra.mxu3 %vm76_vm0, %v2304_v46  ;;  %384 = vmatpush.msrb.mxu0 %v2402_v12  ;;  %v2426_v46 = vld [vmem:[#allocation4 + $0x30] sm:$0xff] }
  0x38   :  { %443 = vmatpush.msra.mxu3 %v2413_v33  ;;  %404 = vmatpush.msrb.mxu1 %v2411_v19  ;;  %3476 = vst [vmem:[#allocation33_spill] sm:$0xff] %v2426_v46  ;;  %v2434_v12 = vld [vmem:[#allocation4 + $0x10] sm:$0xff]  ;;  %v2080_v19 = vmov 0.0  }
  0x39   :  { %531 = vmatpush.msra.mxu0 %v2170_v9  ;;  %422 = vmatpush.msra.mxu2 %v2419_v7  ;;  %3477 = vst [vmem:[#allocation34_spill] sm:$0xff] %v2434_v12 }
  0x3a   :  { %444 = vmatpush.msra.mxu3 %v2421_v4  ;;  %551 = vmatpush.msra.mxu1 %v2172_v10  ;;  %v2444_v10 = vld [vmem:[%s3336_s0] sm:$0xff] }
  0x3b   :  { %423 = vmatpush.msra.mxu2 %v2426_v46  ;;  %532 = vmatpush.msra.mxu0 %v2186_v14  ;;  %3478 = vst [vmem:[#allocation35_spill] sm:$0xff] %v2444_v10  ;;  %vm516_vm1 = vcmp.gt.s32.totalorder %v2444_v10, 0  ;;  %vm678_vm2 = vcmp.gt.s32.totalorder %v2444_v10, 1  ;;  %vm1488_vm3 = vcmp.gt.s32.totalorder %v2444_v10, 6 }
  0x3c   :  { %591 = vmatpush.msrb.mxu3 %v2184_v13  ;;  %v3362_v13 = vmov 0   ;;  %552 = vmatpush.msra.mxu1 %v2190_v15 }
  0x3d   :  { %385 = vmatmul.f32.vlgmr.msrb.gmra.mxu0 %v2080_v19  ;;  %424 = vmatpush.msra.mxu2 %v2434_v12  ;;  %v517_v14 = vsel %vm516_vm1, 1, %v3362_v13 }
  0x3e   :  { %1798 = vmatmul.msk.f32.gmra.mxu2 %vm76_vm0, %v54_v59  ;;  %405 = vmatmul.f32.vlgmr.msrb.gmra.mxu1 %v2080_v19 }
  0x3f   :  { %1806 = vmatmul.msk.f32.gmra.mxu3 %vm76_vm0, %v54_v59  ;;  %1849 = vset.pattern.permute.xlu0 %v3362_v13  ;;  %v3481_v59 = vld [vmem:[#allocation24_spill] sm:$0xff] }
  0x40   :  { %571 = vmatpush.msrb.mxu2 %v2196_v18  ;;  %519 = vperm.xlu0 %1849, %v517_v14   ;;  %v679_v14 = vsel %vm678_vm2, 1, %v3362_v13  ;;  %v3485_v13 = vld [vmem:[#allocation8_spill] sm:$0xff] }
  0x41   :  { %592 = vmatpush.msrb.mxu3 %v2192_v16  ;;  %533 = vmatpush.msra.mxu0 %v2194_v17 }
  0x42   :  { %572 = vmatpush.msrb.mxu2 %v2224_v24  ;;  %553 = vmatpush.msra.mxu1 %v2214_v21 }
  0x43   :  { %593 = vmatpush.msrb.mxu3 %v2222_v23  ;;  %534 = vmatpush.msra.mxu0 %v2216_v22 }
  0x44   :  { %573 = vmatpush.msrb.mxu2 %v2238_v28  ;;  %554 = vmatpush.msra.mxu1 %v2230_v25 }
  0x45   :  { %594 = vmatpush.msrb.mxu3 %v2236_v27  ;;  %535 = vmatpush.msra.mxu0 %v2232_v26 }
  0x46   :  { %1799 = vmatmul.msk.f32.gmra.mxu2 %vm76_vm0, %v55_v8  ;;  %555 = vmatpush.msra.mxu1 %v2241_v29 }
  0x47   :  { %1807 = vmatmul.msk.f32.gmra.mxu3 %vm76_vm0, %v55_v8  ;;  %574 = vmatpush.msrb.mxu2 %v2250_v32  ;;  %v3482_v8 = vld [vmem:[#allocation27_spill] sm:$0xff] }
  0x48   :  { %681 = vperm.xlu0 %1849, %v679_v14   ;;  %595 = vmatpush.msrb.mxu3 %v2248_v31  ;;  %v3483_v14 = vld [vmem:[#allocation28_spill] sm:$0xff] }
  0x49   :  { %575 = vmatpush.msrb.mxu2 %v2273_v37  ;;  %536 = vmatpush.msra.mxu0 %v2243_v30 }
  0x4a   :  { %556 = vmatpush.msra.mxu1 %v2261_v34  ;;  %596 = vmatpush.msrb.mxu3 %v2271_v36 }
  0x4b   :  { %576 = vmatpush.msrb.mxu2 %v2287_v41  ;;  %537 = vmatpush.msra.mxu0 %v2263_v35 }
  0x4c   :  { %557 = vmatpush.msra.mxu1 %v2279_v38  ;;  %597 = vmatpush.msrb.mxu3 %v2285_v40 }
  0x4d   :  { %577 = vmatpush.msrb.mxu2 %v2299_v45  ;;  %538 = vmatpush.msra.mxu0 %v2281_v39 }
  0x4e   :  { %1800 = vmatmul.msk.f32.gmra.mxu2 %vm76_vm0, %v2158_v6  ;;  %558 = vmatpush.msra.mxu1 %v2289_v42 }
  0x4f   :  { %1808 = vmatmul.msk.f32.gmra.mxu3 %vm76_vm0, %v2158_v6  ;;  %578 = vmatpush.msrb.mxu2 %v2322_v50  ;;  %v3479_v6 = vld [vmem:[#allocation23_spill] sm:$0xff] }
  0x50   :  { %598 = vmatpush.msrb.mxu3 %v2297_v44  ;;  %539 = vmatpush.msra.mxu0 %v2291_v43 }
  0x51   :  { %559 = vmatpush.msra.mxu1 %v2310_v47  ;;  %579 = vmatpush.msrb.mxu2 %v2336_v54 }
  0x52   :  { %599 = vmatpush.msrb.mxu3 %v2320_v49  ;;  %540 = vmatpush.msra.mxu0 %v2312_v48 }
  0x53   :  { %560 = vmatpush.msra.mxu1 %v2328_v51  ;;  %580 = vmatpush.msrb.mxu2 %v2348_v58 }
  0x54   :  { %600 = vmatpush.msrb.mxu3 %v2334_v53  ;;  %541 = vmatpush.msra.mxu0 %v2330_v52 }
  0x55   :  { %561 = vmatpush.msra.mxu1 %v2338_v55  ;;  %581 = vmatpush.msrb.mxu2 %v2375_v1 }
  0x56   :  { %1801 = vmatmul.msk.f32.gmra.mxu2 %vm76_vm0, %v2206_v20  ;;  %601 = vmatpush.msrb.mxu3 %v2346_v57 }
  0x57   :  { %1809 = vmatmul.msk.f32.gmra.mxu3 %vm76_vm0, %v2206_v20  ;;  %542 = vmatpush.msra.mxu0 %v2340_v56  ;;  %v3480_v20 = vld [vmem:[#allocation25_spill] sm:$0xff] }
  0x58   :  { %562 = vmatpush.msra.mxu1 %v2357_v60  ;;  %582 = vmatpush.msrb.mxu2 %v2381_v3 }
  0x59   :  { %602 = vmatpush.msrb.mxu3 %v2366_v62  ;;  %543 = vmatpush.msra.mxu0 %v2359_v61 }
  0x5a   :  { %563 = vmatpush.msra.mxu1 %v2371_v63  ;;  %583 = vmatpush.msrb.mxu2 %v2415_v5 }
  0x5b   :  { %603 = vmatpush.msrb.mxu3 %v2379_v2  ;;  %544 = vmatpush.msra.mxu0 %v2373_v0 }
  0x5c   :  { %564 = vmatpush.msra.mxu1 %v3479_v6  ;;  %584 = vmatpush.msrb.mxu2 %v2419_v7 }
  0x5d   :  { %604 = vmatpush.msrb.mxu3 %v3480_v20  ;;  %545 = vmatpush.msra.mxu0 %v3481_v59 }
  0x5e   :  { %425 = vmatmul.f32.vlgmr.msra.gmra.mxu2 %v2080_v19  ;;  %565 = vmatpush.msra.mxu1 %v2400_v11  ;;  %v3486_v11 = vld [vmem:[#allocation9_spill] sm:$0xff] }
  0x5f   :  { %445 = vmatmul.f32.vlgmr.msra.gmra.mxu3 %v2080_v19  ;;  %585 = vmatpush.msrb.mxu2 %v2426_v46  ;;  %v3484_v19 = vld [vmem:[#allocation7_spill] sm:$0xff] }
  0x60   :  { %605 = vmatpush.msrb.mxu3 %v2413_v33  ;;  %546 = vmatpush.msra.mxu0 %v3482_v8 }
  0x61   :  { %566 = vmatpush.msra.mxu1 %v3483_v14  ;;  %586 = vmatpush.msrb.mxu2 %v2434_v12 }
  0x62   :  { %606 = vmatpush.msrb.mxu3 %v2421_v4  ;;  %693 = vmatpush.msrb.mxu0 %v2170_v9 }
  0x63   :  { %713 = vmatpush.msrb.mxu1 %v3484_v19  ;;  %733 = vmatpush.msra.mxu2 %v2196_v18 }
  0x64   :  { %753 = vmatpush.msra.mxu3 %v3485_v13  ;;  %694 = vmatpush.msrb.mxu0 %v3486_v11 }
  0x65   :  { %714 = vmatpush.msrb.mxu1 %v2190_v15  ;;  %734 = vmatpush.msra.mxu2 %v2224_v24 }
  0x66   :  { %754 = vmatpush.msra.mxu3 %v2192_v16  ;;  %695 = vmatpush.msrb.mxu0 %v2194_v17 }
  0x67   :  { %715 = vmatpush.msrb.mxu1 %v2214_v21  ;;  %735 = vmatpush.msra.mxu2 %v2238_v28  ;;  %v3487_v28 = vmov 0  }
  0x68   :  { %755 = vmatpush.msra.mxu3 %v2222_v23  ;;  %696 = vmatpush.msrb.mxu0 %v2216_v22  ;;  %v1489_v23 = vsel %vm1488_vm3, 1, %v3487_v28 }
  0x69   :  { %716 = vmatpush.msrb.mxu1 %v2230_v25  ;;  %736 = vmatpush.msra.mxu2 %v2250_v32 }
  0x6a   :  { %756 = vmatpush.msra.mxu3 %v2236_v27  ;;  %697 = vmatpush.msrb.mxu0 %v2232_v26 }
  0x6b   :  { %717 = vmatpush.msrb.mxu1 %v2241_v29  ;;  %737 = vmatpush.msra.mxu2 %v2273_v37 }
  0x6c   :  { %757 = vmatpush.msra.mxu3 %v2248_v31  ;;  %698 = vmatpush.msrb.mxu0 %v2243_v30 }
  0x6d   :  { %718 = vmatpush.msrb.mxu1 %v2261_v34  ;;  %1491 = vperm.xlu0 %1849, %v1489_v23   ;;  %v3488_v23 = vld [vmem:[#allocation26_spill] sm:$0xff] }
  0x6e   :  { %738 = vmatpush.msra.mxu2 %v2287_v41  ;;  %758 = vmatpush.msra.mxu3 %v2271_v36 }
  0x6f   :  { %699 = vmatpush.msrb.mxu0 %v2263_v35  ;;  %719 = vmatpush.msrb.mxu1 %v2279_v38 }
  0x70   :  { %739 = vmatpush.msra.mxu2 %v2299_v45  ;;  %759 = vmatpush.msra.mxu3 %v2285_v40 }
  0x71   :  { %700 = vmatpush.msrb.mxu0 %v2281_v39  ;;  %720 = vmatpush.msrb.mxu1 %v2289_v42 }
  0x72   :  { %740 = vmatpush.msra.mxu2 %v2322_v50  ;;  %760 = vmatpush.msra.mxu3 %v2297_v44 }
  0x73   :  { %701 = vmatpush.msrb.mxu0 %v2291_v43  ;;  %721 = vmatpush.msrb.mxu1 %v2310_v47 }
  0x74   :  { %741 = vmatpush.msra.mxu2 %v2336_v54  ;;  %761 = vmatpush.msra.mxu3 %v2320_v49 }
  0x75   :  { %702 = vmatpush.msrb.mxu0 %v2312_v48  ;;  %722 = vmatpush.msrb.mxu1 %v2328_v51 }
  0x76   :  { %742 = vmatpush.msra.mxu2 %v2348_v58  ;;  %762 = vmatpush.msra.mxu3 %v2334_v53 }
  0x77   :  { %703 = vmatpush.msrb.mxu0 %v2330_v52  ;;  %723 = vmatpush.msrb.mxu1 %v2338_v55 }
  0x78   :  { %743 = vmatpush.msra.mxu2 %v2375_v1  ;;  %763 = vmatpush.msra.mxu3 %v2346_v57 }
  0x79   :  { %704 = vmatpush.msrb.mxu0 %v2340_v56  ;;  %724 = vmatpush.msrb.mxu1 %v2357_v60 }
  0x7a   :  { %744 = vmatpush.msra.mxu2 %v2381_v3  ;;  %764 = vmatpush.msra.mxu3 %v2366_v62 }
  0x7b   :  { %705 = vmatpush.msrb.mxu0 %v2359_v61  ;;  %725 = vmatpush.msrb.mxu1 %v2371_v63 }
  0x7c   :  { %745 = vmatpush.msra.mxu2 %v2415_v5  ;;  %765 = vmatpush.msra.mxu3 %v2379_v2 }
  0x7d   :  { %706 = vmatpush.msrb.mxu0 %v2373_v0  ;;  %726 = vmatpush.msrb.mxu1 %v3479_v6 }
  0x7e   :  { %746 = vmatpush.msra.mxu2 %v2419_v7  ;;  %766 = vmatpush.msra.mxu3 %v3480_v20 }
  0x7f   :  { %707 = vmatpush.msrb.mxu0 %v3481_v59  ;;  %727 = vmatpush.msrb.mxu1 %v3488_v23  ;;  %v66_v23 = vld [vmem:[%s3340_s4] sm:$0xf] }
  0x80   :  { %747 = vmatpush.msra.mxu2 %v2426_v46  ;;  %767 = vmatpush.msra.mxu3 %v2413_v33  ;;  %v68_v59 = vperm.slane %v66_v23, 0  ;;  %v69_v33 = vperm.slane %v66_v23, 1 }
  0x81   :  { %708 = vmatpush.msrb.mxu0 %v3482_v8  ;;  %728 = vmatpush.msrb.mxu1 %v3483_v14 }
  0x82   :  { %748 = vmatpush.msra.mxu2 %v2434_v12  ;;  %768 = vmatpush.msra.mxu3 %v2421_v4 }
  0x83   :  { %1850 = vset.pattern.permute.xlu1 %v3487_v28  ;;  %1851 = vset.pattern.permute.xlu2 %v3487_v28 }
  0x8a   :  { %v118_v10 = vpop.f32.mrf.mxu0 }
  0x8b   :  { %v159_v46 = vpop.f32.mrf.mxu1 }
  0x90   :  { %v136_v20 = vpop.f32.mrf.mxu2 }
  0x91   :  { %v2595_v8 = vadd.f32 %v136_v20, %v68_v59  ;;  %v177_v14 = vpop.f32.mrf.mxu3 }
  0x92   :  { %v2597_v7 = vadd.f32 %v177_v14, %v69_v33  ;;  %v121_v12 = vpop.f32.mrf.mxu0 }
  0x93   :  { %3489 = vst [vmem:[#allocation7_spill] sm:$0xff] %v2595_v8  ;;  %v2599_v4 = vadd.f32 %v121_v12, %v68_v59  ;;  %v162_v6 = vpop.f32.mrf.mxu1 }
  0x94   :  { %3490 = vst [vmem:[#allocation8_spill] sm:$0xff] %v2597_v7  ;;  %v2601_v0 = vadd.f32 %v162_v6, %v69_v33 }
  0x95   :  { %3491 = vst [vmem:[#allocation9_spill] sm:$0xff] %v2599_v4 }
  0x96   :  { %3492 = vst [vmem:[#allocation36_spill] sm:$0xff] %v2601_v0 }
  0x99   :  { %v139_v28 = vpop.f32.mrf.mxu2 }
  0x9a   :  { %v2603_v2 = vadd.f32 %v139_v28, %v68_v59  ;;  %v180_v5 = vpop.f32.mrf.mxu3  ;;  %v124_v61 = vpop.f32.mrf.mxu0  ;;  %v70_v28 = vperm.slane %v66_v23, 2 }
  0x9b   :  { %v2605_v63 = vadd.f32 %v180_v5, %v69_v33  ;;  %v2607_v62 = vadd.f32 %v124_v61, %v68_v59  ;;  %v165_v20 = vpop.f32.mrf.mxu1 }
  0x9c   :  { %3493 = vst [vmem:[#allocation37_spill] sm:$0xff] %v2603_v2  ;;  %v2609_v8 = vadd.f32 %v165_v20, %v69_v33  ;;  %v71_v2 = vperm.slane %v66_v23, 3 }
  0x9d   :  { %3494 = vst [vmem:[#allocation38_spill] sm:$0xff] %v2605_v63 }
  0x9e   :  { %3495 = vst [vmem:[#allocation39_spill] sm:$0xff] %v2607_v62 }
  0x9f   :  { %3496 = vst [vmem:[#allocation40_spill] sm:$0xff] %v2609_v8 }
  0xa1   :  { %v2611_v14 = vpop.f32.mrf.mxu2 }
  0xa2   :  { %v2613_v7 = vpop.f32.mrf.mxu3  ;;  %v127_v12 = vpop.f32.mrf.mxu0 }
  0xa3   :  { %v2615_v4 = vadd.f32 %v127_v12, %v68_v59  ;;  %v168_v6 = vpop.f32.mrf.mxu1 }
  0xa4   :  { %v2617_v0 = vadd.f32 %v168_v6, %v69_v33 }
  0xa5   :  { %3497 = vst [vmem:[#allocation41_spill] sm:$0xff] %v2615_v4 }
  0xa6   :  { %3498 = vst [vmem:[#allocation42_spill] sm:$0xff] %v2617_v0 }
  0xa9   :  { %v203_v5 = vpop.f32.mrf.mxu2 }
  0xaa   :  { %v2619_v63 = vadd.f32 %v203_v5, %v70_v28  ;;  %v244_v61 = vpop.f32.mrf.mxu3  ;;  %v130_v20 = vpop.f32.mrf.mxu0 }
  0xab   :  { %v2621_v62 = vadd.f32 %v244_v61, %v71_v2  ;;  %v2623_v8 = vadd.f32 %v130_v20, %v68_v59  ;;  %v171_v3 = vpop.f32.mrf.mxu1 }
  0xac   :  { %3499 = vst [vmem:[#allocation43_spill] sm:$0xff] %v2619_v63  ;;  %v2625_v60 = vadd.f32 %v171_v3, %v69_v33 }
  0xad   :  { %3500 = vst [vmem:[#allocation44_spill] sm:$0xff] %v2621_v62  ;;  %v119_v62 = vadd.f32 %v118_v10, %v68_v59 }
  0xae   :  { %3501 = vst [vmem:[#allocation45_spill] sm:$0xff] %v2623_v8  ;;  %v160_v8 = vadd.f32 %v159_v46, %v69_v33 }
  0xaf   :  { %3502 = vst [vmem:[#allocation46_spill] sm:$0xff] %v2625_v60 }
  0xb1   :  { %v206_v56 = vpop.f32.mrf.mxu2 }
  0xb2   :  { %v2627_v12 = vadd.f32 %v206_v56, %v70_v28  ;;  %v247_v4 = vpop.f32.mrf.mxu3  ;;  %v133_v0 = vpop.f32.mrf.mxu0 }
  0xb3   :  { %v2629_v6 = vadd.f32 %v247_v4, %v71_v2  ;;  %v2631_v23 = vadd.f32 %v133_v0, %v68_v59  ;;  %v174_v5 = vpop.f32.mrf.mxu1 }
  0xb4   :  { %3503 = vst [vmem:[#allocation47_spill] sm:$0xff] %v2627_v12  ;;  %v2633_v63 = vadd.f32 %v174_v5, %v69_v33 }
  0xb5   :  { %3504 = vst [vmem:[#allocation48_spill] sm:$0xff] %v2629_v6 }
  0xb6   :  { %3505 = vst [vmem:[#allocation49_spill] sm:$0xff] %v2631_v23 }
  0xb7   :  { %3506 = vst [vmem:[#allocation50_spill] sm:$0xff] %v2633_v63 }
  0xb9   :  { %v209_v61 = vpop.f32.mrf.mxu2 }
  0xba   :  { %v2635_v57 = vadd.f32 %v209_v61, %v70_v28  ;;  %v250_v20 = vpop.f32.mrf.mxu3  ;;  %v386_v60 = vpop.f32.mrf.mxu0 }
  0xbb   :  { %v2637_v3 = vadd.f32 %v250_v20, %v71_v2  ;;  %v449_v56 = vadd.f32 %v386_v60, %v119_v62  ;;  %v406_v12 = vpop.f32.mrf.mxu1 }
  0xbc   :  { %3507 = vst [vmem:[#allocation51_spill] sm:$0xff] %v2635_v57  ;;  %v450_v1 = vadd.f32 %v406_v12, %v160_v8  ;;  %v201_v57 = vadd.f32 %v2611_v14, %v70_v28 }
  0xbd   :  { %3508 = vst [vmem:[#allocation52_spill] sm:$0xff] %v2637_v3  ;;  %v1810_v4 = vmul.f32 -1.442695, %v449_v56 }
  0xbe   :  { %v1811_v6 = vmul.f32 -1.442695, %v450_v1 }
  0xbf   :  { %1854 = vpow2.f32 %v1810_v4 }
  0xc0   :  { %1856 = vpow2.f32 %v1811_v6 }
  0xc1   :  { %v212_v0 = vpop.f32.mrf.mxu2 }
  0xc2   :  { %v2639_v23 = vadd.f32 %v212_v0, %v70_v28  ;;  %v253_v5 = vpop.f32.mrf.mxu3 }
  0xc3   :  { %v2641_v63 = vadd.f32 %v253_v5, %v71_v2 }
  0xc4   :  { %3509 = vst [vmem:[#allocation53_spill] sm:$0xff] %v2639_v23 }
  0xc5   :  { %3510 = vst [vmem:[#allocation54_spill] sm:$0xff] %v2641_v63  ;;  %v1855_v10 = vpop.eup %1854 }
  0xc6   :  { %v1857_v59 = vpop.eup %1856  ;;  %v456_v46 = vadd.f32 1.0, %v1855_v10 }
  0xc7   :  { %v475_v61 = vadd.f32 1.0, %v1857_v59 }
  0xc8   :  { %vm462_vm8 = vweird.f32 %v456_v46 }
  0xc9   :  { %v215_v33 = vpop.f32.mrf.mxu2  ;;  %1858 = vrcp.f32 %v475_v61  ;;  %vm481_vm5 = vweird.f32 %v475_v61 }
  0xca   :  { %v2643_v20 = vadd.f32 %v215_v33, %v70_v28  ;;  %v256_v60 = vpop.f32.mrf.mxu3  ;;  %1860 = vrcp.f32 %v456_v46 }
  0xcb   :  { %v2645_v62 = vadd.f32 %v256_v60, %v71_v2 }
  0xcc   :  { %3511 = vst [vmem:[#allocation55_spill] sm:$0xff] %v2643_v20 }
  0xcd   :  { %3512 = vst [vmem:[#allocation56_spill] sm:$0xff] %v2645_v62 }
  0xcf   :  { %v1859_v8 = vpop.eup %1858 }
  0xd0   :  { %v1861_v4 = vpop.eup %1860  ;;  %v477_v0 = vmul.f32 %v1859_v8, %v475_v61  ;;  %vm482_vm4 = vweird.f32 %v1859_v8 }
  0xd1   :  { %v218_v1 = vpop.f32.mrf.mxu2  ;;  %v458_v5 = vmul.f32 %v1861_v4, %v456_v46  ;;  %vm463_vm6 = vweird.f32 %v1861_v4  ;;  %vm483_vm7 = vmor %vm481_vm5, %vm482_vm4 }
  0xd2   :  { %v2647_v12 = vadd.f32 %v218_v1, %v70_v28  ;;  %v259_v6 = vpop.f32.mrf.mxu3  ;;  %v478_v59 = vsub.f32 1.0, %v477_v0  ;;  %v242_v1 = vadd.f32 %v2613_v7, %v71_v2  ;;  %vm464_vm9 = vmor %vm462_vm8, %vm463_vm6 }
  0xd3   :  { %v2649_v56 = vadd.f32 %v259_v6, %v71_v2  ;;  %v459_v20 = vsub.f32 1.0, %v458_v5  ;;  %v468_v5 = vand.u32 2147483648, %v456_v46 }
  0xd4   :  { %3513 = vst [vmem:[#allocation57_spill] sm:$0xff] %v2647_v12  ;;  %v479_v62 = vmul.f32 %v1859_v8, %v478_v59 }
  0xd5   :  { %3514 = vst [vmem:[#allocation58_spill] sm:$0xff] %v2649_v56  ;;  %v460_v63 = vmul.f32 %v1861_v4, %v459_v20  ;;  %v487_v56 = vand.u32 2147483648, %v475_v61  ;;  %v466_v20 = vand.u32 2147483647, %v456_v46  ;;  %v469_v7 = vor.u32 1.1754944e-38, %v468_v5 }
  0xd6   :  { %v480_v6 = vadd.f32 %v1859_v8, %v479_v62 }
  0xd7   :  { %v461_v55 = vadd.f32 %v1861_v4, %v460_v63  ;;  %vm467_vm11 = vcmp.eq.f32.partialorder %v466_v20, 8.507059e+37 }
  0xd8   :  { %v484_v59 = vsel %vm483_vm7, %v1859_v8, %v480_v6 }
  0xd9   :  { %v221_v23 = vpop.f32.mrf.mxu2 }
  0xda   :  { %v2651_v10 = vadd.f32 %v221_v23, %v70_v28  ;;  %v262_v33 = vpop.f32.mrf.mxu3  ;;  %v485_v23 = vand.u32 2147483647, %v475_v61  ;;  %v488_v28 = vor.u32 1.1754944e-38, %v487_v56 }
  0xdb   :  { %v2653_v60 = vadd.f32 %v262_v33, %v71_v2  ;;  %v465_v2 = vsel %vm464_vm9, %v1861_v4, %v461_v55 }
  0xdc   :  { %3515 = vst [vmem:[#allocation59_spill] sm:$0xff] %v2651_v10  ;;  %vm486_vm10 = vcmp.eq.f32.partialorder %v485_v23, 8.507059e+37 }
  0xdd   :  { %3516 = vst [vmem:[#allocation60_spill] sm:$0xff] %v2653_v60  ;;  %v489_v62 = vsel %vm486_vm10, %v488_v28, %v484_v59  ;;  %v2932_v60 = vld [vmem:[#allocation4] sm:$0xff] }
  0xde   :  { %v511_v61 = vmul.f32 0.0, %v489_v62 }
  0xe1   :  { %v426_v12 = vpop.f32.mrf.mxu2 }
  0xe2   :  { %v451_v3 = vadd.f32 %v426_v12, %v201_v57  ;;  %v446_v0 = vpop.f32.mrf.mxu3  ;;  %v520_v57 = vpop.permute.xlu0 %519  ;;  %v470_v12 = vsel %vm467_vm11, %v469_v7, %v465_v2  ;;  %v3517_v7 = vld [vmem:[#allocation11_spill] sm:$0xff] }
  0xe3   :  { %v452_v10 = vadd.f32 %v446_v0, %v242_v1  ;;  %vm521_vm12 = vcmp.eq.s32.totalorder %v520_v57, 1  ;;  %v3545_v57 = vld [vmem:[#allocation35_spill] sm:$0xff] }
  0xe4   :  { %1862 = vtanh.f32 %v451_v3  ;;  %vm840_vm1 = vcmp.gt.s32.totalorder %v3545_v57, 2  ;;  %vm1002_vm2 = vcmp.gt.s32.totalorder %v3545_v57, 3  ;;  %vm1650_vm8 = vcmp.gt.s32.totalorder %v3545_v57, 7  ;;  %v2794_v57 = vld [vmem:[#allocation4 + $0x190] sm:$0xff] }
  0xe5   :  { %v1812_v14 = vmul.f32 -1.442695, %v452_v10 }
  0xe7   :  { %1864 = vpow2.f32 %v1812_v14 }
  0xea   :  { %v1863_v63 = vpop.eup %1862 }
  0xeb   :  { %v512_v33 = vmul.f32 %v1863_v63, %v470_v12  ;;  %v3546_v12 = vmov 0  }
  0xed   :  { %v1865_v1 = vpop.eup %1864  ;;  %v513_v3 = vadd.f32 %v512_v33, %v511_v61  ;;  %v841_v61 = vsel %vm840_vm1, 1, %v3546_v12 }
  0xee   :  { %v495_v0 = vadd.f32 1.0, %v1865_v1  ;;  %843 = vperm.xlu1 %1850, %v841_v61   ;;  %v2800_v61 = vld [vmem:[#allocation4 + $0x160] sm:$0xff] }
  0xef   :  { %v2658_v46 = vsel %vm521_vm12, %v513_v3, 0.0 }
  0xf0   :  { %1866 = vrcp.f32 %v495_v0  ;;  %v507_v4 = vand.u32 2147483648, %v495_v0  ;;  %v505_v6 = vand.u32 2147483647, %v495_v0  ;;  %vm501_vm14 = vweird.f32 %v495_v0 }
  0xf1   :  { %1868 = vtanh.f32 %v513_v3 }
  0xf2   :  { %v508_v5 = vor.u32 1.1754944e-38, %v507_v4  ;;  %vm506_vm0 = vcmp.eq.f32.partialorder %v505_v6, 8.507059e+37  ;;  %v1003_v6 = vsel %vm1002_vm2, 1, %v3546_v12 }
  0xf6   :  { %v1867_v8 = vpop.eup %1866  ;;  %1005 = vperm.xlu1 %1850, %v1003_v6   ;;  %v2830_v6 = vld [vmem:[#allocation4 + $0x130] sm:$0xff] }
  0xf7   :  { %v497_v55 = vmul.f32 %v1867_v8, %v495_v0  ;;  %vm502_vm13 = vweird.f32 %v1867_v8  ;;  %v1869_v59 = vpop.eup %1868  ;;  %v3547_v0 = vld [vmem:[#allocation43_spill] sm:$0xff] }
  0xf8   :  { %vm503_vm15 = vmor %vm501_vm14, %vm502_vm13 }
  0xf9   :  { %v498_v56 = vsub.f32 1.0, %v497_v55 }
  0xfb   :  { %v499_v10 = vmul.f32 %v1867_v8, %v498_v56 }
  0xfd   :  { %v500_v23 = vadd.f32 %v1867_v8, %v499_v10 }
  0xff   :  { %v504_v20 = vsel %vm503_vm15, %v1867_v8, %v500_v23 }
 0x100   :  { %v509_v14 = vsel %vm506_vm0, %v508_v5, %v504_v20 }
 0x101   :  { %v515_v28 = vmul.f32 %v1869_v59, %v509_v14 }
 0x103   :  { %1813 = vmatmul.msk.f32.vlgmr.msra.gmra.mxu0 %vm521_vm12, %v515_v28  ;;  %1814 = vmatmul.msk.f32.vlgmr.msra.gmra.mxu1 %vm521_vm12, %v515_v28  ;;  %v2663_v2 = vsel %vm521_vm12, %v515_v28, 0.0 }
 0x104   :  { %1815 = vmatmul.msk.f32.vlgmr.msrb.gmra.mxu2 %vm521_vm12, %v515_v28  ;;  %1816 = vmatmul.msk.f32.vlgmr.msrb.gmra.mxu3 %vm521_vm12, %v515_v28 }
 0x105   :  { %855 = vmatpush.msra.mxu0 %v2170_v9  ;;  %875 = vmatpush.msra.mxu1 %v3484_v19  ;;  %v3518_v9 = vld [vmem:[#allocation10_spill] sm:$0xff] }
 0x106   :  { %895 = vmatpush.msrb.mxu2 %v2196_v18  ;;  %915 = vmatpush.msrb.mxu3 %v3485_v13  ;;  %v3519_v13 = vld [vmem:[#allocation12_spill] sm:$0xff]  ;;  %v3523_v18 = vld [vmem:[#allocation15_spill] sm:$0xff] }
 0x107   :  { %856 = vmatpush.msra.mxu0 %v3486_v11  ;;  %876 = vmatpush.msra.mxu1 %v2190_v15  ;;  %v3520_v15 = vld [vmem:[#allocation20_spill] sm:$0xff] }
 0x108   :  { %896 = vmatpush.msrb.mxu2 %v2224_v24  ;;  %916 = vmatpush.msrb.mxu3 %v2192_v16  ;;  %v3521_v16 = vld [vmem:[#allocation14_spill] sm:$0xff]  ;;  %v3526_v24 = vld [vmem:[#allocation16_spill] sm:$0xff] }
 0x109   :  { %857 = vmatpush.msra.mxu0 %v2194_v17  ;;  %877 = vmatpush.msra.mxu1 %v2214_v21  ;;  %v3522_v17 = vld [vmem:[#allocation13_spill] sm:$0xff]  ;;  %v3524_v21 = vld [vmem:[#allocation22_spill] sm:$0xff] }
 0x10a   :  { %897 = vmatpush.msrb.mxu2 %v3517_v7  ;;  %917 = vmatpush.msrb.mxu3 %v3518_v9 }
 0x10b   :  { %858 = vmatpush.msra.mxu0 %v2216_v22  ;;  %878 = vmatpush.msra.mxu1 %v2230_v25  ;;  %v3525_v22 = vld [vmem:[#allocation17_spill] sm:$0xff]  ;;  %v3527_v25 = vld [vmem:[#allocation18_spill] sm:$0xff] }
 0x10c   :  { %898 = vmatpush.msrb.mxu2 %v2250_v32  ;;  %918 = vmatpush.msrb.mxu3 %v2236_v27  ;;  %v3529_v27 = vld [vmem:[#allocation21_spill] sm:$0xff] }
 0x10d   :  { %859 = vmatpush.msra.mxu0 %v2232_v26  ;;  %879 = vmatpush.msra.mxu1 %v2241_v29  ;;  %v3528_v26 = vld [vmem:[#allocation30_spill] sm:$0xff]  ;;  %v3530_v29 = vld [vmem:[#allocation19_spill] sm:$0xff]  ;;  %v3533_v32 = vld [vmem:[#allocation25_spill] sm:$0xff] }
 0x10e   :  { %899 = vmatpush.msrb.mxu2 %v2273_v37  ;;  %919 = vmatpush.msrb.mxu3 %v2248_v31  ;;  %v3532_v31 = vld [vmem:[#allocation31_spill] sm:$0xff]  ;;  %v3537_v37 = vld [vmem:[#allocation29_spill] sm:$0xff] }
 0x10f   :  { %860 = vmatpush.msra.mxu0 %v2243_v30  ;;  %880 = vmatpush.msra.mxu1 %v2261_v34  ;;  %v3531_v30 = vld [vmem:[#allocation23_spill] sm:$0xff]  ;;  %v3534_v34 = vld [vmem:[#allocation24_spill] sm:$0xff] }
 0x110   :  { %900 = vmatpush.msrb.mxu2 %v2287_v41  ;;  %920 = vmatpush.msrb.mxu3 %v2271_v36  ;;  %v3536_v36 = vld [vmem:[#allocation33_spill] sm:$0xff]  ;;  %v3541_v41 = vld [vmem:[#allocation32_spill] sm:$0xff] }
 0x111   :  { %861 = vmatpush.msra.mxu0 %v2263_v35  ;;  %881 = vmatpush.msra.mxu1 %v2279_v38  ;;  %v3535_v35 = vld [vmem:[#allocation26_spill] sm:$0xff]  ;;  %v3538_v38 = vld [vmem:[#allocation27_spill] sm:$0xff]  ;;  %3572 = vst [vmem:[#allocation32_spill] sm:$0xff] %v2932_v60 }
 0x112   :  { %901 = vmatpush.msrb.mxu2 %v2299_v45  ;;  %921 = vmatpush.msrb.mxu3 %v2285_v40  ;;  %v3540_v40 = vld [vmem:[#allocation34_spill] sm:$0xff] }
 0x113   :  { %862 = vmatpush.msra.mxu0 %v2281_v39  ;;  %882 = vmatpush.msra.mxu1 %v2289_v42  ;;  %v3539_v39 = vld [vmem:[#allocation28_spill] sm:$0xff] }
 0x114   :  { %902 = vmatpush.msrb.mxu2 %v2322_v50  ;;  %922 = vmatpush.msrb.mxu3 %v2297_v44  ;;  %v3542_v44 = vld [vmem:[#allocation9_spill] sm:$0xff] }
 0x115   :  { %863 = vmatpush.msra.mxu0 %v2291_v43  ;;  %883 = vmatpush.msra.mxu1 %v2310_v47  ;;  %v3543_v47 = vld [vmem:[#allocation36_spill] sm:$0xff] }
 0x116   :  { %903 = vmatpush.msrb.mxu2 %v2336_v54  ;;  %923 = vmatpush.msrb.mxu3 %v2320_v49 }
 0x117   :  { %864 = vmatpush.msra.mxu0 %v2312_v48  ;;  %884 = vmatpush.msra.mxu1 %v2328_v51 }
 0x118   :  { %904 = vmatpush.msrb.mxu2 %v2348_v58  ;;  %924 = vmatpush.msrb.mxu3 %v2334_v53 }
 0x119   :  { %865 = vmatpush.msra.mxu0 %v2330_v52  ;;  %885 = vmatpush.msra.mxu1 %v3519_v13  ;;  %v3544_v52 = vld [vmem:[#allocation44_spill] sm:$0xff] }
 0x11a   :  { %905 = vmatpush.msrb.mxu2 %v3520_v15  ;;  %925 = vmatpush.msrb.mxu3 %v3521_v16 }
 0x11b   :  { %866 = vmatpush.msra.mxu0 %v3522_v17  ;;  %886 = vmatpush.msra.mxu1 %v3523_v18 }
 0x11c   :  { %906 = vmatpush.msrb.mxu2 %v3524_v21  ;;  %926 = vmatpush.msrb.mxu3 %v3525_v22 }
 0x11d   :  { %867 = vmatpush.msra.mxu0 %v3526_v24  ;;  %887 = vmatpush.msra.mxu1 %v3527_v25 }
 0x11e   :  { %907 = vmatpush.msrb.mxu2 %v3528_v26  ;;  %927 = vmatpush.msrb.mxu3 %v3529_v27 }
 0x11f   :  { %868 = vmatpush.msra.mxu0 %v3530_v29  ;;  %888 = vmatpush.msra.mxu1 %v3531_v30  ;;  %v1651_v30 = vsel %vm1650_vm8, 1, %v3546_v12  ;;  %v2935_v12 = vld [vmem:[#allocation4 + $0x8] sm:$0xff] }
 0x120   :  { %908 = vmatpush.msrb.mxu2 %v3532_v31  ;;  %928 = vmatpush.msrb.mxu3 %v3533_v32  ;;  %3573 = vst [vmem:[#allocation9_spill] sm:$0xff] %v2935_v12 }
 0x121   :  { %869 = vmatpush.msra.mxu0 %v3534_v34  ;;  %889 = vmatpush.msra.mxu1 %v3535_v35  ;;  %v682_v34 = vpop.permute.xlu0 %681 }
 0x122   :  { %909 = vmatpush.msrb.mxu2 %v3536_v36  ;;  %929 = vmatpush.msrb.mxu3 %v3537_v37  ;;  %vm683_vm12 = vcmp.eq.s32.totalorder %v682_v34, 1  ;;  %v2902_v34 = vld [vmem:[#allocation4 + $0x70] sm:$0xff] }
 0x123   :  { %870 = vmatpush.msra.mxu0 %v3538_v38  ;;  %890 = vmatpush.msra.mxu1 %v3539_v39  ;;  %3562 = vst [vmem:[#allocation23_spill] sm:$0xff] %v2902_v34 }
 0x124   :  { %910 = vmatpush.msrb.mxu2 %v3540_v40  ;;  %930 = vmatpush.msrb.mxu3 %v3541_v41 }
 0x125   :  { %1653 = vperm.xlu1 %1850, %v1651_v30   ;;  %v2893_v30 = vld [vmem:[#allocation4 + $0x98] sm:$0xff] }
 0x126   :  { %3559 = vst [vmem:[#allocation30_spill] sm:$0xff] %v2893_v30 }
 0x180   :  { %v548_v42 = vpop.f32.mrf.mxu0  ;;  %v568_v43 = vpop.f32.mrf.mxu1 }
 0x181   :  { %v611_v45 = vadd.f32 %v548_v42, %v3542_v44  ;;  %v612_v48 = vadd.f32 %v568_v43, %v3543_v47  ;;  %v2755_v47 = vld [vmem:[#allocation4 + $0x1e8] sm:$0xff] }
 0x183   :  { %v1817_v49 = vmul.f32 -1.442695, %v611_v45  ;;  %v1818_v50 = vmul.f32 -1.442695, %v612_v48  ;;  %v2758_v48 = vld [vmem:[#allocation4 + $0x1f0] sm:$0xff] }
 0x185   :  { %1870 = vpow2.f32 %v1817_v49  ;;  %v2764_v49 = vld [vmem:[#allocation4 + $0x1c0] sm:$0xff] }
 0x186   :  { %1872 = vpow2.f32 %v1818_v50  ;;  %v2767_v50 = vld [vmem:[#allocation4 + $0x1c8] sm:$0xff] }
 0x187   :  { %v608_v51 = vpop.f32.mrf.mxu3  ;;  %v588_v63 = vpop.f32.mrf.mxu2 }
 0x188   :  { %v614_v53 = vadd.f32 %v608_v51, %v3544_v52  ;;  %v613_v8 = vadd.f32 %v588_v63, %v3547_v0  ;;  %v2770_v51 = vld [vmem:[#allocation4 + $0x1d0] sm:$0xff]  ;;  %v2773_v52 = vld [vmem:[#allocation4 + $0x1d8] sm:$0xff]  ;;  %v2812_v0 = vld [vmem:[#allocation4 + $0x140] sm:$0xff] }
 0x189   :  { %v2797_v63 = vld [vmem:[#allocation4 + $0x198] sm:$0xff] }
 0x18a   :  { %v1819_v54 = vmul.f32 -1.442695, %v614_v53  ;;  %v2776_v53 = vld [vmem:[#allocation4 + $0x1a0] sm:$0xff] }
 0x18b   :  { %v1871_v58 = vpop.eup %1870 }
 0x18c   :  { %v1873_v11 = vpop.eup %1872  ;;  %v618_v19 = vadd.f32 1.0, %v1871_v58  ;;  %1874 = vpow2.f32 %v1819_v54  ;;  %v2779_v54 = vld [vmem:[#allocation4 + $0x1a8] sm:$0xff]  ;;  %v2782_v58 = vld [vmem:[#allocation4 + $0x1b0] sm:$0xff] }
 0x18d   :  { %v637_v62 = vadd.f32 1.0, %v1873_v11  ;;  %v2785_v11 = vld [vmem:[#allocation4 + $0x1b8] sm:$0xff] }
 0x18e   :  { %1876 = vrcp.f32 %v618_v19  ;;  %v630_v5 = vand.u32 2147483648, %v618_v19  ;;  %v628_v14 = vand.u32 2147483647, %v618_v19  ;;  %vm624_vm6 = vweird.f32 %v618_v19 }
 0x18f   :  { %1878 = vrcp.f32 %v637_v62  ;;  %v649_v20 = vand.u32 2147483648, %v637_v62  ;;  %v647_v7 = vand.u32 2147483647, %v637_v62  ;;  %vm643_vm5 = vweird.f32 %v637_v62 }
 0x190   :  { %v631_v15 = vor.u32 1.1754944e-38, %v630_v5  ;;  %vm629_vm10 = vcmp.eq.f32.partialorder %v628_v14, 8.507059e+37  ;;  %v2836_v5 = vld [vmem:[#allocation4 + $0x100] sm:$0xff]  ;;  %v2845_v14 = vld [vmem:[#allocation4 + $0x118] sm:$0xff] }
 0x191   :  { %v650_v18 = vor.u32 1.1754944e-38, %v649_v20  ;;  %vm648_vm11 = vcmp.eq.f32.partialorder %v647_v7, 8.507059e+37  ;;  %v2839_v20 = vld [vmem:[#allocation4 + $0x108] sm:$0xff] }
 0x192   :  { %v1875_v33 = vpop.eup %1874  ;;  %v2851_v7 = vld [vmem:[#allocation4 + $0xe8] sm:$0xff] }
 0x193   :  { %v657_v1 = vadd.f32 1.0, %v1875_v33  ;;  %v2803_v33 = vld [vmem:[#allocation4 + $0x168] sm:$0xff] }
 0x194   :  { %v1877_v3 = vpop.eup %1876 }
 0x195   :  { %v1879_v55 = vpop.eup %1878  ;;  %v620_v56 = vmul.f32 %v1877_v3, %v618_v19  ;;  %1880 = vrcp.f32 %v657_v1  ;;  %vm625_vm3 = vweird.f32 %v1877_v3  ;;  %v669_v37 = vand.u32 2147483648, %v657_v1  ;;  %v2788_v19 = vld [vmem:[#allocation4 + $0x180] sm:$0xff] }
 0x196   :  { %v639_v4 = vmul.f32 %v1879_v55, %v637_v62  ;;  %1882 = vtanh.f32 %v613_v8  ;;  %vm644_vm4 = vweird.f32 %v1879_v55  ;;  %vm626_vm7 = vmor %vm624_vm6, %vm625_vm3  ;;  %vm663_vm14 = vweird.f32 %v657_v1  ;;  %v2791_v62 = vld [vmem:[#allocation4 + $0x188] sm:$0xff] }
 0x197   :  { %v621_v10 = vsub.f32 1.0, %v620_v56  ;;  %vm645_vm9 = vmor %vm643_vm5, %vm644_vm4  ;;  %v667_v39 = vand.u32 2147483647, %v657_v1  ;;  %v670_v41 = vor.u32 1.1754944e-38, %v669_v37  ;;  %v2815_v8 = vld [vmem:[#allocation4 + $0x148] sm:$0xff]  ;;  %v2821_v56 = vld [vmem:[#allocation4 + $0x158] sm:$0xff] }
 0x198   :  { %v640_v23 = vsub.f32 1.0, %v639_v4  ;;  %v2824_v4 = vld [vmem:[#allocation4 + $0x120] sm:$0xff]  ;;  %v2911_v37 = vld [vmem:[#allocation4 + $0x48] sm:$0xff] }
 0x199   :  { %v622_v59 = vmul.f32 %v1877_v3, %v621_v10  ;;  %vm668_vm0 = vcmp.eq.f32.partialorder %v667_v39, 8.507059e+37  ;;  %v2827_v10 = vld [vmem:[#allocation4 + $0x128] sm:$0xff]  ;;  %3565 = vst [vmem:[#allocation24_spill] sm:$0xff] %v2911_v37  ;;  %v2914_v39 = vld [vmem:[#allocation4 + $0x50] sm:$0xff] }
 0x19a   :  { %v641_v28 = vmul.f32 %v1879_v55, %v640_v23  ;;  %v2833_v23 = vld [vmem:[#allocation4 + $0x138] sm:$0xff]  ;;  %3566 = vst [vmem:[#allocation26_spill] sm:$0xff] %v2914_v39 }
 0x19b   :  { %v1881_v9 = vpop.eup %1880  ;;  %v623_v13 = vadd.f32 %v1877_v3, %v622_v59  ;;  %v2842_v59 = vld [vmem:[#allocation4 + $0x110] sm:$0xff] }
 0x19c   :  { %v642_v16 = vadd.f32 %v1879_v55, %v641_v28  ;;  %v659_v17 = vmul.f32 %v1881_v9, %v657_v1  ;;  %v1883_v22 = vpop.eup %1882  ;;  %vm664_vm13 = vweird.f32 %v1881_v9  ;;  %v2806_v1 = vld [vmem:[#allocation4 + $0x170] sm:$0xff]  ;;  %v2848_v28 = vld [vmem:[#allocation4 + $0xe0] sm:$0xff] }
 0x19d   :  { %v627_v21 = vsel %vm626_vm7, %v1877_v3, %v623_v13  ;;  %vm665_vm15 = vmor %vm663_vm14, %vm664_vm13  ;;  %v2809_v3 = vld [vmem:[#allocation4 + $0x178] sm:$0xff] }
 0x19e   :  { %v632_v24 = vsel %vm629_vm10, %v631_v15, %v627_v21  ;;  %v646_v25 = vsel %vm645_vm9, %v1879_v55, %v642_v16  ;;  %v660_v26 = vsub.f32 1.0, %v659_v17  ;;  %v2818_v55 = vld [vmem:[#allocation4 + $0x150] sm:$0xff]  ;;  %v2857_v13 = vld [vmem:[#allocation4 + $0xf8] sm:$0xff]  ;;  %v2860_v15 = vld [vmem:[#allocation4 + $0xc0] sm:$0xff] }
 0x19f   :  { %v651_v27 = vsel %vm648_vm11, %v650_v18, %v646_v25  ;;  %v674_v29 = vmul.f32 %v1883_v22, %v632_v24  ;;  %3548 = vst [vmem:[#allocation11_spill] sm:$0xff] %v2860_v15  ;;  %v2863_v16 = vld [vmem:[#allocation4 + $0xc8] sm:$0xff]  ;;  %v2866_v17 = vld [vmem:[#allocation4 + $0xd0] sm:$0xff]  ;;  %v2869_v18 = vld [vmem:[#allocation4 + $0xd8] sm:$0xff] }
 0x1a0   :  { %v673_v31 = vmul.f32 %v651_v27, %v2658_v46  ;;  %v661_v32 = vmul.f32 %v1881_v9, %v660_v26  ;;  %3549 = vst [vmem:[#allocation10_spill] sm:$0xff] %v2863_v16  ;;  %v2872_v21 = vld [vmem:[#allocation4 + $0xa0] sm:$0xff]  ;;  %v2875_v22 = vld [vmem:[#allocation4 + $0xa8] sm:$0xff]  ;;  %v2878_v24 = vld [vmem:[#allocation4 + $0xb0] sm:$0xff] }
 0x1a1   :  { %3550 = vst [vmem:[#allocation12_spill] sm:$0xff] %v2866_v17  ;;  %v2881_v25 = vld [vmem:[#allocation4 + $0xb8] sm:$0xff]  ;;  %v2884_v26 = vld [vmem:[#allocation4 + $0x80] sm:$0xff]  ;;  %v2887_v27 = vld [vmem:[#allocation4 + $0x88] sm:$0xff] }
 0x1a2   :  { %v675_v35 = vadd.f32 %v674_v29, %v673_v31  ;;  %v662_v36 = vadd.f32 %v1881_v9, %v661_v32  ;;  %3551 = vst [vmem:[#allocation20_spill] sm:$0xff] %v2869_v18  ;;  %v2890_v29 = vld [vmem:[#allocation4 + $0x90] sm:$0xff]  ;;  %v2896_v31 = vld [vmem:[#allocation4 + $0x60] sm:$0xff]  ;;  %v2899_v32 = vld [vmem:[#allocation4 + $0x68] sm:$0xff] }
 0x1a3   :  { %3552 = vst [vmem:[#allocation14_spill] sm:$0xff] %v2872_v21 }
 0x1a4   :  { %1884 = vtanh.f32 %v675_v35  ;;  %v2743_v38 = vsel %vm683_vm12, %v675_v35, %v2658_v46  ;;  %v666_v40 = vsel %vm665_vm15, %v1881_v9, %v662_v36  ;;  %v2752_v46 = vld [vmem:[#allocation4 + $0x1e0] sm:$0xff]  ;;  %v2854_v9 = vld [vmem:[#allocation4 + $0xf0] sm:$0xff]  ;;  %3553 = vst [vmem:[#allocation13_spill] sm:$0xff] %v2875_v22  ;;  %v2905_v35 = vld [vmem:[#allocation4 + $0x78] sm:$0xff] }
 0x1a5   :  { %v671_v43 = vsel %vm668_vm0, %v670_v41, %v666_v40  ;;  %3554 = vst [vmem:[#allocation15_spill] sm:$0xff] %v2878_v24  ;;  %v2908_v36 = vld [vmem:[#allocation4 + $0x40] sm:$0xff]  ;;  %v2917_v40 = vld [vmem:[#allocation4 + $0x58] sm:$0xff] }
 0x1a6   :  { %3555 = vst [vmem:[#allocation22_spill] sm:$0xff] %v2881_v25  ;;  %v2920_v41 = vld [vmem:[#allocation4 + $0x20] sm:$0xff] }
 0x1a7   :  { %3556 = vst [vmem:[#allocation17_spill] sm:$0xff] %v2884_v26 }
 0x1a8   :  { %3557 = vst [vmem:[#allocation16_spill] sm:$0xff] %v2887_v27 }
 0x1a9   :  { %3558 = vst [vmem:[#allocation18_spill] sm:$0xff] %v2890_v29 }
 0x1aa   :  { %v1885_v42 = vpop.eup %1884  ;;  %3560 = vst [vmem:[#allocation21_spill] sm:$0xff] %v2896_v31 }
 0x1ab   :  { %v677_v44 = vmul.f32 %v1885_v42, %v671_v43  ;;  %3561 = vst [vmem:[#allocation19_spill] sm:$0xff] %v2899_v32  ;;  %v2923_v42 = vld [vmem:[#allocation4 + $0x28] sm:$0xff]  ;;  %v2926_v43 = vld [vmem:[#allocation4 + $0x30] sm:$0xff] }
 0x1ac   :  { %3563 = vst [vmem:[#allocation31_spill] sm:$0xff] %v2905_v35 }
 0x1ad   :  { %v2746_v45 = vsel %vm683_vm12, %v677_v44, %v2663_v2  ;;  %v2761_v2 = vld [vmem:[#allocation4 + $0x1f8] sm:$0xff]  ;;  %3564 = vst [vmem:[#allocation25_spill] sm:$0xff] %v2908_v36 }
 0x1ae   :  { %709 = vmatmul.f32.vlgmr.msrb.gmra.mxu0 %v2746_v45  ;;  %729 = vmatmul.f32.vlgmr.msrb.gmra.mxu1 %v2746_v45  ;;  %3567 = vst [vmem:[#allocation33_spill] sm:$0xff] %v2917_v40  ;;  %v2929_v44 = vld [vmem:[#allocation4 + $0x38] sm:$0xff] }
 0x1af   :  { %749 = vmatmul.f32.vlgmr.msra.gmra.mxu2 %v2746_v45  ;;  %769 = vmatmul.f32.vlgmr.msra.gmra.mxu3 %v2746_v45  ;;  %3568 = vst [vmem:[#allocation29_spill] sm:$0xff] %v2920_v41 }
 0x1b0   :  { %1017 = vmatpush.msrb.mxu0 %v2752_v46  ;;  %1037 = vmatpush.msrb.mxu1 %v2755_v47  ;;  %3569 = vst [vmem:[#allocation27_spill] sm:$0xff] %v2923_v42 }
 0x1b1   :  { %1057 = vmatpush.msra.mxu2 %v2758_v48  ;;  %1077 = vmatpush.msra.mxu3 %v2761_v2  ;;  %3570 = vst [vmem:[#allocation28_spill] sm:$0xff] %v2926_v43 }
 0x1b2   :  { %1018 = vmatpush.msrb.mxu0 %v2764_v49  ;;  %1038 = vmatpush.msrb.mxu1 %v2767_v50  ;;  %3571 = vst [vmem:[#allocation34_spill] sm:$0xff] %v2929_v44 }
 0x1b3   :  { %1058 = vmatpush.msra.mxu2 %v2770_v51  ;;  %1078 = vmatpush.msra.mxu3 %v2773_v52 }
 0x1b4   :  { %1019 = vmatpush.msrb.mxu0 %v2776_v53  ;;  %1039 = vmatpush.msrb.mxu1 %v2779_v54 }
 0x1b5   :  { %1059 = vmatpush.msra.mxu2 %v2782_v58  ;;  %1079 = vmatpush.msra.mxu3 %v2785_v11 }
 0x1b6   :  { %1020 = vmatpush.msrb.mxu0 %v2788_v19  ;;  %1040 = vmatpush.msrb.mxu1 %v2791_v62 }
 0x1b7   :  { %1060 = vmatpush.msra.mxu2 %v2794_v57  ;;  %1080 = vmatpush.msra.mxu3 %v2797_v63 }
 0x1b8   :  { %1021 = vmatpush.msrb.mxu0 %v2800_v61  ;;  %1041 = vmatpush.msrb.mxu1 %v2803_v33 }
 0x1b9   :  { %1061 = vmatpush.msra.mxu2 %v2806_v1  ;;  %1081 = vmatpush.msra.mxu3 %v2809_v3 }
 0x1ba   :  { %1022 = vmatpush.msrb.mxu0 %v2812_v0  ;;  %1042 = vmatpush.msrb.mxu1 %v2815_v8 }
 0x1bb   :  { %1062 = vmatpush.msra.mxu2 %v2818_v55  ;;  %1082 = vmatpush.msra.mxu3 %v2821_v56 }
 0x1bc   :  { %1023 = vmatpush.msrb.mxu0 %v2824_v4  ;;  %1043 = vmatpush.msrb.mxu1 %v2827_v10 }
 0x1bd   :  { %1063 = vmatpush.msra.mxu2 %v2830_v6  ;;  %1083 = vmatpush.msra.mxu3 %v2833_v23 }
 0x1be   :  { %1024 = vmatpush.msrb.mxu0 %v2836_v5  ;;  %1044 = vmatpush.msrb.mxu1 %v2839_v20 }
 0x1bf   :  { %1064 = vmatpush.msra.mxu2 %v2842_v59  ;;  %1084 = vmatpush.msra.mxu3 %v2845_v14 }
 0x1c0   :  { %1025 = vmatpush.msrb.mxu0 %v2848_v28  ;;  %1045 = vmatpush.msrb.mxu1 %v2851_v7 }
 0x1c1   :  { %1065 = vmatpush.msra.mxu2 %v2854_v9  ;;  %1085 = vmatpush.msra.mxu3 %v2857_v13 }
 0x1c2   :  { %1026 = vmatpush.msrb.mxu0 %v2860_v15  ;;  %1046 = vmatpush.msrb.mxu1 %v2863_v16  ;;  %v844_v16 = vpop.permute.xlu1 %843 }
 0x1c3   :  { %1066 = vmatpush.msra.mxu2 %v2866_v17  ;;  %1086 = vmatpush.msra.mxu3 %v2869_v18  ;;  %vm845_vm9 = vcmp.eq.s32.totalorder %v844_v16, 1  ;;  %v3583_v16 = vld [vmem:[#allocation20_spill] sm:$0xff] }
 0x1c4   :  { %1027 = vmatpush.msrb.mxu0 %v2872_v21  ;;  %1047 = vmatpush.msrb.mxu1 %v2875_v22 }
 0x1c5   :  { %1067 = vmatpush.msra.mxu2 %v2878_v24  ;;  %1087 = vmatpush.msra.mxu3 %v2881_v25 }
 0x1c6   :  { %1028 = vmatpush.msrb.mxu0 %v2884_v26  ;;  %1048 = vmatpush.msrb.mxu1 %v2887_v27 }
 0x1c7   :  { %1068 = vmatpush.msra.mxu2 %v2890_v29  ;;  %1088 = vmatpush.msra.mxu3 %v2893_v30 }
 0x1c8   :  { %1029 = vmatpush.msrb.mxu0 %v2896_v31  ;;  %1049 = vmatpush.msrb.mxu1 %v2899_v32 }
 0x1c9   :  { %1069 = vmatpush.msra.mxu2 %v2902_v34  ;;  %1089 = vmatpush.msra.mxu3 %v2905_v35 }
 0x1ca   :  { %1030 = vmatpush.msrb.mxu0 %v2908_v36  ;;  %1050 = vmatpush.msrb.mxu1 %v2911_v37  ;;  %v3577_v37 = vld [vmem:[#allocation40_spill] sm:$0xff] }
 0x1cb   :  { %1070 = vmatpush.msra.mxu2 %v2914_v39  ;;  %1090 = vmatpush.msra.mxu3 %v2917_v40  ;;  %v3576_v39 = vld [vmem:[#allocation39_spill] sm:$0xff] }
 0x1cc   :  { %1031 = vmatpush.msrb.mxu0 %v2920_v41  ;;  %1051 = vmatpush.msrb.mxu1 %v2923_v42  ;;  %v2938_v41 = vld [vmem:[#allocation4 + $0x10] sm:$0xff]  ;;  %v2941_v42 = vld [vmem:[#allocation4 + $0x18] sm:$0xff] }
 0x1cd   :  { %1071 = vmatpush.msra.mxu2 %v2926_v43  ;;  %1091 = vmatpush.msra.mxu3 %v2929_v44  ;;  %3574 = vst [vmem:[#allocation36_spill] sm:$0xff] %v2938_v41 }
 0x1ce   :  { %1032 = vmatpush.msrb.mxu0 %v2932_v60  ;;  %1052 = vmatpush.msrb.mxu1 %v2935_v12  ;;  %3575 = vst [vmem:[#allocation44_spill] sm:$0xff] %v2941_v42  ;;  %v3578_v12 = vld [vmem:[#allocation48_spill] sm:$0xff] }
 0x1cf   :  { %1072 = vmatpush.msra.mxu2 %v2938_v41  ;;  %1092 = vmatpush.msra.mxu3 %v2941_v42 }
 0x22b   :  { %v710_v43 = vpop.f32.mrf.mxu0  ;;  %v730_v40 = vpop.f32.mrf.mxu1 }
 0x22c   :  { %v773_v44 = vadd.f32 %v710_v43, %v3576_v39  ;;  %v774_v36 = vadd.f32 %v730_v40, %v3577_v37  ;;  %v3579_v37 = vld [vmem:[#allocation47_spill] sm:$0xff] }
 0x22e   :  { %v1820_v35 = vmul.f32 -1.442695, %v773_v44  ;;  %v1821_v60 = vmul.f32 -1.442695, %v774_v36 }
 0x230   :  { %1886 = vpow2.f32 %v1820_v35 }
 0x231   :  { %1888 = vpow2.f32 %v1821_v60 }
 0x232   :  { %v770_v34 = vpop.f32.mrf.mxu3  ;;  %v750_v42 = vpop.f32.mrf.mxu2 }
 0x233   :  { %v776_v32 = vadd.f32 %v770_v34, %v3578_v12  ;;  %v775_v40 = vadd.f32 %v750_v42, %v3579_v37 }
 0x235   :  { %v1822_v31 = vmul.f32 -1.442695, %v776_v32 }
 0x236   :  { %v1887_v30 = vpop.eup %1886 }
 0x237   :  { %v1889_v41 = vpop.eup %1888  ;;  %v780_v29 = vadd.f32 1.0, %v1887_v30  ;;  %1890 = vpow2.f32 %v1822_v31 }
 0x238   :  { %v799_v27 = vadd.f32 1.0, %v1889_v41 }
 0x239   :  { %1892 = vrcp.f32 %v780_v29  ;;  %v792_v32 = vand.u32 2147483648, %v780_v29  ;;  %v790_v30 = vand.u32 2147483647, %v780_v29  ;;  %vm786_vm3 = vweird.f32 %v780_v29 }
 0x23a   :  { %1894 = vrcp.f32 %v799_v27  ;;  %v811_v31 = vand.u32 2147483648, %v799_v27  ;;  %v809_v25 = vand.u32 2147483647, %v799_v27  ;;  %vm805_vm5 = vweird.f32 %v799_v27 }
 0x23b   :  { %v793_v42 = vor.u32 1.1754944e-38, %v792_v32  ;;  %vm791_vm6 = vcmp.eq.f32.partialorder %v790_v30, 8.507059e+37 }
 0x23c   :  { %vm810_vm8 = vcmp.eq.f32.partialorder %v809_v25, 8.507059e+37 }
 0x23d   :  { %v1891_v26 = vpop.eup %1890 }
 0x23e   :  { %v819_v39 = vadd.f32 1.0, %v1891_v26 }
 0x23f   :  { %v1893_v43 = vpop.eup %1892 }
 0x240   :  { %v1895_v36 = vpop.eup %1894  ;;  %v782_v35 = vmul.f32 %v1893_v43, %v780_v29  ;;  %1896 = vrcp.f32 %v819_v39  ;;  %vm787_vm1 = vweird.f32 %v1893_v43  ;;  %vm825_vm11 = vweird.f32 %v819_v39 }
 0x241   :  { %v801_v60 = vmul.f32 %v1895_v36, %v799_v27  ;;  %1898 = vtanh.f32 %v775_v40  ;;  %vm806_vm2 = vweird.f32 %v1895_v36  ;;  %vm788_vm4 = vmor %vm786_vm3, %vm787_vm1  ;;  %v831_v27 = vand.u32 2147483648, %v819_v39 }
 0x242   :  { %v783_v44 = vsub.f32 1.0, %v782_v35  ;;  %vm807_vm7 = vmor %vm805_vm5, %vm806_vm2  ;;  %v812_v35 = vor.u32 1.1754944e-38, %v811_v31  ;;  %v3586_v31 = vld [vmem:[#allocation15_spill] sm:$0xff] }
 0x243   :  { %v802_v12 = vsub.f32 1.0, %v801_v60  ;;  %v832_v25 = vor.u32 1.1754944e-38, %v831_v27  ;;  %v3599_v27 = vld [vmem:[#allocation33_spill] sm:$0xff] }
 0x244   :  { %v784_v34 = vmul.f32 %v1893_v43, %v783_v44 }
 0x245   :  { %v803_v41 = vmul.f32 %v1895_v36, %v802_v12 }
 0x246   :  { %v1897_v24 = vpop.eup %1896  ;;  %v785_v26 = vadd.f32 %v1893_v43, %v784_v34 }
 0x247   :  { %v821_v37 = vmul.f32 %v1897_v24, %v819_v39  ;;  %v804_v22 = vadd.f32 %v1895_v36, %v803_v41  ;;  %v1899_v40 = vpop.eup %1898  ;;  %vm826_vm10 = vweird.f32 %v1897_v24  ;;  %v3587_v41 = vld [vmem:[#allocation22_spill] sm:$0xff] }
 0x248   :  { %v789_v21 = vsel %vm788_vm4, %v1893_v43, %v785_v26  ;;  %vm827_vm12 = vmor %vm825_vm11, %vm826_vm10  ;;  %v3588_v26 = vld [vmem:[#allocation17_spill] sm:$0xff] }
 0x249   :  { %v794_v60 = vsel %vm791_vm6, %v793_v42, %v789_v21  ;;  %v822_v44 = vsub.f32 1.0, %v821_v37  ;;  %v808_v18 = vsel %vm807_vm7, %v1895_v36, %v804_v22  ;;  %v829_v21 = vand.u32 2147483647, %v819_v39  ;;  %v3585_v39 = vld [vmem:[#allocation13_spill] sm:$0xff]  ;;  %v3589_v42 = vld [vmem:[#allocation16_spill] sm:$0xff]  ;;  %v3590_v37 = vld [vmem:[#allocation18_spill] sm:$0xff] }
 0x24a   :  { %v836_v12 = vmul.f32 %v1899_v40, %v794_v60  ;;  %v813_v17 = vsel %vm810_vm8, %v812_v35, %v808_v18  ;;  %v3591_v35 = vld [vmem:[#allocation30_spill] sm:$0xff]  ;;  %v3592_v40 = vld [vmem:[#allocation21_spill] sm:$0xff]  ;;  %v3593_v60 = vld [vmem:[#allocation19_spill] sm:$0xff] }
 0x24b   :  { %v823_v15 = vmul.f32 %v1897_v24, %v822_v44  ;;  %v835_v29 = vmul.f32 %v813_v17, %v2743_v38  ;;  %vm830_vm13 = vcmp.eq.f32.partialorder %v829_v21, 8.507059e+37  ;;  %v3594_v44 = vld [vmem:[#allocation23_spill] sm:$0xff]  ;;  %v3600_v21 = vld [vmem:[#allocation29_spill] sm:$0xff] }
 0x24d   :  { %v837_v32 = vadd.f32 %v836_v12, %v835_v29  ;;  %v824_v34 = vadd.f32 %v1897_v24, %v823_v15  ;;  %v3582_v15 = vld [vmem:[#allocation12_spill] sm:$0xff]  ;;  %v3595_v12 = vld [vmem:[#allocation31_spill] sm:$0xff]  ;;  %v3596_v29 = vld [vmem:[#allocation25_spill] sm:$0xff] }
 0x24f   :  { %1900 = vtanh.f32 %v837_v32  ;;  %v2951_v43 = vsel %vm845_vm9, %v837_v32, %v2743_v38  ;;  %v828_v22 = vsel %vm827_vm12, %v1897_v24, %v824_v34  ;;  %v3580_v38 = vld [vmem:[#allocation11_spill] sm:$0xff]  ;;  %v3584_v24 = vld [vmem:[#allocation14_spill] sm:$0xff]  ;;  %v3597_v32 = vld [vmem:[#allocation24_spill] sm:$0xff] }
 0x250   :  { %v833_v36 = vsel %vm830_vm13, %v832_v25, %v828_v22  ;;  %v3598_v34 = vld [vmem:[#allocation26_spill] sm:$0xff]  ;;  %v3601_v22 = vld [vmem:[#allocation27_spill] sm:$0xff]  ;;  %v3602_v25 = vld [vmem:[#allocation28_spill] sm:$0xff] }
 0x255   :  { %v1901_v18 = vpop.eup %1900 }
 0x256   :  { %v839_v30 = vmul.f32 %v1901_v18, %v833_v36  ;;  %v3603_v18 = vld [vmem:[#allocation34_spill] sm:$0xff]  ;;  %v3604_v36 = vld [vmem:[#allocation32_spill] sm:$0xff] }
 0x258   :  { %v2955_v17 = vsel %vm845_vm9, %v839_v30, %v2746_v45  ;;  %v3581_v45 = vld [vmem:[#allocation10_spill] sm:$0xff]  ;;  %v3605_v30 = vld [vmem:[#allocation9_spill] sm:$0xff] }
 0x259   :  { %871 = vmatmul.f32.vlgmr.msra.gmra.mxu0 %v2955_v17  ;;  %891 = vmatmul.f32.vlgmr.msra.gmra.mxu1 %v2955_v17 }
 0x25a   :  { %911 = vmatmul.f32.vlgmr.msrb.gmra.mxu2 %v2955_v17  ;;  %931 = vmatmul.f32.vlgmr.msrb.gmra.mxu3 %v2955_v17 }
 0x25b   :  { %1179 = vmatpush.msra.mxu0 %v2752_v46  ;;  %1199 = vmatpush.msra.mxu1 %v2755_v47 }
 0x25c   :  { %1219 = vmatpush.msrb.mxu2 %v2758_v48  ;;  %1239 = vmatpush.msrb.mxu3 %v2761_v2 }
 0x25d   :  { %1180 = vmatpush.msra.mxu0 %v2764_v49  ;;  %1200 = vmatpush.msra.mxu1 %v2767_v50 }
 0x25e   :  { %1220 = vmatpush.msrb.mxu2 %v2770_v51  ;;  %1240 = vmatpush.msrb.mxu3 %v2773_v52 }
 0x25f   :  { %1181 = vmatpush.msra.mxu0 %v2776_v53  ;;  %1201 = vmatpush.msra.mxu1 %v2779_v54 }
 0x260   :  { %1221 = vmatpush.msrb.mxu2 %v2782_v58  ;;  %1241 = vmatpush.msrb.mxu3 %v2785_v11 }
 0x261   :  { %1182 = vmatpush.msra.mxu0 %v2788_v19  ;;  %1202 = vmatpush.msra.mxu1 %v2791_v62 }
 0x262   :  { %1222 = vmatpush.msrb.mxu2 %v2794_v57  ;;  %1242 = vmatpush.msrb.mxu3 %v2797_v63 }
 0x263   :  { %1183 = vmatpush.msra.mxu0 %v2800_v61  ;;  %1203 = vmatpush.msra.mxu1 %v2803_v33 }
 0x264   :  { %1223 = vmatpush.msrb.mxu2 %v2806_v1  ;;  %1243 = vmatpush.msrb.mxu3 %v2809_v3 }
 0x265   :  { %1184 = vmatpush.msra.mxu0 %v2812_v0  ;;  %1204 = vmatpush.msra.mxu1 %v2815_v8 }
 0x266   :  { %1224 = vmatpush.msrb.mxu2 %v2818_v55  ;;  %1244 = vmatpush.msrb.mxu3 %v2821_v56 }
 0x267   :  { %1185 = vmatpush.msra.mxu0 %v2824_v4  ;;  %1205 = vmatpush.msra.mxu1 %v2827_v10 }
 0x268   :  { %1225 = vmatpush.msrb.mxu2 %v2830_v6  ;;  %1245 = vmatpush.msrb.mxu3 %v2833_v23 }
 0x269   :  { %1186 = vmatpush.msra.mxu0 %v2836_v5  ;;  %1206 = vmatpush.msra.mxu1 %v2839_v20 }
 0x26a   :  { %1226 = vmatpush.msrb.mxu2 %v2842_v59  ;;  %1246 = vmatpush.msrb.mxu3 %v2845_v14 }
 0x26b   :  { %1187 = vmatpush.msra.mxu0 %v2848_v28  ;;  %1207 = vmatpush.msra.mxu1 %v2851_v7 }
 0x26c   :  { %1227 = vmatpush.msrb.mxu2 %v2854_v9  ;;  %1247 = vmatpush.msrb.mxu3 %v2857_v13 }
 0x26d   :  { %1188 = vmatpush.msra.mxu0 %v3580_v38  ;;  %1208 = vmatpush.msra.mxu1 %v3581_v45 }
 0x26e   :  { %1228 = vmatpush.msrb.mxu2 %v3582_v15  ;;  %1248 = vmatpush.msrb.mxu3 %v3583_v16 }
 0x26f   :  { %1189 = vmatpush.msra.mxu0 %v3584_v24  ;;  %1209 = vmatpush.msra.mxu1 %v3585_v39 }
 0x270   :  { %1229 = vmatpush.msrb.mxu2 %v3586_v31  ;;  %1249 = vmatpush.msrb.mxu3 %v3587_v41 }
 0x271   :  { %1190 = vmatpush.msra.mxu0 %v3588_v26  ;;  %1210 = vmatpush.msra.mxu1 %v3589_v42 }
 0x272   :  { %1230 = vmatpush.msrb.mxu2 %v3590_v37  ;;  %1250 = vmatpush.msrb.mxu3 %v3591_v35 }
 0x273   :  { %1191 = vmatpush.msra.mxu0 %v3592_v40  ;;  %1211 = vmatpush.msra.mxu1 %v3593_v60  ;;  %v3609_v60 = vld [vmem:[#allocation42_spill] sm:$0xff] }
 0x274   :  { %1231 = vmatpush.msrb.mxu2 %v3594_v44  ;;  %1251 = vmatpush.msrb.mxu3 %v3595_v12  ;;  %v3606_v12 = vld [vmem:[#allocation36_spill] sm:$0xff]  ;;  %v3608_v44 = vld [vmem:[#allocation41_spill] sm:$0xff] }
 0x275   :  { %1192 = vmatpush.msra.mxu0 %v3596_v29  ;;  %1212 = vmatpush.msra.mxu1 %v3597_v32  ;;  %v3607_v29 = vld [vmem:[#allocation44_spill] sm:$0xff] }
 0x276   :  { %1232 = vmatpush.msrb.mxu2 %v3598_v34  ;;  %1252 = vmatpush.msrb.mxu3 %v3599_v27 }
 0x277   :  { %1193 = vmatpush.msra.mxu0 %v3600_v21  ;;  %1213 = vmatpush.msra.mxu1 %v3601_v22 }
 0x278   :  { %1233 = vmatpush.msrb.mxu2 %v3602_v25  ;;  %1253 = vmatpush.msrb.mxu3 %v3603_v18  ;;  %v3610_v18 = vld [vmem:[#allocation52_spill] sm:$0xff] }
 0x279   :  { %1194 = vmatpush.msra.mxu0 %v3604_v36  ;;  %1214 = vmatpush.msra.mxu1 %v3605_v30 }
 0x27a   :  { %1234 = vmatpush.msrb.mxu2 %v3606_v12  ;;  %1254 = vmatpush.msrb.mxu3 %v3607_v29 }
 0x2d6   :  { %v872_v32 = vpop.f32.mrf.mxu0  ;;  %v892_v34 = vpop.f32.mrf.mxu1 }
 0x2d7   :  { %v935_v27 = vadd.f32 %v872_v32, %v3608_v44  ;;  %v936_v21 = vadd.f32 %v892_v34, %v3609_v60  ;;  %v2050_v44 = vld [vmem:[%s3336_s0] sm:$0xff]  ;;  %v3611_v32 = vmov 0  }
 0x2d8   :  { %vm1164_vm14 = vcmp.gt.s32.totalorder %v2050_v44, 4  ;;  %vm1326_vm15 = vcmp.gt.s32.totalorder %v2050_v44, 5  ;;  %vm1657_vm5 = vcmp.eq.s32.totalorder %v2050_v44, 8 }
 0x2d9   :  { %v1823_v40 = vmul.f32 -1.442695, %v935_v27  ;;  %v1824_v22 = vmul.f32 -1.442695, %v936_v21 }
 0x2db   :  { %1902 = vpow2.f32 %v1823_v40  ;;  %v1165_v40 = vsel %vm1164_vm14, 1, %v3611_v32 }
 0x2dc   :  { %1904 = vpow2.f32 %v1824_v22  ;;  %1167 = vperm.xlu2 %1851, %v1165_v40  }
 0x2dd   :  { %v932_v25 = vpop.f32.mrf.mxu3  ;;  %v912_v60 = vpop.f32.mrf.mxu2 }
 0x2de   :  { %v938_v35 = vadd.f32 %v932_v25, %v3610_v18 }
 0x2e0   :  { %v1825_v36 = vmul.f32 -1.442695, %v938_v35  ;;  %v3612_v35 = vld [vmem:[#allocation51_spill] sm:$0xff] }
 0x2e1   :  { %v1903_v37 = vpop.eup %1902  ;;  %v937_v22 = vadd.f32 %v912_v60, %v3612_v35 }
 0x2e2   :  { %v1905_v30 = vpop.eup %1904  ;;  %v942_v42 = vadd.f32 1.0, %v1903_v37  ;;  %1906 = vpow2.f32 %v1825_v36 }
 0x2e3   :  { %v961_v12 = vadd.f32 1.0, %v1905_v30  ;;  %v1327_v30 = vsel %vm1326_vm15, 1, %v3611_v32 }
 0x2e4   :  { %1908 = vrcp.f32 %v942_v42  ;;  %v954_v26 = vand.u32 2147483648, %v942_v42  ;;  %v952_v39 = vand.u32 2147483647, %v942_v42  ;;  %1329 = vperm.xlu2 %1851, %v1327_v30   ;;  %vm948_vm3 = vweird.f32 %v942_v42 }
 0x2e5   :  { %1910 = vrcp.f32 %v961_v12  ;;  %v973_v41 = vand.u32 2147483648, %v961_v12  ;;  %vm967_vm2 = vweird.f32 %v961_v12 }
 0x2e6   :  { %v955_v24 = vor.u32 1.1754944e-38, %v954_v26  ;;  %vm953_vm7 = vcmp.eq.f32.partialorder %v952_v39, 8.507059e+37  ;;  %v1006_v26 = vpop.permute.xlu1 %1005 }
 0x2e7   :  { %vm1007_vm9 = vcmp.eq.s32.totalorder %v1006_v26, 1  ;;  %v3629_v26 = vld [vmem:[#allocation25_spill] sm:$0xff] }
 0x2e8   :  { %v1907_v34 = vpop.eup %1906 }
 0x2e9   :  { %v981_v27 = vadd.f32 1.0, %v1907_v34  ;;  %v971_v34 = vand.u32 2147483647, %v961_v12 }
 0x2ea   :  { %v1909_v21 = vpop.eup %1908 }
 0x2eb   :  { %v1911_v37 = vpop.eup %1910  ;;  %v944_v25 = vmul.f32 %v1909_v21, %v942_v42  ;;  %1912 = vrcp.f32 %v981_v27  ;;  %vm949_vm0 = vweird.f32 %v1909_v21  ;;  %vm972_vm8 = vcmp.eq.f32.partialorder %v971_v34, 8.507059e+37  ;;  %v3617_v34 = vld [vmem:[#allocation14_spill] sm:$0xff] }
 0x2ec   :  { %v963_v18 = vmul.f32 %v1911_v37, %v961_v12  ;;  %1914 = vtanh.f32 %v937_v22  ;;  %vm968_vm1 = vweird.f32 %v1911_v37  ;;  %vm950_vm4 = vmor %vm948_vm3, %vm949_vm0  ;;  %v1658_v12 = vsel %vm1657_vm5, 1, %v3611_v32 }
 0x2ed   :  { %v945_v36 = vsub.f32 1.0, %v944_v25  ;;  %vm969_vm6 = vmor %vm967_vm2, %vm968_vm1  ;;  %1660 = vperm.xlu2 %1851, %v1658_v12   ;;  %v993_v39 = vand.u32 2147483648, %v981_v27  ;;  %vm987_vm11 = vweird.f32 %v981_v27  ;;  %v3626_v12 = vld [vmem:[#allocation19_spill] sm:$0xff] }
 0x2ee   :  { %v964_v29 = vsub.f32 1.0, %v963_v18  ;;  %v974_v18 = vor.u32 1.1754944e-38, %v973_v41 }
 0x2ef   :  { %v946_v31 = vmul.f32 %v1909_v21, %v945_v36 }
 0x2f0   :  { %v965_v40 = vmul.f32 %v1911_v37, %v964_v29 }
 0x2f1   :  { %v1913_v60 = vpop.eup %1912  ;;  %v947_v35 = vadd.f32 %v1909_v21, %v946_v31 }
 0x2f2   :  { %v966_v25 = vadd.f32 %v1911_v37, %v965_v40  ;;  %v983_v16 = vmul.f32 %v1913_v60, %v981_v27  ;;  %v1915_v36 = vpop.eup %1914  ;;  %vm988_vm10 = vweird.f32 %v1913_v60 }
 0x2f3   :  { %v951_v22 = vsel %vm950_vm4, %v1909_v21, %v947_v35  ;;  %vm989_vm12 = vmor %vm987_vm11, %vm988_vm10  ;;  %v3619_v35 = vld [vmem:[#allocation15_spill] sm:$0xff] }
 0x2f4   :  { %v956_v15 = vsel %vm953_vm7, %v955_v24, %v951_v22  ;;  %v970_v45 = vsel %vm969_vm6, %v1911_v37, %v966_v25  ;;  %v984_v29 = vsub.f32 1.0, %v983_v16  ;;  %v991_v16 = vand.u32 2147483647, %v981_v27  ;;  %v3615_v27 = vld [vmem:[#allocation12_spill] sm:$0xff]  ;;  %v3620_v25 = vld [vmem:[#allocation22_spill] sm:$0xff] }
 0x2f5   :  { %v975_v38 = vsel %vm972_vm8, %v974_v18, %v970_v45  ;;  %v998_v30 = vmul.f32 %v1915_v36, %v956_v15  ;;  %v994_v15 = vor.u32 1.1754944e-38, %v993_v39  ;;  %v3616_v37 = vld [vmem:[#allocation20_spill] sm:$0xff]  ;;  %v3621_v18 = vld [vmem:[#allocation17_spill] sm:$0xff]  ;;  %v3623_v36 = vld [vmem:[#allocation18_spill] sm:$0xff] }
 0x2f6   :  { %v997_v31 = vmul.f32 %v975_v38, %v2951_v43  ;;  %v985_v42 = vmul.f32 %v1913_v60, %v984_v29  ;;  %vm992_vm13 = vcmp.eq.f32.partialorder %v991_v16, 8.507059e+37  ;;  %v3622_v22 = vld [vmem:[#allocation16_spill] sm:$0xff]  ;;  %v3624_v29 = vld [vmem:[#allocation30_spill] sm:$0xff]  ;;  %v3632_v39 = vld [vmem:[#allocation33_spill] sm:$0xff] }
 0x2f7   :  { %v3633_v16 = vld [vmem:[#allocation29_spill] sm:$0xff] }
 0x2f8   :  { %v999_v40 = vadd.f32 %v998_v30, %v997_v31  ;;  %v986_v44 = vadd.f32 %v1913_v60, %v985_v42  ;;  %v3625_v30 = vld [vmem:[#allocation21_spill] sm:$0xff]  ;;  %v3627_v31 = vld [vmem:[#allocation23_spill] sm:$0xff] }
 0x2f9   :  { %v3628_v42 = vld [vmem:[#allocation31_spill] sm:$0xff] }
 0x2fa   :  { %1916 = vtanh.f32 %v999_v40  ;;  %v3037_v24 = vsel %vm1007_vm9, %v999_v40, %v2951_v43  ;;  %v990_v45 = vsel %vm989_vm12, %v1913_v60, %v986_v44  ;;  %v3613_v43 = vld [vmem:[#allocation11_spill] sm:$0xff]  ;;  %v3618_v60 = vld [vmem:[#allocation13_spill] sm:$0xff]  ;;  %v3630_v40 = vld [vmem:[#allocation24_spill] sm:$0xff] }
 0x2fb   :  { %v995_v38 = vsel %vm992_vm13, %v994_v15, %v990_v45  ;;  %v3631_v44 = vld [vmem:[#allocation26_spill] sm:$0xff]  ;;  %v3634_v45 = vld [vmem:[#allocation27_spill] sm:$0xff]  ;;  %v3635_v15 = vld [vmem:[#allocation28_spill] sm:$0xff] }
 0x300   :  { %v1917_v41 = vpop.eup %1916 }
 0x301   :  { %v1001_v32 = vmul.f32 %v1917_v41, %v995_v38  ;;  %v3636_v41 = vld [vmem:[#allocation34_spill] sm:$0xff]  ;;  %v3637_v38 = vld [vmem:[#allocation32_spill] sm:$0xff] }
 0x303   :  { %v3040_v21 = vsel %vm1007_vm9, %v1001_v32, %v2955_v17  ;;  %v3614_v17 = vld [vmem:[#allocation10_spill] sm:$0xff]  ;;  %v3638_v32 = vld [vmem:[#allocation9_spill] sm:$0xff] }
 0x304   :  { %1033 = vmatmul.f32.vlgmr.msrb.gmra.mxu0 %v3040_v21  ;;  %1053 = vmatmul.f32.vlgmr.msrb.gmra.mxu1 %v3040_v21 }
 0x305   :  { %1073 = vmatmul.f32.vlgmr.msra.gmra.mxu2 %v3040_v21  ;;  %1093 = vmatmul.f32.vlgmr.msra.gmra.mxu3 %v3040_v21 }
 0x306   :  { %1341 = vmatpush.msrb.mxu0 %v2752_v46  ;;  %1361 = vmatpush.msrb.mxu1 %v2755_v47 }
 0x307   :  { %1381 = vmatpush.msra.mxu2 %v2758_v48  ;;  %1401 = vmatpush.msra.mxu3 %v2761_v2 }
 0x308   :  { %1342 = vmatpush.msrb.mxu0 %v2764_v49  ;;  %1362 = vmatpush.msrb.mxu1 %v2767_v50 }
 0x309   :  { %1382 = vmatpush.msra.mxu2 %v2770_v51  ;;  %1402 = vmatpush.msra.mxu3 %v2773_v52 }
 0x30a   :  { %1343 = vmatpush.msrb.mxu0 %v2776_v53  ;;  %1363 = vmatpush.msrb.mxu1 %v2779_v54 }
 0x30b   :  { %1383 = vmatpush.msra.mxu2 %v2782_v58  ;;  %1403 = vmatpush.msra.mxu3 %v2785_v11 }
 0x30c   :  { %1344 = vmatpush.msrb.mxu0 %v2788_v19  ;;  %1364 = vmatpush.msrb.mxu1 %v2791_v62 }
 0x30d   :  { %1384 = vmatpush.msra.mxu2 %v2794_v57  ;;  %1404 = vmatpush.msra.mxu3 %v2797_v63 }
 0x30e   :  { %1345 = vmatpush.msrb.mxu0 %v2800_v61  ;;  %1365 = vmatpush.msrb.mxu1 %v2803_v33 }
 0x30f   :  { %1385 = vmatpush.msra.mxu2 %v2806_v1  ;;  %1405 = vmatpush.msra.mxu3 %v2809_v3 }
 0x310   :  { %1346 = vmatpush.msrb.mxu0 %v2812_v0  ;;  %1366 = vmatpush.msrb.mxu1 %v2815_v8 }
 0x311   :  { %1386 = vmatpush.msra.mxu2 %v2818_v55  ;;  %1406 = vmatpush.msra.mxu3 %v2821_v56 }
 0x312   :  { %1347 = vmatpush.msrb.mxu0 %v2824_v4  ;;  %1367 = vmatpush.msrb.mxu1 %v2827_v10 }
 0x313   :  { %1387 = vmatpush.msra.mxu2 %v2830_v6  ;;  %1407 = vmatpush.msra.mxu3 %v2833_v23 }
 0x314   :  { %1348 = vmatpush.msrb.mxu0 %v2836_v5  ;;  %1368 = vmatpush.msrb.mxu1 %v2839_v20 }
 0x315   :  { %1388 = vmatpush.msra.mxu2 %v2842_v59  ;;  %1408 = vmatpush.msra.mxu3 %v2845_v14 }
 0x316   :  { %1349 = vmatpush.msrb.mxu0 %v2848_v28  ;;  %1369 = vmatpush.msrb.mxu1 %v2851_v7 }
 0x317   :  { %1389 = vmatpush.msra.mxu2 %v2854_v9  ;;  %1409 = vmatpush.msra.mxu3 %v2857_v13 }
 0x318   :  { %1350 = vmatpush.msrb.mxu0 %v3613_v43  ;;  %1370 = vmatpush.msrb.mxu1 %v3614_v17 }
 0x319   :  { %1390 = vmatpush.msra.mxu2 %v3615_v27  ;;  %1410 = vmatpush.msra.mxu3 %v3616_v37 }
 0x31a   :  { %1351 = vmatpush.msrb.mxu0 %v3617_v34  ;;  %1371 = vmatpush.msrb.mxu1 %v3618_v60 }
 0x31b   :  { %1391 = vmatpush.msra.mxu2 %v3619_v35  ;;  %1411 = vmatpush.msra.mxu3 %v3620_v25 }
 0x31c   :  { %1352 = vmatpush.msrb.mxu0 %v3621_v18  ;;  %1372 = vmatpush.msrb.mxu1 %v3622_v22 }
 0x31d   :  { %1392 = vmatpush.msra.mxu2 %v3623_v36  ;;  %1412 = vmatpush.msra.mxu3 %v3624_v29 }
 0x31e   :  { %1353 = vmatpush.msrb.mxu0 %v3625_v30  ;;  %1373 = vmatpush.msrb.mxu1 %v3626_v12  ;;  %v3642_v12 = vld [vmem:[#allocation46_spill] sm:$0xff] }
 0x31f   :  { %1393 = vmatpush.msra.mxu2 %v3627_v31  ;;  %1413 = vmatpush.msra.mxu3 %v3628_v42  ;;  %v3639_v42 = vld [vmem:[#allocation36_spill] sm:$0xff]  ;;  %v3641_v31 = vld [vmem:[#allocation45_spill] sm:$0xff] }
 0x320   :  { %1354 = vmatpush.msrb.mxu0 %v3629_v26  ;;  %1374 = vmatpush.msrb.mxu1 %v3630_v40  ;;  %v3640_v26 = vld [vmem:[#allocation44_spill] sm:$0xff] }
 0x321   :  { %1394 = vmatpush.msra.mxu2 %v3631_v44  ;;  %1414 = vmatpush.msra.mxu3 %v3632_v39 }
 0x322   :  { %1355 = vmatpush.msrb.mxu0 %v3633_v16  ;;  %1375 = vmatpush.msrb.mxu1 %v3634_v45 }
 0x323   :  { %1395 = vmatpush.msra.mxu2 %v3635_v15  ;;  %1415 = vmatpush.msra.mxu3 %v3636_v41  ;;  %v3643_v41 = vld [vmem:[#allocation54_spill] sm:$0xff] }
 0x324   :  { %1356 = vmatpush.msrb.mxu0 %v3637_v38  ;;  %1376 = vmatpush.msrb.mxu1 %v3638_v32 }
 0x325   :  { %1396 = vmatpush.msra.mxu2 %v3639_v42  ;;  %1416 = vmatpush.msra.mxu3 %v3640_v26 }
 0x336   :  { %v1168_v17 = vpop.permute.xlu2 %1167 }
 0x337   :  { %vm1169_vm6 = vcmp.eq.s32.totalorder %v1168_v17, 1 }
 0x381   :  { %v1034_v40 = vpop.f32.mrf.mxu0  ;;  %v1054_v44 = vpop.f32.mrf.mxu1 }
 0x382   :  { %v1097_v39 = vadd.f32 %v1034_v40, %v3641_v31  ;;  %v1098_v16 = vadd.f32 %v1054_v44, %v3642_v12  ;;  %v3644_v12 = vld [vmem:[#allocation53_spill] sm:$0xff] }
 0x384   :  { %v1826_v30 = vmul.f32 -1.442695, %v1097_v39  ;;  %v1827_v45 = vmul.f32 -1.442695, %v1098_v16 }
 0x386   :  { %1918 = vpow2.f32 %v1826_v30 }
 0x387   :  { %1920 = vpow2.f32 %v1827_v45 }
 0x388   :  { %v1094_v15 = vpop.f32.mrf.mxu3  ;;  %v1074_v26 = vpop.f32.mrf.mxu2 }
 0x389   :  { %v1100_v29 = vadd.f32 %v1094_v15, %v3643_v41  ;;  %v1099_v44 = vadd.f32 %v1074_v26, %v3644_v12 }
 0x38b   :  { %v1828_v38 = vmul.f32 -1.442695, %v1100_v29 }
 0x38c   :  { %v1919_v36 = vpop.eup %1918 }
 0x38d   :  { %v1921_v32 = vpop.eup %1920  ;;  %v1104_v22 = vadd.f32 1.0, %v1919_v36  ;;  %1922 = vpow2.f32 %v1828_v38 }
 0x38e   :  { %v1123_v42 = vadd.f32 1.0, %v1921_v32 }
 0x38f   :  { %1924 = vrcp.f32 %v1104_v22  ;;  %v1116_v29 = vand.u32 2147483648, %v1104_v22  ;;  %v1114_v36 = vand.u32 2147483647, %v1104_v22  ;;  %vm1110_vm0 = vweird.f32 %v1104_v22 }
 0x390   :  { %1926 = vrcp.f32 %v1123_v42  ;;  %v1135_v38 = vand.u32 2147483648, %v1123_v42  ;;  %v1133_v25 = vand.u32 2147483647, %v1123_v42  ;;  %vm1129_vm2 = vweird.f32 %v1123_v42 }
 0x391   :  { %v1117_v26 = vor.u32 1.1754944e-38, %v1116_v29  ;;  %vm1115_vm3 = vcmp.eq.f32.partialorder %v1114_v36, 8.507059e+37 }
 0x392   :  { %vm1134_vm5 = vcmp.eq.f32.partialorder %v1133_v25, 8.507059e+37 }
 0x393   :  { %v1923_v18 = vpop.eup %1922 }
 0x394   :  { %v1143_v31 = vadd.f32 1.0, %v1923_v18 }
 0x395   :  { %v1925_v40 = vpop.eup %1924 }
 0x396   :  { %v1927_v39 = vpop.eup %1926  ;;  %v1106_v30 = vmul.f32 %v1925_v40, %v1104_v22  ;;  %1928 = vrcp.f32 %v1143_v31  ;;  %vm1111_vm14 = vweird.f32 %v1925_v40  ;;  %vm1149_vm8 = vweird.f32 %v1143_v31 }
 0x397   :  { %v1125_v16 = vmul.f32 %v1927_v39, %v1123_v42  ;;  %1930 = vtanh.f32 %v1099_v44  ;;  %vm1130_vm15 = vweird.f32 %v1927_v39  ;;  %vm1112_vm1 = vmor %vm1110_vm0, %vm1111_vm14  ;;  %v1155_v42 = vand.u32 2147483648, %v1143_v31 }
 0x398   :  { %v1107_v45 = vsub.f32 1.0, %v1106_v30  ;;  %vm1131_vm4 = vmor %vm1129_vm2, %vm1130_vm15  ;;  %v1136_v30 = vor.u32 1.1754944e-38, %v1135_v38 }
 0x399   :  { %v1126_v15 = vsub.f32 1.0, %v1125_v16  ;;  %v1156_v25 = vor.u32 1.1754944e-38, %v1155_v42 }
 0x39a   :  { %v1108_v41 = vmul.f32 %v1925_v40, %v1107_v45 }
 0x39b   :  { %v1127_v32 = vmul.f32 %v1927_v39, %v1126_v15 }
 0x39c   :  { %v1929_v35 = vpop.eup %1928  ;;  %v1109_v18 = vadd.f32 %v1925_v40, %v1108_v41 }
 0x39d   :  { %v1145_v12 = vmul.f32 %v1929_v35, %v1143_v31  ;;  %v1128_v60 = vadd.f32 %v1927_v39, %v1127_v32  ;;  %v1931_v44 = vpop.eup %1930  ;;  %vm1150_vm7 = vweird.f32 %v1929_v35 }
 0x39e   :  { %v1113_v34 = vsel %vm1112_vm1, %v1925_v40, %v1109_v18  ;;  %vm1151_vm9 = vmor %vm1149_vm8, %vm1150_vm7 }
 0x39f   :  { %v1118_v16 = vsel %vm1115_vm3, %v1117_v26, %v1113_v34  ;;  %v1146_v45 = vsub.f32 1.0, %v1145_v12  ;;  %v1132_v37 = vsel %vm1131_vm4, %v1927_v39, %v1128_v60  ;;  %v1153_v34 = vand.u32 2147483647, %v1143_v31 }
 0x3a0   :  { %v1160_v15 = vmul.f32 %v1931_v44, %v1118_v16  ;;  %v1137_v27 = vsel %vm1134_vm5, %v1136_v30, %v1132_v37  ;;  %v3676_v44 = vld [vmem:[#allocation55_spill] sm:$0xff] }
 0x3a1   :  { %v1147_v43 = vmul.f32 %v1929_v35, %v1146_v45  ;;  %v1159_v22 = vmul.f32 %v1137_v27, %v3037_v24  ;;  %vm1154_vm10 = vcmp.eq.f32.partialorder %v1153_v34, 8.507059e+37 }
 0x3a3   :  { %v1161_v29 = vadd.f32 %v1160_v15, %v1159_v22  ;;  %v1148_v41 = vadd.f32 %v1929_v35, %v1147_v43 }
 0x3a5   :  { %1932 = vtanh.f32 %v1161_v29  ;;  %v3117_v40 = vsel %vm1169_vm6, %v1161_v29, %v3037_v24  ;;  %v1152_v60 = vsel %vm1151_vm9, %v1929_v35, %v1148_v41 }
 0x3a6   :  { %v1157_v39 = vsel %vm1154_vm10, %v1156_v25, %v1152_v60 }
 0x3ab   :  { %v1933_v37 = vpop.eup %1932 }
 0x3ac   :  { %v1163_v36 = vmul.f32 %v1933_v37, %v1157_v39 }
 0x3ae   :  { %v3121_v27 = vsel %vm1169_vm6, %v1163_v36, %v3040_v21  ;;  %v3675_v21 = vld [vmem:[#allocation56_spill] sm:$0xff] }
 0x3af   :  { %1195 = vmatmul.f32.vlgmr.msra.gmra.mxu0 %v3121_v27  ;;  %1215 = vmatmul.f32.vlgmr.msra.gmra.mxu1 %v3121_v27 }
 0x3b0   :  { %1235 = vmatmul.f32.vlgmr.msrb.gmra.mxu2 %v3121_v27  ;;  %1255 = vmatmul.f32.vlgmr.msrb.gmra.mxu3 %v3121_v27 }
 0x3b1   :  { %1503 = vmatpush.msra.mxu0 %v2752_v46  ;;  %1523 = vmatpush.msra.mxu1 %v2755_v47  ;;  %v3645_v46 = vld [vmem:[#allocation11_spill] sm:$0xff]  ;;  %v3646_v47 = vld [vmem:[#allocation10_spill] sm:$0xff] }
 0x3b2   :  { %1543 = vmatpush.msrb.mxu2 %v2758_v48  ;;  %1563 = vmatpush.msrb.mxu3 %v2761_v2  ;;  %v3647_v48 = vld [vmem:[#allocation12_spill] sm:$0xff] }
 0x3b3   :  { %1504 = vmatpush.msra.mxu0 %v2764_v49  ;;  %1524 = vmatpush.msra.mxu1 %v2767_v50  ;;  %v3648_v2 = vld [vmem:[#allocation20_spill] sm:$0xff]  ;;  %v3649_v49 = vld [vmem:[#allocation14_spill] sm:$0xff]  ;;  %v3650_v50 = vld [vmem:[#allocation13_spill] sm:$0xff] }
 0x3b4   :  { %1544 = vmatpush.msrb.mxu2 %v2770_v51  ;;  %1564 = vmatpush.msrb.mxu3 %v2773_v52  ;;  %v3651_v51 = vld [vmem:[#allocation15_spill] sm:$0xff]  ;;  %v3652_v52 = vld [vmem:[#allocation22_spill] sm:$0xff] }
 0x3b5   :  { %1505 = vmatpush.msra.mxu0 %v2776_v53  ;;  %1525 = vmatpush.msra.mxu1 %v2779_v54  ;;  %v3653_v53 = vld [vmem:[#allocation17_spill] sm:$0xff]  ;;  %v3654_v54 = vld [vmem:[#allocation16_spill] sm:$0xff] }
 0x3b6   :  { %1545 = vmatpush.msrb.mxu2 %v2782_v58  ;;  %1565 = vmatpush.msrb.mxu3 %v2785_v11  ;;  %v3655_v58 = vld [vmem:[#allocation18_spill] sm:$0xff] }
 0x3b7   :  { %1506 = vmatpush.msra.mxu0 %v2788_v19  ;;  %1526 = vmatpush.msra.mxu1 %v2791_v62  ;;  %v3656_v11 = vld [vmem:[#allocation30_spill] sm:$0xff]  ;;  %v3657_v19 = vld [vmem:[#allocation21_spill] sm:$0xff]  ;;  %v3658_v62 = vld [vmem:[#allocation19_spill] sm:$0xff] }
 0x3b8   :  { %1546 = vmatpush.msrb.mxu2 %v2794_v57  ;;  %1566 = vmatpush.msrb.mxu3 %v2797_v63  ;;  %v3659_v57 = vld [vmem:[#allocation23_spill] sm:$0xff] }
 0x3b9   :  { %1507 = vmatpush.msra.mxu0 %v2800_v61  ;;  %1527 = vmatpush.msra.mxu1 %v2803_v33  ;;  %v3660_v63 = vld [vmem:[#allocation31_spill] sm:$0xff]  ;;  %v3661_v61 = vld [vmem:[#allocation25_spill] sm:$0xff]  ;;  %v3662_v33 = vld [vmem:[#allocation24_spill] sm:$0xff] }
 0x3ba   :  { %1547 = vmatpush.msrb.mxu2 %v2806_v1  ;;  %1567 = vmatpush.msrb.mxu3 %v2809_v3  ;;  %v3663_v1 = vld [vmem:[#allocation26_spill] sm:$0xff]  ;;  %v3664_v3 = vld [vmem:[#allocation33_spill] sm:$0xff] }
 0x3bb   :  { %1508 = vmatpush.msra.mxu0 %v2812_v0  ;;  %1528 = vmatpush.msra.mxu1 %v2815_v8  ;;  %v3665_v0 = vld [vmem:[#allocation29_spill] sm:$0xff]  ;;  %v3666_v8 = vld [vmem:[#allocation27_spill] sm:$0xff] }
 0x3bc   :  { %1548 = vmatpush.msrb.mxu2 %v2818_v55  ;;  %1568 = vmatpush.msrb.mxu3 %v2821_v56  ;;  %v3667_v55 = vld [vmem:[#allocation28_spill] sm:$0xff]  ;;  %v3668_v56 = vld [vmem:[#allocation34_spill] sm:$0xff] }
 0x3bd   :  { %1509 = vmatpush.msra.mxu0 %v2824_v4  ;;  %1529 = vmatpush.msra.mxu1 %v2827_v10  ;;  %v3669_v4 = vld [vmem:[#allocation32_spill] sm:$0xff]  ;;  %v3670_v10 = vld [vmem:[#allocation9_spill] sm:$0xff] }
 0x3be   :  { %1549 = vmatpush.msrb.mxu2 %v2830_v6  ;;  %1569 = vmatpush.msrb.mxu3 %v2833_v23  ;;  %v3671_v6 = vld [vmem:[#allocation36_spill] sm:$0xff] }
 0x3bf   :  { %1510 = vmatpush.msra.mxu0 %v2836_v5  ;;  %1530 = vmatpush.msra.mxu1 %v2839_v20  ;;  %v3672_v23 = vld [vmem:[#allocation44_spill] sm:$0xff] }
 0x3c0   :  { %1550 = vmatpush.msrb.mxu2 %v2842_v59  ;;  %1570 = vmatpush.msrb.mxu3 %v2845_v14  ;;  %v3673_v59 = vld [vmem:[#allocation49_spill] sm:$0xff] }
 0x3c1   :  { %1511 = vmatpush.msra.mxu0 %v2848_v28  ;;  %1531 = vmatpush.msra.mxu1 %v2851_v7  ;;  %v3674_v28 = vld [vmem:[#allocation50_spill] sm:$0xff] }
 0x3c2   :  { %1551 = vmatpush.msrb.mxu2 %v2854_v9  ;;  %1571 = vmatpush.msrb.mxu3 %v2857_v13 }
 0x3c3   :  { %1512 = vmatpush.msra.mxu0 %v3645_v46  ;;  %1532 = vmatpush.msra.mxu1 %v3646_v47 }
 0x3c4   :  { %1552 = vmatpush.msrb.mxu2 %v3647_v48  ;;  %1572 = vmatpush.msrb.mxu3 %v3648_v2 }
 0x3c5   :  { %1513 = vmatpush.msra.mxu0 %v3649_v49  ;;  %1533 = vmatpush.msra.mxu1 %v3650_v50 }
 0x3c6   :  { %1553 = vmatpush.msrb.mxu2 %v3651_v51  ;;  %1573 = vmatpush.msrb.mxu3 %v3652_v52 }
 0x3c7   :  { %1514 = vmatpush.msra.mxu0 %v3653_v53  ;;  %1534 = vmatpush.msra.mxu1 %v3654_v54 }
 0x3c8   :  { %1554 = vmatpush.msrb.mxu2 %v3655_v58  ;;  %1574 = vmatpush.msrb.mxu3 %v3656_v11 }
 0x3c9   :  { %1515 = vmatpush.msra.mxu0 %v3657_v19  ;;  %1535 = vmatpush.msra.mxu1 %v3658_v62 }
 0x3ca   :  { %1555 = vmatpush.msrb.mxu2 %v3659_v57  ;;  %1575 = vmatpush.msrb.mxu3 %v3660_v63  ;;  %v1330_v57 = vpop.permute.xlu2 %1329 }
 0x3cb   :  { %1516 = vmatpush.msra.mxu0 %v3661_v61  ;;  %1536 = vmatpush.msra.mxu1 %v3662_v33  ;;  %vm1331_vm3 = vcmp.eq.s32.totalorder %v1330_v57, 1 }
 0x3cc   :  { %1556 = vmatpush.msrb.mxu2 %v3663_v1  ;;  %1576 = vmatpush.msrb.mxu3 %v3664_v3 }
 0x3cd   :  { %1517 = vmatpush.msra.mxu0 %v3665_v0  ;;  %1537 = vmatpush.msra.mxu1 %v3666_v8 }
 0x3ce   :  { %1557 = vmatpush.msrb.mxu2 %v3667_v55  ;;  %1577 = vmatpush.msrb.mxu3 %v3668_v56 }
 0x3cf   :  { %1518 = vmatpush.msra.mxu0 %v3669_v4  ;;  %1538 = vmatpush.msra.mxu1 %v3670_v10 }
 0x3d0   :  { %1558 = vmatpush.msrb.mxu2 %v3671_v6  ;;  %1578 = vmatpush.msrb.mxu3 %v3672_v23  ;;  %v3677_v23 = vld [vmem:[#allocation7_spill] sm:$0xff] }
 0x42c   :  { %v1196_v5 = vpop.f32.mrf.mxu0  ;;  %v1216_v20 = vpop.f32.mrf.mxu1 }
 0x42d   :  { %v1259_v14 = vadd.f32 %v1196_v5, %v3673_v59  ;;  %v1260_v7 = vadd.f32 %v1216_v20, %v3674_v28  ;;  %v3678_v20 = vld [vmem:[#allocation8_spill] sm:$0xff] }
 0x42f   :  { %v1829_v9 = vmul.f32 -1.442695, %v1259_v14  ;;  %v1830_v13 = vmul.f32 -1.442695, %v1260_v7  ;;  %v3679_v7 = vld [vmem:[#allocation58_spill] sm:$0xff] }
 0x431   :  { %1934 = vpow2.f32 %v1829_v9 }
 0x432   :  { %1936 = vpow2.f32 %v1830_v13 }
 0x433   :  { %v1256_v24 = vpop.f32.mrf.mxu3  ;;  %v1236_v18 = vpop.f32.mrf.mxu2 }
 0x434   :  { %v1262_v43 = vadd.f32 %v1256_v24, %v3675_v21  ;;  %v1261_v16 = vadd.f32 %v1236_v18, %v3676_v44  ;;  %v3680_v18 = vld [vmem:[#allocation57_spill] sm:$0xff] }
 0x436   :  { %v1831_v17 = vmul.f32 -1.442695, %v1262_v43 }
 0x437   :  { %v1935_v35 = vpop.eup %1934 }
 0x438   :  { %v1937_v31 = vpop.eup %1936  ;;  %v1266_v38 = vadd.f32 1.0, %v1935_v35  ;;  %1938 = vpow2.f32 %v1831_v17 }
 0x439   :  { %v1285_v32 = vadd.f32 1.0, %v1937_v31 }
 0x43a   :  { %1940 = vrcp.f32 %v1266_v38  ;;  %v1278_v42 = vand.u32 2147483648, %v1266_v38  ;;  %v1276_v25 = vand.u32 2147483647, %v1266_v38  ;;  %vm1272_vm13 = vweird.f32 %v1266_v38 }
 0x43b   :  { %1942 = vrcp.f32 %v1285_v32  ;;  %v1297_v34 = vand.u32 2147483648, %v1285_v32  ;;  %v1295_v39 = vand.u32 2147483647, %v1285_v32  ;;  %vm1291_vm14 = vweird.f32 %v1285_v32 }
 0x43c   :  { %v1279_v47 = vor.u32 1.1754944e-38, %v1278_v42  ;;  %vm1277_vm1 = vcmp.eq.f32.partialorder %v1276_v25, 8.507059e+37 }
 0x43d   :  { %v1298_v49 = vor.u32 1.1754944e-38, %v1297_v34  ;;  %vm1296_vm2 = vcmp.eq.f32.partialorder %v1295_v39, 8.507059e+37 }
 0x43e   :  { %v1939_v26 = vpop.eup %1938 }
 0x43f   :  { %v1305_v12 = vadd.f32 1.0, %v1939_v26 }
 0x440   :  { %v1941_v30 = vpop.eup %1940 }
 0x441   :  { %v1943_v45 = vpop.eup %1942  ;;  %v1268_v15 = vmul.f32 %v1941_v30, %v1266_v38  ;;  %1944 = vrcp.f32 %v1305_v12  ;;  %vm1273_vm11 = vweird.f32 %v1941_v30  ;;  %v1317_v33 = vand.u32 2147483648, %v1305_v12 }
 0x442   :  { %v1287_v22 = vmul.f32 %v1943_v45, %v1285_v32  ;;  %1946 = vtanh.f32 %v1261_v16  ;;  %vm1292_vm12 = vweird.f32 %v1943_v45  ;;  %vm1274_vm15 = vmor %vm1272_vm13, %vm1273_vm11  ;;  %vm1311_vm5 = vweird.f32 %v1305_v12 }
 0x443   :  { %v1269_v29 = vsub.f32 1.0, %v1268_v15  ;;  %vm1293_vm0 = vmor %vm1291_vm14, %vm1292_vm12  ;;  %v1315_v3 = vand.u32 2147483647, %v1305_v12  ;;  %v1318_v8 = vor.u32 1.1754944e-38, %v1317_v33 }
 0x444   :  { %v1288_v41 = vsub.f32 1.0, %v1287_v22 }
 0x445   :  { %v1270_v60 = vmul.f32 %v1941_v30, %v1269_v29  ;;  %vm1316_vm7 = vcmp.eq.f32.partialorder %v1315_v3, 8.507059e+37 }
 0x446   :  { %v1289_v37 = vmul.f32 %v1943_v45, %v1288_v41 }
 0x447   :  { %v1945_v36 = vpop.eup %1944  ;;  %v1271_v46 = vadd.f32 %v1941_v30, %v1270_v60 }
 0x448   :  { %v1290_v48 = vadd.f32 %v1943_v45, %v1289_v37  ;;  %v1307_v2 = vmul.f32 %v1945_v36, %v1305_v12  ;;  %v1947_v51 = vpop.eup %1946  ;;  %vm1312_vm4 = vweird.f32 %v1945_v36 }
 0x449   :  { %v1275_v50 = vsel %vm1274_vm15, %v1941_v30, %v1271_v46  ;;  %vm1313_vm6 = vmor %vm1311_vm5, %vm1312_vm4 }
 0x44a   :  { %v1280_v52 = vsel %vm1277_vm1, %v1279_v47, %v1275_v50  ;;  %v1294_v53 = vsel %vm1293_vm0, %v1943_v45, %v1290_v48  ;;  %v1308_v54 = vsub.f32 1.0, %v1307_v2 }
 0x44b   :  { %v1299_v58 = vsel %vm1296_vm2, %v1298_v49, %v1294_v53  ;;  %v1322_v11 = vmul.f32 %v1947_v51, %v1280_v52  ;;  %v1492_v53 = vpop.permute.xlu0 %1491 }
 0x44c   :  { %v1321_v19 = vmul.f32 %v1299_v58, %v3117_v40  ;;  %v1309_v62 = vmul.f32 %v1945_v36, %v1308_v54  ;;  %vm1493_vm0 = vcmp.eq.s32.totalorder %v1492_v53, 1  ;;  %v1714_v53 = vld [vmem:[%s3343_s7 + $0x48] sm:$0xff] }
 0x44e   :  { %v1323_v63 = vadd.f32 %v1322_v11, %v1321_v19  ;;  %v1310_v61 = vadd.f32 %v1945_v36, %v1309_v62 }
 0x450   :  { %1948 = vtanh.f32 %v1323_v63  ;;  %v3197_v1 = vsel %vm1331_vm3, %v1323_v63, %v3117_v40  ;;  %v1314_v0 = vsel %vm1313_vm6, %v1945_v36, %v1310_v61 }
 0x451   :  { %v1319_v56 = vsel %vm1316_vm7, %v1318_v8, %v1314_v0 }
 0x456   :  { %v1949_v55 = vpop.eup %1948 }
 0x457   :  { %v1325_v4 = vmul.f32 %v1949_v55, %v1319_v56  ;;  %v1678_v56 = vld [vmem:[%s3341_s5 + $0x70] sm:$0xff] }
 0x459   :  { %v3200_v10 = vsel %vm1331_vm3, %v1325_v4, %v3121_v27  ;;  %v1677_v4 = vld [vmem:[%s3341_s5 + $0x68] sm:$0xff] }
 0x45a   :  { %1357 = vmatmul.f32.vlgmr.msrb.gmra.mxu0 %v3200_v10  ;;  %1377 = vmatmul.f32.vlgmr.msrb.gmra.mxu1 %v3200_v10 }
 0x45b   :  { %1397 = vmatmul.f32.vlgmr.msra.gmra.mxu2 %v3200_v10  ;;  %1417 = vmatmul.f32.vlgmr.msra.gmra.mxu3 %v3200_v10 }
 0x4d7   :  { %v1358_v40 = vpop.f32.mrf.mxu0  ;;  %v1378_v6 = vpop.f32.mrf.mxu1 }
 0x4d8   :  { %v1421_v5 = vadd.f32 %v1358_v40, %v3677_v23  ;;  %v1422_v59 = vadd.f32 %v1378_v6, %v3678_v20  ;;  %v1675_v40 = vld [vmem:[%s3341_s5 + $0x58] sm:$0xff]  ;;  %v1674_v6 = vld [vmem:[%s3341_s5 + $0x50] sm:$0xff]  ;;  %v1673_v23 = vld [vmem:[%s3341_s5 + $0x48] sm:$0xff] }
 0x4d9   :  { %v1671_v20 = vld [vmem:[%s3341_s5 + $0x38] sm:$0xff] }
 0x4da   :  { %v1832_v14 = vmul.f32 -1.442695, %v1421_v5  ;;  %v1833_v28 = vmul.f32 -1.442695, %v1422_v59  ;;  %v1672_v5 = vld [vmem:[%s3341_s5 + $0x40] sm:$0xff] }
 0x4dc   :  { %1950 = vpow2.f32 %v1832_v14 }
 0x4dd   :  { %1952 = vpow2.f32 %v1833_v28  ;;  %v3681_v28 = vld [vmem:[#allocation37_spill] sm:$0xff] }
 0x4de   :  { %v1418_v27 = vpop.f32.mrf.mxu3  ;;  %v1398_v35 = vpop.f32.mrf.mxu2 }
 0x4df   :  { %v1424_v9 = vadd.f32 %v1418_v27, %v3679_v7  ;;  %v1423_v26 = vadd.f32 %v1398_v35, %v3680_v18  ;;  %v3682_v7 = vld [vmem:[#allocation38_spill] sm:$0xff] }
 0x4e0   :  { %v1667_v35 = vld [vmem:[%s3341_s5 + $0x18] sm:$0xff] }
 0x4e1   :  { %v1834_v13 = vmul.f32 -1.442695, %v1424_v9 }
 0x4e2   :  { %v1951_v24 = vpop.eup %1950 }
 0x4e3   :  { %v1953_v21 = vpop.eup %1952  ;;  %v1428_v43 = vadd.f32 1.0, %v1951_v24  ;;  %1954 = vpow2.f32 %v1834_v13  ;;  %v1670_v13 = vld [vmem:[%s3341_s5 + $0x30] sm:$0xff] }
 0x4e4   :  { %v1447_v17 = vadd.f32 1.0, %v1953_v21 }
 0x4e5   :  { %1956 = vrcp.f32 %v1428_v43  ;;  %v1440_v15 = vand.u32 2147483648, %v1428_v43  ;;  %v1438_v41 = vand.u32 2147483647, %v1428_v43  ;;  %vm1434_vm10 = vweird.f32 %v1428_v43 }
 0x4e6   :  { %1958 = vrcp.f32 %v1447_v17  ;;  %v1459_v22 = vand.u32 2147483648, %v1447_v17  ;;  %v1457_v34 = vand.u32 2147483647, %v1447_v17  ;;  %vm1453_vm11 = vweird.f32 %v1447_v17 }
 0x4e7   :  { %v1441_v37 = vor.u32 1.1754944e-38, %v1440_v15  ;;  %vm1439_vm14 = vcmp.eq.f32.partialorder %v1438_v41, 8.507059e+37  ;;  %v1718_v41 = vld [vmem:[%s3343_s7 + $0x68] sm:$0xff] }
 0x4e8   :  { %v1460_v46 = vor.u32 1.1754944e-38, %v1459_v22  ;;  %vm1458_vm15 = vcmp.eq.f32.partialorder %v1457_v34, 8.507059e+37  ;;  %v1720_v22 = vld [vmem:[%s3343_s7 + $0x78] sm:$0xff] }
 0x4e9   :  { %v1955_v31 = vpop.eup %1954  ;;  %1725 = vmatpush.msrb.mxu1 %v1720_v22  ;;  %v1853_v22 = vld [vmem:[#allocation3] ss:$0 sm:$0xff] }
 0x4ea   :  { %v1467_v38 = vadd.f32 1.0, %v1955_v31 }
 0x4eb   :  { %v1957_v32 = vpop.eup %1956 }
 0x4ec   :  { %v1959_v12 = vpop.eup %1958  ;;  %v1430_v30 = vmul.f32 %v1957_v32, %v1428_v43  ;;  %1960 = vrcp.f32 %v1467_v38  ;;  %vm1435_vm8 = vweird.f32 %v1957_v32  ;;  %v1479_v62 = vand.u32 2147483648, %v1467_v38  ;;  %v1669_v43 = vld [vmem:[%s3341_s5 + $0x28] sm:$0xff] }
 0x4ed   :  { %v1449_v44 = vmul.f32 %v1959_v12, %v1447_v17  ;;  %1962 = vtanh.f32 %v1423_v26  ;;  %vm1454_vm9 = vweird.f32 %v1959_v12  ;;  %vm1436_vm12 = vmor %vm1434_vm10, %vm1435_vm8  ;;  %vm1473_vm2 = vweird.f32 %v1467_v38  ;;  %v1668_v17 = vld [vmem:[%s3341_s5 + $0x20] sm:$0xff]  ;;  %v1665_v26 = vld [vmem:[%s3341_s5 + $0x8] sm:$0xff] }
 0x4ee   :  { %v1431_v16 = vsub.f32 1.0, %v1430_v30  ;;  %vm1455_vm13 = vmor %vm1453_vm11, %vm1454_vm9  ;;  %v1477_v63 = vand.u32 2147483647, %v1467_v38  ;;  %v1480_v33 = vor.u32 1.1754944e-38, %v1479_v62 }
 0x4ef   :  { %v1450_v45 = vsub.f32 1.0, %v1449_v44  ;;  %v1664_v44 = vld [vmem:[%s3341_s5] sm:$0xff] }
 0x4f0   :  { %v1432_v29 = vmul.f32 %v1957_v32, %v1431_v16  ;;  %vm1478_vm4 = vcmp.eq.f32.partialorder %v1477_v63, 8.507059e+37  ;;  %v1713_v63 = vld [vmem:[%s3343_s7 + $0x40] sm:$0xff] }
 0x4f1   :  { %v1451_v42 = vmul.f32 %v1959_v12, %v1450_v45 }
 0x4f2   :  { %v1961_v60 = vpop.eup %1960  ;;  %v1433_v25 = vadd.f32 %v1957_v32, %v1432_v29  ;;  %v1719_v29 = vld [vmem:[%s3343_s7 + $0x70] sm:$0xff] }
 0x4f3   :  { %v1452_v39 = vadd.f32 %v1959_v12, %v1451_v42  ;;  %v1469_v36 = vmul.f32 %v1961_v60, %v1467_v38  ;;  %v1963_v48 = vpop.eup %1962  ;;  %vm1474_vm1 = vweird.f32 %v1961_v60  ;;  %v1666_v38 = vld [vmem:[%s3341_s5 + $0x10] sm:$0xff]  ;;  %1726 = vmatpush.msrb.mxu1 %v1719_v29 }
 0x4f4   :  { %v1437_v47 = vsel %vm1436_vm12, %v1957_v32, %v1433_v25  ;;  %vm1475_vm3 = vmor %vm1473_vm2, %vm1474_vm1  ;;  %v3683_v32 = vld [vmem:[#allocation60_spill] sm:$0xff] }
 0x4f5   :  { %v1442_v2 = vsel %vm1439_vm14, %v1441_v37, %v1437_v47  ;;  %v1456_v49 = vsel %vm1455_vm13, %v1959_v12, %v1452_v39  ;;  %v1470_v50 = vsub.f32 1.0, %v1469_v36  ;;  %1727 = vmatpush.msrb.mxu1 %v1718_v41  ;;  %v3684_v39 = vld [vmem:[#allocation59_spill] sm:$0xff] }
 0x4f6   :  { %v1461_v51 = vsel %vm1458_vm15, %v1460_v46, %v1456_v49  ;;  %v1484_v52 = vmul.f32 %v1963_v48, %v1442_v2  ;;  %v1716_v46 = vld [vmem:[%s3343_s7 + $0x58] sm:$0xff]  ;;  %v1715_v49 = vld [vmem:[%s3343_s7 + $0x50] sm:$0xff] }
 0x4f7   :  { %v1483_v54 = vmul.f32 %v1461_v51, %v3197_v1  ;;  %v1471_v58 = vmul.f32 %v1961_v60, %v1470_v50 }
 0x4f9   :  { %v1485_v11 = vadd.f32 %v1484_v52, %v1483_v54  ;;  %v1472_v19 = vadd.f32 %v1961_v60, %v1471_v58 }
 0x4fb   :  { %1964 = vtanh.f32 %v1485_v11  ;;  %v3212_v57 = vsel %vm1493_vm0, %v1485_v11, %v3197_v1  ;;  %v1476_v61 = vsel %vm1475_vm3, %v1961_v60, %v1472_v19  ;;  %v1679_v1 = vld [vmem:[%s3341_s5 + $0x78] sm:$0xff]  ;;  %v1717_v60 = vld [vmem:[%s3343_s7 + $0x60] sm:$0xff] }
 0x4fc   :  { %v1481_v0 = vsel %vm1478_vm4, %v1480_v33, %v1476_v61  ;;  %1684 = vmatpush.msrb.mxu0 %v1679_v1  ;;  %1728 = vmatpush.msrb.mxu1 %v1717_v60  ;;  %v1712_v1 = vld [vmem:[%s3343_s7 + $0x38] sm:$0xff] }
 0x4fe   :  { %1685 = vmatpush.msrb.mxu0 %v1678_v56  ;;  %1729 = vmatpush.msrb.mxu1 %v1716_v46 }
 0x500   :  { %1686 = vmatpush.msrb.mxu0 %v1677_v4  ;;  %1730 = vmatpush.msrb.mxu1 %v1715_v49 }
 0x501   :  { %v1965_v3 = vpop.eup %1964 }
 0x502   :  { %v1487_v8 = vmul.f32 %v1965_v3, %v1481_v0  ;;  %1731 = vmatpush.msrb.mxu1 %v1714_v53 }
 0x504   :  { %v3215_v55 = vsel %vm1493_vm0, %v1487_v8, %v3200_v10  ;;  %v1676_v10 = vld [vmem:[%s3341_s5 + $0x60] sm:$0xff]  ;;  %1732 = vmatpush.msrb.mxu1 %v1713_v63 }
 0x505   :  { %1519 = vmatmul.f32.vlgmr.msra.gmra.mxu0 %v3215_v55  ;;  %1539 = vmatmul.f32.vlgmr.msra.gmra.mxu1 %v3215_v55 }
 0x506   :  { %1559 = vmatmul.f32.vlgmr.msrb.gmra.mxu2 %v3215_v55  ;;  %1579 = vmatmul.f32.vlgmr.msrb.gmra.mxu3 %v3215_v55 }
 0x507   :  { %1687 = vmatpush.msrb.mxu0 %v1676_v10  ;;  %1733 = vmatpush.msrb.mxu1 %v1712_v1 }
 0x509   :  { %1688 = vmatpush.msrb.mxu0 %v1675_v40 }
 0x50b   :  { %1689 = vmatpush.msrb.mxu0 %v1674_v6 }
 0x50d   :  { %1690 = vmatpush.msrb.mxu0 %v1673_v23 }
 0x50f   :  { %1691 = vmatpush.msrb.mxu0 %v1672_v5  ;;  %v1711_v5 = vld [vmem:[%s3343_s7 + $0x30] sm:$0xff] }
 0x510   :  { %1734 = vmatpush.msrb.mxu1 %v1711_v5 }
 0x511   :  { %1692 = vmatpush.msrb.mxu0 %v1671_v20 }
 0x513   :  { %1693 = vmatpush.msrb.mxu0 %v1670_v13 }
 0x515   :  { %1694 = vmatpush.msrb.mxu0 %v1669_v43 }
 0x517   :  { %1695 = vmatpush.msrb.mxu0 %v1668_v17 }
 0x519   :  { %1696 = vmatpush.msrb.mxu0 %v1667_v35  ;;  %v1654_v35 = vpop.permute.xlu1 %1653 }
 0x51a   :  { %vm1655_vm1 = vcmp.eq.s32.totalorder %v1654_v35, 1 }
 0x51b   :  { %1697 = vmatpush.msrb.mxu0 %v1666_v38  ;;  %v1661_v38 = vpop.permute.xlu2 %1660 }
 0x51c   :  { %vm1662_vm2 = vcmp.eq.s32.totalorder %v1661_v38, 1 }
 0x51d   :  { %1698 = vmatpush.msrb.mxu0 %v1665_v26 }
 0x51f   :  { %1699 = vmatpush.msrb.mxu0 %v1664_v44  ;;  %v1705_v44 = vld [vmem:[%s3343_s7] sm:$0xff] }
 0x582   :  { %v1520_v59 = vpop.f32.mrf.mxu0  ;;  %v1540_v14 = vpop.f32.mrf.mxu1 }
 0x583   :  { %v1583_v27 = vadd.f32 %v1520_v59, %v3681_v28  ;;  %v1584_v9 = vadd.f32 %v1540_v14, %v3682_v7 }
 0x585   :  { %v1835_v24 = vmul.f32 -1.442695, %v1583_v27  ;;  %v1836_v21 = vmul.f32 -1.442695, %v1584_v9  ;;  %v1710_v27 = vld [vmem:[%s3343_s7 + $0x28] sm:$0xff]  ;;  %v1709_v9 = vld [vmem:[%s3343_s7 + $0x20] sm:$0xff] }
 0x586   :  { %1735 = vmatpush.msrb.mxu1 %v1710_v27 }
 0x587   :  { %1966 = vpow2.f32 %v1835_v24 }
 0x588   :  { %1968 = vpow2.f32 %v1836_v21  ;;  %1736 = vmatpush.msrb.mxu1 %v1709_v9 }
 0x589   :  { %v1580_v31 = vpop.f32.mrf.mxu3  ;;  %v1560_v42 = vpop.f32.mrf.mxu2 }
 0x58a   :  { %v1586_v18 = vadd.f32 %v1580_v31, %v3683_v32  ;;  %v1585_v36 = vadd.f32 %v1560_v42, %v3684_v39 }
 0x58c   :  { %v1837_v12 = vmul.f32 -1.442695, %v1586_v18 }
 0x58d   :  { %v1967_v30 = vpop.eup %1966 }
 0x58e   :  { %v1969_v16 = vpop.eup %1968  ;;  %v1590_v45 = vadd.f32 1.0, %v1967_v30  ;;  %1970 = vpow2.f32 %v1837_v12  ;;  %v1707_v12 = vld [vmem:[%s3343_s7 + $0x10] sm:$0xff]  ;;  %v1706_v30 = vld [vmem:[%s3343_s7 + $0x8] sm:$0xff] }
 0x58f   :  { %v1609_v15 = vadd.f32 1.0, %v1969_v16 }
 0x590   :  { %1972 = vrcp.f32 %v1590_v45  ;;  %v1602_v52 = vand.u32 2147483648, %v1590_v45  ;;  %v1600_v11 = vand.u32 2147483647, %v1590_v45  ;;  %vm1596_vm7 = vweird.f32 %v1590_v45 }
 0x591   :  { %1974 = vrcp.f32 %v1609_v15  ;;  %v1621_v54 = vand.u32 2147483648, %v1609_v15  ;;  %v1619_v62 = vand.u32 2147483647, %v1609_v15  ;;  %vm1615_vm8 = vweird.f32 %v1609_v15 }
 0x592   :  { %v1603_v3 = vor.u32 1.1754944e-38, %v1602_v52  ;;  %vm1601_vm11 = vcmp.eq.f32.partialorder %v1600_v11, 8.507059e+37 }
 0x593   :  { %v1622_v56 = vor.u32 1.1754944e-38, %v1621_v54  ;;  %vm1620_vm12 = vcmp.eq.f32.partialorder %v1619_v62, 8.507059e+37 }
 0x594   :  { %v1971_v34 = vpop.eup %1970 }
 0x595   :  { %v3284_v25 = vadd.f32 1.0, %v1971_v34 }
 0x596   :  { %v1973_v37 = vpop.eup %1972 }
 0x597   :  { %v1975_v47 = vpop.eup %1974  ;;  %v1592_v48 = vmul.f32 %v1973_v37, %v1590_v45  ;;  %1976 = vrcp.f32 %v3284_v25  ;;  %vm1597_vm5 = vweird.f32 %v1973_v37  ;;  %v1641_v24 = vand.u32 2147483648, %v3284_v25 }
 0x598   :  { %v1611_v2 = vmul.f32 %v1975_v47, %v1609_v15  ;;  %1978 = vtanh.f32 %v1585_v36  ;;  %vm1616_vm6 = vweird.f32 %v1975_v47  ;;  %vm1598_vm9 = vmor %vm1596_vm7, %vm1597_vm5  ;;  %vm1635_vm14 = vweird.f32 %v3284_v25 }
 0x599   :  { %v1593_v50 = vsub.f32 1.0, %v1592_v48  ;;  %vm1617_vm10 = vmor %vm1615_vm8, %vm1616_vm6  ;;  %v1639_v21 = vand.u32 2147483647, %v3284_v25  ;;  %v1642_v17 = vor.u32 1.1754944e-38, %v1641_v24  ;;  %vm1764_vm6 = vcmask 7168  }
 0x59a   :  { %v1612_v51 = vsub.f32 1.0, %v1611_v2 }
 0x59b   :  { %v1594_v58 = vmul.f32 %v1973_v37, %v1593_v50  ;;  %vm1640_vm0 = vcmp.eq.f32.partialorder %v1639_v21, 8.507059e+37 }
 0x59c   :  { %v1613_v19 = vmul.f32 %v1975_v47, %v1612_v51 }
 0x59d   :  { %v1977_v61 = vpop.eup %1976  ;;  %v1595_v33 = vadd.f32 %v1973_v37, %v1594_v58 }
 0x59e   :  { %v1614_v0 = vadd.f32 %v1975_v47, %v1613_v19  ;;  %v1631_v8 = vmul.f32 %v1977_v61, %v3284_v25  ;;  %v1979_v10 = vpop.eup %1978  ;;  %vm1636_vm13 = vweird.f32 %v1977_v61 }
 0x59f   :  { %v1599_v4 = vsel %vm1598_vm9, %v1973_v37, %v1595_v33  ;;  %vm1637_vm15 = vmor %vm1635_vm14, %vm1636_vm13 }
 0x5a0   :  { %v1604_v40 = vsel %vm1601_vm11, %v1603_v3, %v1599_v4  ;;  %v1618_v6 = vsel %vm1617_vm10, %v1975_v47, %v1614_v0  ;;  %v1632_v23 = vsub.f32 1.0, %v1631_v8 }
 0x5a1   :  { %v1623_v20 = vsel %vm1620_vm12, %v1622_v56, %v1618_v6  ;;  %v1646_v59 = vmul.f32 %v1979_v10, %v1604_v40 }
 0x5a2   :  { %v1645_v14 = vmul.f32 %v1623_v20, %v3212_v57  ;;  %v1633_v28 = vmul.f32 %v1977_v61, %v1632_v23  ;;  %v1708_v57 = vld [vmem:[%s3343_s7 + $0x18] sm:$0xff] }
 0x5a3   :  { %1737 = vmatpush.msrb.mxu1 %v1708_v57 }
 0x5a4   :  { %v1647_v7 = vadd.f32 %v1646_v59, %v1645_v14  ;;  %v1634_v13 = vadd.f32 %v1977_v61, %v1633_v28 }
 0x5a5   :  { %1738 = vmatpush.msrb.mxu1 %v1707_v12 }
 0x5a6   :  { %1980 = vtanh.f32 %v1647_v7  ;;  %v1638_v43 = vsel %vm1637_vm15, %v1977_v61, %v1634_v13 }
 0x5a7   :  { %v1643_v32 = vsel %vm1640_vm0, %v1642_v17, %v1638_v43  ;;  %1739 = vmatpush.msrb.mxu1 %v1706_v30 }
 0x5a9   :  { %1740 = vmatpush.msrb.mxu1 %v1705_v44 }
 0x5ac   :  { %v1981_v31 = vpop.eup %1980 }
 0x5ad   :  { %v1649_v18 = vmul.f32 %v1981_v31, %v1643_v32 }
 0x5af   :  { %v1656_v26 = vsel %vm1655_vm1, %v1649_v18, %v3215_v55  ;;  %v1852_v55 = vld [vmem:[%s3342_s6] ss:$0 sm:$0xff] }
 0x5b0   :  { %1838 = vmatmul.msk.f32.vlgmr.msrb.gmra.mxu0 %vm1662_vm2, %v1656_v26 }
 0x62d   :  { %v1701_v16 = vpop.f32.mrf.mxu0 }
 0x62e   :  { %v1702_v45 = vadd.f32 %v1852_v55, %v1701_v16 }
 0x630   :  { %v1704_v15 = vmax.f32 %v1702_v45, 0.0 }
 0x632   :  { %1741 = vmatmul.f32.vlgmr.msrb.gmra.mxu1 %v1704_v15 }
 0x6af   :  { %v1742_v29 = vpop.f32.mrf.mxu1 }
 0x6b0   :  { %v1743_v41 = vadd.f32 %v1853_v22, %v1742_v29 }
 0x6b2   :  { %v1839_v42 = vmul.f32 -1.442695, %v1743_v41 }
 0x6b4   :  { %1982 = vpow2.f32 %v1839_v42 }
 0x6ba   :  { %v1983_v34 = vpop.eup %1982 }
 0x6bb   :  { %v1748_v60 = vadd.f32 1.0, %v1983_v34 }
 0x6bd   :  { %1984 = vrcp.f32 %v1748_v60  ;;  %v1760_v36 = vand.u32 2147483648, %v1748_v60  ;;  %v1758_v47 = vand.u32 2147483647, %v1748_v60  ;;  %vm1754_vm4 = vweird.f32 %v1748_v60 }
 0x6bf   :  { %v1761_v2 = vor.u32 1.1754944e-38, %v1760_v36  ;;  %vm1759_vm7 = vcmp.eq.f32.partialorder %v1758_v47, 8.507059e+37 }
 0x6c3   :  { %v1985_v25 = vpop.eup %1984 }
 0x6c4   :  { %v1750_v37 = vmul.f32 %v1985_v25, %v1748_v60  ;;  %vm1755_vm3 = vweird.f32 %v1985_v25 }
 0x6c5   :  { %vm1756_vm5 = vmor %vm1754_vm4, %vm1755_vm3 }
 0x6c6   :  { %v1751_v39 = vsub.f32 1.0, %v1750_v37 }
 0x6c8   :  { %v1752_v46 = vmul.f32 %v1985_v25, %v1751_v39 }
 0x6ca   :  { %v1753_v48 = vadd.f32 %v1985_v25, %v1752_v46 }
 0x6cc   :  { %v1757_v49 = vsel %vm1756_vm5, %v1985_v25, %v1753_v48 }
 0x6cd   :  { %v1762_v50 = vsel %vm1759_vm7, %v1761_v2, %v1757_v49 }
 0x6ce   :  { %1765 = vst.msk [vmem:[%s3345_s9] sm:$0xff] %vm1764_vm6, %v1762_v50 }
 0x6cf   :  { %1770 = vsyncpa [#allocation5], 1 }

</bundles_post_ra>
